<compile_context>
chip_gen: v7x
topology: tpu7x:2x2x1
jax: 0.10.0
libtpu: 0.0.40
codegen_flags: <defaults>
</compile_context>

<pallas_src>
import functools

import jax
import jax.numpy as jnp
from jax.experimental import pallas as pl
from jax.experimental.pallas import tpu as pltpu

# ----------------------------- configuration --------------------------------
B = 2            # batch
M = 32           # input sequence length
C_IN = 16        # input feature dim
N_LAT = 16       # number of latents
D_LAT = 64       # latent dim
Q_LEN = 8        # decoder query length
Q_DIM = 32       # decoder query dim
PROJ_DIM = 10    # decoder projection dim
PROJ_PAD = 128   # lane-dense padding for the final (only) HBM store
CROSS_HEADS = 1  # encoder cross-attention heads
SELF_HEADS = 4   # encoder self-attention heads
DEC_HEADS = 1    # decoder cross-attention heads
NUM_BLOCKS = 2               # encoder blocks (weight-shared, like the reference)
NUM_SELF_PER_BLOCK = 1       # self-attention layers per block
CROSS_WIDENING = 1
SELF_WIDENING = 4
DEC_WIDENING = 1
LN_EPS = 1e-5

SMALL_W = 64     # lane width of the "small" weight slab
WIDE_W = 256     # lane width of the "wide" weight slab


# ----------------------------- fused Pallas kernel ---------------------------
def _fused_kernel(x_ref, qry_ref, ws_ref, ww_ref, out_ref, *, layout):
    """Single invocation: full PerceiverIO forward, all weights resident in VMEM."""
    slabs = (ws_ref, ww_ref)

    def get(name):
        slab, r0, rows, cols = layout[name]          # static python ints
        return slabs[slab][pl.ds(r0, rows), pl.ds(0, cols)]

    def ln(x, pre):
        g = get(pre + "_g")                          # (1, D)
        b = get(pre + "_b")                          # (1, D)
        mu = jnp.mean(x, axis=-1, keepdims=True)
        var = jnp.mean((x - mu) ** 2, axis=-1, keepdims=True)   # biased, like torch
        return (x - mu) * jax.lax.rsqrt(var + LN_EPS) * g + b

    def softmax(s):
        s = s - jnp.max(s, axis=-1, keepdims=True)
        p = jnp.exp(s)
        return p * pl.reciprocal(jnp.sum(p, axis=-1, keepdims=True), approx=True)

    def attend(q, k, v, lq, lk, heads):
        # q: (B*lq, d), k/v: (B*lk, d).  Only the score / P.V matmuls are
        # per-batch / per-head; heads come from static lane slices of values.
        dh = q.shape[-1] // heads
        scale = float(dh) ** -0.5
        outs = []
        for b in range(B):                           # static batch loop
            qb = q[b * lq:(b + 1) * lq]
            kb = k[b * lk:(b + 1) * lk]
            vb = v[b * lk:(b + 1) * lk]
            hout = []
            for h in range(heads):                   # static head loop
                sl = slice(h * dh, (h + 1) * dh)
                s = jax.lax.dot_general(
                    qb[:, sl], kb[:, sl], (((1,), (1,)), ((), ())),
                    preferred_element_type=jnp.float32) * scale
                hout.append(jnp.dot(softmax(s), vb[:, sl],
                                    preferred_element_type=jnp.float32))
            outs.append(hout[0] if heads == 1 else jnp.concatenate(hout, axis=-1))
        return jnp.concatenate(outs, axis=0)

    def mha(xq, xkv, pre, lq, lk, heads):
        # Full-width, head-shared projection matmuls (one MXU push each).
        q = jnp.dot(xq, get(pre + "wq"),
                    preferred_element_type=jnp.float32) + get(pre + "bq")
        k = jnp.dot(xkv, get(pre + "wk"),
                    preferred_element_type=jnp.float32) + get(pre + "bk")
        v = jnp.dot(xkv, get(pre + "wv"),
                    preferred_element_type=jnp.float32) + get(pre + "bv")
        o = attend(q, k, v, lq, lk, heads)
        return jnp.dot(o, get(pre + "wo"),
                       preferred_element_type=jnp.float32) + get(pre + "bo")

    def gelu(x):
        return 0.5 * x * (1.0 + jax.lax.erf(x * 0.7071067811865476))  # exact GELU

    def ffn(x, pre):
        h = jnp.dot(x, get(pre + "ffn_w1"),
                    preferred_element_type=jnp.float32) + get(pre + "ffn_b1")
        h = gelu(h)
        return jnp.dot(h, get(pre + "ffn_w2"),
                       preferred_element_type=jnp.float32) + get(pre + "ffn_b2")

    def cross_block(x_q, x_kv, pre, lq, lk, heads, use_query_residual):
        kv_n = ln(x_kv, pre + "ln_kv")
        q_n = ln(x_q, pre + "ln_q")
        attn = mha(q_n, kv_n, pre, lq, lk, heads)
        x = x_q + attn if use_query_residual else attn
        return x + ffn(ln(x, pre + "ln_mlp"), pre)

    def self_block(x, pre, l, heads):
        x = x + mha(ln(x, pre + "ln1"), ln(x, pre + "ln1"), pre, l, l, heads)
        return x + ffn(ln(x, pre + "ln2"), pre)

    x = x_ref[...]                         # (B*M, C_IN), batch stacked on sublanes
    qry = qry_ref[...]                     # (B*Q_LEN, Q_DIM)
    lat0 = get("latents")                  # (N_LAT, D_LAT), shared across batch
    lat = jnp.concatenate([lat0] * B, axis=0)   # (B*N_LAT, D_LAT)

    # Encoder: cross-attend latents to inputs, then weight-shared self blocks.
    lat = cross_block(lat, x, "enc_cross/", N_LAT, M, CROSS_HEADS,
                      use_query_residual=True)
    for _ in range(NUM_BLOCKS):
        for li in range(NUM_SELF_PER_BLOCK):
            lat = self_block(lat, f"enc_self{li}/", N_LAT, SELF_HEADS)

    # Decoder: queries cross-attend to latents, then project (lane-padded).
    dec = cross_block(qry, lat, "dec_cross/", Q_LEN, N_LAT, DEC_HEADS,
                      use_query_residual=False)
    out_ref[...] = (jnp.dot(dec, get("proj_w"), preferred_element_type=jnp.float32)
                    + get("proj_b"))


# --------------------- weight packing (once, at init time) -------------------
def pack_weights(params):
    """Pack all weights into two contiguous f32 slabs + a static layout table.

    Every sub-array is padded to a multiple of 8 rows so all in-kernel reads
    are sublane-aligned static slices.  Arrays with <=64 cols go to the 64-lane
    slab, the rest (self-FFN hidden, padded projection) to the 256-lane slab.
    """
    entries = []

    def add(name, arr):
        arr = jnp.asarray(arr, jnp.float32)
        if arr.ndim == 1:
            arr = arr[None, :]
        entries.append((name, arr))

    add("latents", params["latents"])

    def add_attn(pre, p):
        add(pre + "wq", p["wq"]); add(pre + "bq", p["bq"])
        add(pre + "wk", p["wk"]); add(pre + "bk", p["bk"])
        add(pre + "wv", p["wv"]); add(pre + "bv", p["bv"])
        add(pre + "wo", p["wo"]); add(pre + "bo", p["bo"])

    def add_ffn(pre, p):
        add(pre + "ffn_w1", p["w1"]); add(pre + "ffn_b1", p["b1"])
        add(pre + "ffn_w2", p["w2"]); add(pre + "ffn_b2", p["b2"])

    def add_cross(pre, p):
        add(pre + "ln_kv_g", p["ln_kv_g"]); add(pre + "ln_kv_b", p["ln_kv_b"])
        add(pre + "ln_q_g", p["ln_q_g"]);   add(pre + "ln_q_b", p["ln_q_b"])
        add_attn(pre, p["attn"])
        add(pre + "ln_mlp_g", p["ln_mlp_g"]); add(pre + "ln_mlp_b", p["ln_mlp_b"])
        add_ffn(pre, p["ffn"])

    def add_self(pre, p):
        add(pre + "ln1_g", p["ln1_g"]); add(pre + "ln1_b", p["ln1_b"])
        add_attn(pre, p["attn"])
        add(pre + "ln2_g", p["ln2_g"]); add(pre + "ln2_b", p["ln2_b"])
        add_ffn(pre, p["ffn"])

    add_cross("enc_cross/", params["enc_cross"])
    for li, p_layer in enumerate(params["enc_self"]):
        add_self(f"enc_self{li}/", p_layer)
    add_cross("dec_cross/", params["dec_cross"])

    # Final projection padded to 128 lanes -> the kernel's single HBM store is
    # an unmasked, lane-dense (B*Q_LEN, 128) slab (sliced back in the wrapper).
    pw = jnp.zeros((Q_DIM, PROJ_PAD), jnp.float32).at[:, :PROJ_DIM].set(params["proj_w"])
    pb = jnp.zeros((1, PROJ_PAD), jnp.float32).at[:, :PROJ_DIM].set(
        params["proj_b"][None, :])
    add("proj_w", pw)
    add("proj_b", pb)

    small = [(n, a) for n, a in entries if a.shape[1] <= SMALL_W]
    wide = [(n, a) for n, a in entries if a.shape[1] > SMALL_W]

    def build(items, width):
        lay, blocks, r = {}, [], 0
        for name, arr in items:
            rows, cols = arr.shape
            rpad = (-rows) % 8                         # keep 8-row alignment
            blocks.append(jnp.pad(arr, ((0, rpad), (0, width - cols))))
            lay[name] = (r, rows, cols)
            r += rows + rpad
        return jnp.concatenate(blocks, axis=0), lay

    small_slab, lo_s = build(small, SMALL_W)
    wide_slab, lo_w = build(wide, WIDE_W)
    layout = {n: (0,) + v for n, v in lo_s.items()}
    layout.update({n: (1,) + v for n, v in lo_w.items()})
    return (small_slab, wide_slab), layout


def make_forward(layout):
    kernel = functools.partial(_fused_kernel, layout=layout)

    @jax.jit
    def forward(small_slab, wide_slab, inputs, query):
        bsz, seq_in, c_in = inputs.shape
        _, q_len, q_dim = query.shape
        assert bsz == B and seq_in == M and q_len == Q_LEN
        x2d = inputs.reshape(bsz * seq_in, c_in)       # batch folded along sublanes
        q2d = query.reshape(bsz * q_len, q_dim)
        out2d = pl.pallas_call(
            kernel,
            out_shape=jax.ShapeDtypeStruct((bsz * q_len, PROJ_PAD), jnp.float32),
            grid=(1,),                                  # single fat step (latency-bound)
            in_specs=[
                pl.BlockSpec(x2d.shape, lambda i: (0, 0)),
                pl.BlockSpec(q2d.shape, lambda i: (0, 0)),
                pl.BlockSpec(small_slab.shape, lambda i: (0, 0)),
                pl.BlockSpec(wide_slab.shape, lambda i: (0, 0)),
            ],
            out_specs=pl.BlockSpec((bsz * q_len, PROJ_PAD), lambda i: (0, 0)),
            compiler_params=pltpu.CompilerParams(
                dimension_semantics=("arbitrary",)),
        )(x2d, q2d, small_slab, wide_slab)
        return out2d[:, :PROJ_DIM].reshape(bsz, q_len, PROJ_DIM)

    return forward


# -------------------------- pure-JAX reference path --------------------------
_HI = jax.lax.Precision.HIGHEST


def _ref_ln(x, g, b):
    mu = x.mean(-1, keepdims=True)
    var = ((x - mu) ** 2).mean(-1, keepdims=True)
    return (x - mu) / jnp.sqrt(var + LN_EPS) * g + b


def _ref_mha(x_q, x_kv, p, num_heads):
    q = jnp.matmul(x_q, p["wq"], precision=_HI) + p["bq"]
    k = jnp.matmul(x_kv, p["wk"], precision=_HI) + p["bk"]
    v = jnp.matmul(x_kv, p["wv"], precision=_HI) + p["bv"]
    bsz, lq, qk = q.shape
    d_qk = qk // num_heads
    d_v = v.shape[-1] // num_heads
    qh = q.reshape(bsz, lq, num_heads, d_qk).transpose(0, 2, 1, 3)
    kh = k.reshape(bsz, -1, num_heads, d_qk).transpose(0, 2, 1, 3)
    vh = v.reshape(bsz, -1, num_heads, d_v).transpose(0, 2, 1, 3)
    s = jnp.einsum("bhqd,bhkd->bhqk", qh, kh, precision=_HI) * (d_qk ** -0.5)
    a = jax.nn.softmax(s, axis=-1)
    o = jnp.einsum("bhqk,bhkd->bhqd", a, vh, precision=_HI)
    o = o.transpose(0, 2, 1, 3).reshape(bsz, lq, -1)
    return jnp.matmul(o, p["wo"], precision=_HI) + p["bo"]


def _ref_ffn(x, p):
    h = jnp.matmul(x, p["w1"], precision=_HI) + p["b1"]
    h = 0.5 * h * (1.0 + jax.lax.erf(h * 0.7071067811865476))
    return jnp.matmul(h, p["w2"], precision=_HI) + p["b2"]


def _ref_cross_block(p, x_q, x_kv, num_heads, use_query_residual):
    kv_n = _ref_ln(x_kv, p["ln_kv_g"], p["ln_kv_b"])
    q_n = _ref_ln(x_q, p["ln_q_g"], p["ln_q_b"])
    attn = _ref_mha(q_n, kv_n, p["attn"], num_heads)
    x = x_q + attn if use_query_residual else attn
    x_n = _ref_ln(x, p["ln_mlp_g"], p["ln_mlp_b"])
    return x + _ref_ffn(x_n, p["ffn"])


def _ref_self_block(p, x, num_heads):
    x_n = _ref_ln(x, p["ln1_g"], p["ln1_b"])
    x = x + _ref_mha(x_n, x_n, p["attn"], num_heads)
    x_n = _ref_ln(x, p["ln2_g"], p["ln2_b"])
    return x + _ref_ffn(x_n, p["ffn"])


def ref_forward(params, inputs, query):
    bsz = inputs.shape[0]
    latents = jnp.broadcast_to(params["latents"][None],
                               (bsz,) + params["latents"].shape)
    latents = _ref_cross_block(params["enc_cross"], latents, inputs,
                               CROSS_HEADS, use_query_residual=True)
    for _ in range(NUM_BLOCKS):
        for p_layer in params["enc_self"]:
            latents = _ref_self_block(p_layer, latents, SELF_HEADS)
    out = _ref_cross_block(params["dec_cross"], query, latents,
                           DEC_HEADS, use_query_residual=False)
    return jnp.matmul(out, params["proj_w"], precision=_HI) + params["proj_b"]


# ------------------------------ parameter init --------------------------------
def init_params(key):
    keys = iter(jax.random.split(key, 128))

    def lin(d_in, d_out):
        kw, kb = jax.random.split(next(keys))
        w = 0.02 * jax.random.normal(kw, (d_in, d_out), jnp.float32)
        b = 0.02 * jax.random.normal(kb, (d_out,), jnp.float32)
        return w, b

    def ln(d):
        return jnp.ones((d,), jnp.float32), jnp.zeros((d,), jnp.float32)

    def mha_params(kv_dim, q_dim):
        # qk_out_dim = v_out_dim = output_dim = q_dim (module defaults)
        wq, bq = lin(q_dim, q_dim)
        wk, bk = lin(kv_dim, q_dim)
        wv, bv = lin(kv_dim, q_dim)
        wo, bo = lin(q_dim, q_dim)
        return dict(wq=wq, bq=bq, wk=wk, bk=bk, wv=wv, bv=bv, wo=wo, bo=bo)

    def ffn_params(d, widening):
        w1, b1 = lin(d, d * widening)
        w2, b2 = lin(d * widening, d)
        return dict(w1=w1, b1=b1, w2=w2, b2=b2)

    def cross_params(kv_dim, q_dim, widening):
        g_kv, b_kv = ln(kv_dim)
        g_q, b_q = ln(q_dim)
        g_m, b_m = ln(q_dim)
        return dict(ln_kv_g=g_kv, ln_kv_b=b_kv, ln_q_g=g_q, ln_q_b=b_q,
                    attn=mha_params(kv_dim, q_dim),
                    ln_mlp_g=g_m, ln_mlp_b=b_m, ffn=ffn_params(q_dim, widening))

    def self_params(d, widening):
        g1, b1 = ln(d)
        g2, b2 = ln(d)
        return dict(ln1_g=g1, ln1_b=b1, attn=mha_params(d, d),
                    ln2_g=g2, ln2_b=b2, ffn=ffn_params(d, widening))

    proj_w, proj_b = lin(Q_DIM, PROJ_DIM)
    return dict(
        latents=jax.random.normal(next(keys), (N_LAT, D_LAT), jnp.float32),
        enc_cross=cross_params(C_IN, D_LAT, CROSS_WIDENING),
        enc_self=[self_params(D_LAT, SELF_WIDENING)
                  for _ in range(NUM_SELF_PER_BLOCK)],
        dec_cross=cross_params(D_LAT, Q_DIM, DEC_WIDENING),
        proj_w=proj_w, proj_b=proj_b,
    )


# ----------------------------------- main -------------------------------------
if __name__ == "__main__":
    key = jax.random.PRNGKey(0)
    k_param, k_x, k_q = jax.random.split(key, 3)
    params = init_params(k_param)
    inputs = jax.random.normal(k_x, (B, M, C_IN), jnp.float32)
    query = jax.random.normal(k_q, (B, Q_LEN, Q_DIM), jnp.float32)

    # Weight packing happens ONCE here, outside the per-call jitted path.
    (small_slab, wide_slab), layout = pack_weights(params)
    forward = make_forward(layout)

    out = forward(small_slab, wide_slab, inputs, query)
    out = jax.block_until_ready(out)
    assert out.shape == (B, Q_LEN, PROJ_DIM), out.shape

    ref = ref_forward(params, inputs, query)
    err = float(jnp.max(jnp.abs(out - ref)))
    # Kernel runs default (single-pass MXU) matmul precision + approx softmax
    # reciprocal; reference runs HIGHEST precision. Measured error ~1e-4.
    assert err < 2e-3, f"Pallas vs reference mismatch: max abs err = {err}"

    print("KERNEL_OK")
</pallas_src>

<mosaic_0001>
module attributes {stable_mosaic.version = 11 : i64} {
  func.func @_fused_kernel(%arg0: i32, %arg1: memref<64x16xf32, #tpu.memory_space<vmem>>, %arg2: memref<16x32xf32, #tpu.memory_space<vmem>>, %arg3: memref<1336x64xf32, #tpu.memory_space<vmem>>, %arg4: memref<112x256xf32, #tpu.memory_space<vmem>>, %arg5: memref<16x128xf32, #tpu.memory_space<vmem>>) attributes {dimension_semantics = [#tpu.dimension_semantics<arbitrary>], iteration_bounds = array<i64: 1>, scalar_prefetch = 0 : i64, scratch_operands = 0 : i64, tpu.core_type = #tpu.core_type<tc>, window_params = [{pipeline_mode = #tpu.pipeline_mode<synchronous>, transform_indices = @transform_0, window_bounds = array<i64: 64, 16>}, {pipeline_mode = #tpu.pipeline_mode<synchronous>, transform_indices = @transform_1, window_bounds = array<i64: 16, 32>}, {pipeline_mode = #tpu.pipeline_mode<synchronous>, transform_indices = @transform_2, window_bounds = array<i64: 1336, 64>}, {pipeline_mode = #tpu.pipeline_mode<synchronous>, transform_indices = @transform_3, window_bounds = array<i64: 112, 256>}, {pipeline_mode = #tpu.pipeline_mode<synchronous>, transform_indices = @transform_4, window_bounds = array<i64: 16, 128>}]} {
    %c0 = arith.constant 0 : index
    %c0_0 = arith.constant 0 : index
    %0 = vector.load %arg1[%c0, %c0_0] : memref<64x16xf32, #tpu.memory_space<vmem>>, vector<64x16xf32>
    %c0_1 = arith.constant 0 : index
    %c0_2 = arith.constant 0 : index
    %1 = vector.load %arg2[%c0_1, %c0_2] : memref<16x32xf32, #tpu.memory_space<vmem>>, vector<16x32xf32>
    %c0_3 = arith.constant 0 : index
    %c0_4 = arith.constant 0 : index
    %2 = vector.load %arg3[%c0_3, %c0_4] : memref<1336x64xf32, #tpu.memory_space<vmem>>, vector<16x64xf32>
    %3 = tpu.concatenate %2, %2 in 0 : vector<16x64xf32>, vector<16x64xf32> -> vector<32x64xf32>
    %c16 = arith.constant 16 : index
    %c0_5 = arith.constant 0 : index
    %4 = vector.load %arg3[%c16, %c0_5] : memref<1336x64xf32, #tpu.memory_space<vmem>>, vector<1x16xf32>
    %c24 = arith.constant 24 : index
    %c0_6 = arith.constant 0 : index
    %5 = vector.load %arg3[%c24, %c0_6] : memref<1336x64xf32, #tpu.memory_space<vmem>>, vector<1x16xf32>
    %cst = arith.constant dense<0.000000e+00> : vector<64xf32>
    %6 = vector.multi_reduction <add>, %0, %cst [1] : vector<64x16xf32> to vector<64xf32>
    %7 = vector.shape_cast %6 : vector<64xf32> to vector<64x1xf32>
    %cst_7 = arith.constant 1.600000e+01 : f32
    %8 = vector.broadcast %cst_7 : f32 to vector<64x1xf32>
    %9 = arith.divf %7, %8 : vector<64x1xf32>
    %10 = vector.broadcast %9 : vector<64x1xf32> to vector<64x16xf32>
    %11 = arith.subf %0, %10 : vector<64x16xf32>
    %12 = arith.mulf %11, %11 : vector<64x16xf32>
    %cst_8 = arith.constant dense<0.000000e+00> : vector<64xf32>
    %13 = vector.multi_reduction <add>, %12, %cst_8 [1] : vector<64x16xf32> to vector<64xf32>
    %14 = vector.shape_cast %13 : vector<64xf32> to vector<64x1xf32>
    %cst_9 = arith.constant 1.600000e+01 : f32
    %15 = vector.broadcast %cst_9 : f32 to vector<64x1xf32>
    %16 = arith.divf %14, %15 : vector<64x1xf32>
    %17 = vector.broadcast %9 : vector<64x1xf32> to vector<64x16xf32>
    %18 = arith.subf %0, %17 : vector<64x16xf32>
    %cst_10 = arith.constant 9.99999974E-6 : f32
    %19 = vector.broadcast %cst_10 : f32 to vector<64x1xf32>
    %20 = arith.addf %16, %19 : vector<64x1xf32>
    %21 = math.rsqrt %20 : vector<64x1xf32>
    %22 = vector.broadcast %21 : vector<64x1xf32> to vector<64x16xf32>
    %23 = arith.mulf %18, %22 : vector<64x16xf32>
    %24 = vector.broadcast %4 : vector<1x16xf32> to vector<64x16xf32>
    %25 = arith.mulf %23, %24 : vector<64x16xf32>
    %26 = vector.broadcast %5 : vector<1x16xf32> to vector<64x16xf32>
    %27 = arith.addf %25, %26 : vector<64x16xf32>
    %c32 = arith.constant 32 : index
    %c0_11 = arith.constant 0 : index
    %28 = vector.load %arg3[%c32, %c0_11] : memref<1336x64xf32, #tpu.memory_space<vmem>>, vector<1x64xf32>
    %c40 = arith.constant 40 : index
    %c0_12 = arith.constant 0 : index
    %29 = vector.load %arg3[%c40, %c0_12] : memref<1336x64xf32, #tpu.memory_space<vmem>>, vector<1x64xf32>
    %cst_13 = arith.constant dense<0.000000e+00> : vector<32xf32>
    %30 = vector.multi_reduction <add>, %3, %cst_13 [1] : vector<32x64xf32> to vector<32xf32>
    %31 = vector.shape_cast %30 : vector<32xf32> to vector<32x1xf32>
    %cst_14 = arith.constant 6.400000e+01 : f32
    %32 = vector.broadcast %cst_14 : f32 to vector<32x1xf32>
    %33 = arith.divf %31, %32 : vector<32x1xf32>
    %34 = vector.broadcast %33 : vector<32x1xf32> to vector<32x64xf32>
    %35 = arith.subf %3, %34 : vector<32x64xf32>
    %36 = arith.mulf %35, %35 : vector<32x64xf32>
    %cst_15 = arith.constant dense<0.000000e+00> : vector<32xf32>
    %37 = vector.multi_reduction <add>, %36, %cst_15 [1] : vector<32x64xf32> to vector<32xf32>
    %38 = vector.shape_cast %37 : vector<32xf32> to vector<32x1xf32>
    %cst_16 = arith.constant 6.400000e+01 : f32
    %39 = vector.broadcast %cst_16 : f32 to vector<32x1xf32>
    %40 = arith.divf %38, %39 : vector<32x1xf32>
    %41 = vector.broadcast %33 : vector<32x1xf32> to vector<32x64xf32>
    %42 = arith.subf %3, %41 : vector<32x64xf32>
    %cst_17 = arith.constant 9.99999974E-6 : f32
    %43 = vector.broadcast %cst_17 : f32 to vector<32x1xf32>
    %44 = arith.addf %40, %43 : vector<32x1xf32>
    %45 = math.rsqrt %44 : vector<32x1xf32>
    %46 = vector.broadcast %45 : vector<32x1xf32> to vector<32x64xf32>
    %47 = arith.mulf %42, %46 : vector<32x64xf32>
    %48 = vector.broadcast %28 : vector<1x64xf32> to vector<32x64xf32>
    %49 = arith.mulf %47, %48 : vector<32x64xf32>
    %50 = vector.broadcast %29 : vector<1x64xf32> to vector<32x64xf32>
    %51 = arith.addf %49, %50 : vector<32x64xf32>
    %c48 = arith.constant 48 : index
    %c0_18 = arith.constant 0 : index
    %52 = vector.load %arg3[%c48, %c0_18] : memref<1336x64xf32, #tpu.memory_space<vmem>>, vector<64x64xf32>
    %cst_19 = arith.constant dense<0.000000e+00> : vector<32x64xf32>
    %53 = tpu.matmul %51, %52, %cst_19 {dimension_numbers = #tpu.dot_dimension_numbers<[1], [0], [0], [1], [0, 0, 1, 1], [], []>} : vector<32x64xf32>, vector<64x64xf32>, vector<32x64xf32> -> vector<32x64xf32>
    %c112 = arith.constant 112 : index
    %c0_20 = arith.constant 0 : index
    %54 = vector.load %arg3[%c112, %c0_20] : memref<1336x64xf32, #tpu.memory_space<vmem>>, vector<1x64xf32>
    %55 = vector.broadcast %54 : vector<1x64xf32> to vector<32x64xf32>
    %56 = arith.addf %53, %55 : vector<32x64xf32>
    %c120 = arith.constant 120 : index
    %c0_21 = arith.constant 0 : index
    %57 = vector.load %arg3[%c120, %c0_21] : memref<1336x64xf32, #tpu.memory_space<vmem>>, vector<16x64xf32>
    %cst_22 = arith.constant dense<0.000000e+00> : vector<64x64xf32>
    %58 = tpu.matmul %27, %57, %cst_22 {dimension_numbers = #tpu.dot_dimension_numbers<[1], [0], [0], [1], [0, 0, 1, 1], [], []>} : vector<64x16xf32>, vector<16x64xf32>, vector<64x64xf32> -> vector<64x64xf32>
    %c136 = arith.constant 136 : index
    %c0_23 = arith.constant 0 : index
    %59 = vector.load %arg3[%c136, %c0_23] : memref<1336x64xf32, #tpu.memory_space<vmem>>, vector<1x64xf32>
    %60 = vector.broadcast %59 : vector<1x64xf32> to vector<64x64xf32>
    %61 = arith.addf %58, %60 : vector<64x64xf32>
    %c144 = arith.constant 144 : index
    %c0_24 = arith.constant 0 : index
    %62 = vector.load %arg3[%c144, %c0_24] : memref<1336x64xf32, #tpu.memory_space<vmem>>, vector<16x64xf32>
    %cst_25 = arith.constant dense<0.000000e+00> : vector<64x64xf32>
    %63 = tpu.matmul %27, %62, %cst_25 {dimension_numbers = #tpu.dot_dimension_numbers<[1], [0], [0], [1], [0, 0, 1, 1], [], []>} : vector<64x16xf32>, vector<16x64xf32>, vector<64x64xf32> -> vector<64x64xf32>
    %c160 = arith.constant 160 : index
    %c0_26 = arith.constant 0 : index
    %64 = vector.load %arg3[%c160, %c0_26] : memref<1336x64xf32, #tpu.memory_space<vmem>>, vector<1x64xf32>
    %65 = vector.broadcast %64 : vector<1x64xf32> to vector<64x64xf32>
    %66 = arith.addf %63, %65 : vector<64x64xf32>
    %67 = vector.extract_strided_slice %56 {offsets = [0, 0], sizes = [16, 64], strides = [1, 1]} : vector<32x64xf32> to vector<16x64xf32>
    %68 = vector.extract_strided_slice %61 {offsets = [0, 0], sizes = [32, 64], strides = [1, 1]} : vector<64x64xf32> to vector<32x64xf32>
    %69 = vector.extract_strided_slice %66 {offsets = [0, 0], sizes = [32, 64], strides = [1, 1]} : vector<64x64xf32> to vector<32x64xf32>
    %cst_27 = arith.constant dense<0.000000e+00> : vector<16x32xf32>
    %70 = tpu.matmul %67, %68, %cst_27 {dimension_numbers = #tpu.dot_dimension_numbers<[1], [1], [0], [0], [0, 0, 1, 0], [], []>} : vector<16x64xf32>, vector<32x64xf32>, vector<16x32xf32> -> vector<16x32xf32>
    %cst_28 = arith.constant 1.250000e-01 : f32
    %71 = vector.broadcast %cst_28 : f32 to vector<16x32xf32>
    %72 = arith.mulf %70, %71 : vector<16x32xf32>
    %cst_29 = arith.constant dense<0xFF800000> : vector<16xf32>
    %73 = vector.multi_reduction <maximumf>, %72, %cst_29 [1] : vector<16x32xf32> to vector<16xf32>
    %74 = vector.shape_cast %73 : vector<16xf32> to vector<16x1xf32>
    %75 = vector.broadcast %74 : vector<16x1xf32> to vector<16x32xf32>
    %76 = arith.subf %72, %75 : vector<16x32xf32>
    %77 = math.exp %76 : vector<16x32xf32>
    %cst_30 = arith.constant dense<0.000000e+00> : vector<16xf32>
    %78 = vector.multi_reduction <add>, %77, %cst_30 [1] : vector<16x32xf32> to vector<16xf32>
    %79 = vector.shape_cast %78 : vector<16xf32> to vector<16x1xf32>
    %80 = tpu.reciprocal %79 {approx = true} : vector<16x1xf32> -> vector<16x1xf32>
    %81 = vector.broadcast %80 : vector<16x1xf32> to vector<16x32xf32>
    %82 = arith.mulf %77, %81 : vector<16x32xf32>
    %cst_31 = arith.constant dense<0.000000e+00> : vector<16x64xf32>
    %83 = tpu.matmul %82, %69, %cst_31 {dimension_numbers = #tpu.dot_dimension_numbers<[1], [0], [0], [1], [0, 0, 1, 1], [], []>} : vector<16x32xf32>, vector<32x64xf32>, vector<16x64xf32> -> vector<16x64xf32>
    %84 = vector.extract_strided_slice %56 {offsets = [16, 0], sizes = [16, 64], strides = [1, 1]} : vector<32x64xf32> to vector<16x64xf32>
    %85 = vector.extract_strided_slice %61 {offsets = [32, 0], sizes = [32, 64], strides = [1, 1]} : vector<64x64xf32> to vector<32x64xf32>
    %86 = vector.extract_strided_slice %66 {offsets = [32, 0], sizes = [32, 64], strides = [1, 1]} : vector<64x64xf32> to vector<32x64xf32>
    %cst_32 = arith.constant dense<0.000000e+00> : vector<16x32xf32>
    %87 = tpu.matmul %84, %85, %cst_32 {dimension_numbers = #tpu.dot_dimension_numbers<[1], [1], [0], [0], [0, 0, 1, 0], [], []>} : vector<16x64xf32>, vector<32x64xf32>, vector<16x32xf32> -> vector<16x32xf32>
    %cst_33 = arith.constant 1.250000e-01 : f32
    %88 = vector.broadcast %cst_33 : f32 to vector<16x32xf32>
    %89 = arith.mulf %87, %88 : vector<16x32xf32>
    %cst_34 = arith.constant dense<0xFF800000> : vector<16xf32>
    %90 = vector.multi_reduction <maximumf>, %89, %cst_34 [1] : vector<16x32xf32> to vector<16xf32>
    %91 = vector.shape_cast %90 : vector<16xf32> to vector<16x1xf32>
    %92 = vector.broadcast %91 : vector<16x1xf32> to vector<16x32xf32>
    %93 = arith.subf %89, %92 : vector<16x32xf32>
    %94 = math.exp %93 : vector<16x32xf32>
    %cst_35 = arith.constant dense<0.000000e+00> : vector<16xf32>
    %95 = vector.multi_reduction <add>, %94, %cst_35 [1] : vector<16x32xf32> to vector<16xf32>
    %96 = vector.shape_cast %95 : vector<16xf32> to vector<16x1xf32>
    %97 = tpu.reciprocal %96 {approx = true} : vector<16x1xf32> -> vector<16x1xf32>
    %98 = vector.broadcast %97 : vector<16x1xf32> to vector<16x32xf32>
    %99 = arith.mulf %94, %98 : vector<16x32xf32>
    %cst_36 = arith.constant dense<0.000000e+00> : vector<16x64xf32>
    %100 = tpu.matmul %99, %86, %cst_36 {dimension_numbers = #tpu.dot_dimension_numbers<[1], [0], [0], [1], [0, 0, 1, 1], [], []>} : vector<16x32xf32>, vector<32x64xf32>, vector<16x64xf32> -> vector<16x64xf32>
    %101 = tpu.concatenate %83, %100 in 0 : vector<16x64xf32>, vector<16x64xf32> -> vector<32x64xf32>
    %c168 = arith.constant 168 : index
    %c0_37 = arith.constant 0 : index
    %102 = vector.load %arg3[%c168, %c0_37] : memref<1336x64xf32, #tpu.memory_space<vmem>>, vector<64x64xf32>
    %cst_38 = arith.constant dense<0.000000e+00> : vector<32x64xf32>
    %103 = tpu.matmul %101, %102, %cst_38 {dimension_numbers = #tpu.dot_dimension_numbers<[1], [0], [0], [1], [0, 0, 1, 1], [], []>} : vector<32x64xf32>, vector<64x64xf32>, vector<32x64xf32> -> vector<32x64xf32>
    %c232 = arith.constant 232 : index
    %c0_39 = arith.constant 0 : index
    %104 = vector.load %arg3[%c232, %c0_39] : memref<1336x64xf32, #tpu.memory_space<vmem>>, vector<1x64xf32>
    %105 = vector.broadcast %104 : vector<1x64xf32> to vector<32x64xf32>
    %106 = arith.addf %103, %105 : vector<32x64xf32>
    %107 = arith.addf %3, %106 : vector<32x64xf32>
    %c240 = arith.constant 240 : index
    %c0_40 = arith.constant 0 : index
    %108 = vector.load %arg3[%c240, %c0_40] : memref<1336x64xf32, #tpu.memory_space<vmem>>, vector<1x64xf32>
    %c248 = arith.constant 248 : index
    %c0_41 = arith.constant 0 : index
    %109 = vector.load %arg3[%c248, %c0_41] : memref<1336x64xf32, #tpu.memory_space<vmem>>, vector<1x64xf32>
    %cst_42 = arith.constant dense<0.000000e+00> : vector<32xf32>
    %110 = vector.multi_reduction <add>, %107, %cst_42 [1] : vector<32x64xf32> to vector<32xf32>
    %111 = vector.shape_cast %110 : vector<32xf32> to vector<32x1xf32>
    %cst_43 = arith.constant 6.400000e+01 : f32
    %112 = vector.broadcast %cst_43 : f32 to vector<32x1xf32>
    %113 = arith.divf %111, %112 : vector<32x1xf32>
    %114 = vector.broadcast %113 : vector<32x1xf32> to vector<32x64xf32>
    %115 = arith.subf %107, %114 : vector<32x64xf32>
    %116 = arith.mulf %115, %115 : vector<32x64xf32>
    %cst_44 = arith.constant dense<0.000000e+00> : vector<32xf32>
    %117 = vector.multi_reduction <add>, %116, %cst_44 [1] : vector<32x64xf32> to vector<32xf32>
    %118 = vector.shape_cast %117 : vector<32xf32> to vector<32x1xf32>
    %cst_45 = arith.constant 6.400000e+01 : f32
    %119 = vector.broadcast %cst_45 : f32 to vector<32x1xf32>
    %120 = arith.divf %118, %119 : vector<32x1xf32>
    %121 = vector.broadcast %113 : vector<32x1xf32> to vector<32x64xf32>
    %122 = arith.subf %107, %121 : vector<32x64xf32>
    %cst_46 = arith.constant 9.99999974E-6 : f32
    %123 = vector.broadcast %cst_46 : f32 to vector<32x1xf32>
    %124 = arith.addf %120, %123 : vector<32x1xf32>
    %125 = math.rsqrt %124 : vector<32x1xf32>
    %126 = vector.broadcast %125 : vector<32x1xf32> to vector<32x64xf32>
    %127 = arith.mulf %122, %126 : vector<32x64xf32>
    %128 = vector.broadcast %108 : vector<1x64xf32> to vector<32x64xf32>
    %129 = arith.mulf %127, %128 : vector<32x64xf32>
    %130 = vector.broadcast %109 : vector<1x64xf32> to vector<32x64xf32>
    %131 = arith.addf %129, %130 : vector<32x64xf32>
    %c256 = arith.constant 256 : index
    %c0_47 = arith.constant 0 : index
    %132 = vector.load %arg3[%c256, %c0_47] : memref<1336x64xf32, #tpu.memory_space<vmem>>, vector<64x64xf32>
    %cst_48 = arith.constant dense<0.000000e+00> : vector<32x64xf32>
    %133 = tpu.matmul %131, %132, %cst_48 {dimension_numbers = #tpu.dot_dimension_numbers<[1], [0], [0], [1], [0, 0, 1, 1], [], []>} : vector<32x64xf32>, vector<64x64xf32>, vector<32x64xf32> -> vector<32x64xf32>
    %c320 = arith.constant 320 : index
    %c0_49 = arith.constant 0 : index
    %134 = vector.load %arg3[%c320, %c0_49] : memref<1336x64xf32, #tpu.memory_space<vmem>>, vector<1x64xf32>
    %135 = vector.broadcast %134 : vector<1x64xf32> to vector<32x64xf32>
    %136 = arith.addf %133, %135 : vector<32x64xf32>
    %cst_50 = arith.constant 5.000000e-01 : f32
    %137 = vector.broadcast %cst_50 : f32 to vector<32x64xf32>
    %138 = arith.mulf %137, %136 : vector<32x64xf32>
    %cst_51 = arith.constant 0.707106769 : f32
    %139 = vector.broadcast %cst_51 : f32 to vector<32x64xf32>
    %140 = arith.mulf %136, %139 : vector<32x64xf32>
    %141 = math.erf %140 : vector<32x64xf32>
    %cst_52 = arith.constant 1.000000e+00 : f32
    %142 = vector.broadcast %cst_52 : f32 to vector<32x64xf32>
    %143 = arith.addf %142, %141 : vector<32x64xf32>
    %144 = arith.mulf %138, %143 : vector<32x64xf32>
    %c328 = arith.constant 328 : index
    %c0_53 = arith.constant 0 : index
    %145 = vector.load %arg3[%c328, %c0_53] : memref<1336x64xf32, #tpu.memory_space<vmem>>, vector<64x64xf32>
    %cst_54 = arith.constant dense<0.000000e+00> : vector<32x64xf32>
    %146 = tpu.matmul %144, %145, %cst_54 {dimension_numbers = #tpu.dot_dimension_numbers<[1], [0], [0], [1], [0, 0, 1, 1], [], []>} : vector<32x64xf32>, vector<64x64xf32>, vector<32x64xf32> -> vector<32x64xf32>
    %c392 = arith.constant 392 : index
    %c0_55 = arith.constant 0 : index
    %147 = vector.load %arg3[%c392, %c0_55] : memref<1336x64xf32, #tpu.memory_space<vmem>>, vector<1x64xf32>
    %148 = vector.broadcast %147 : vector<1x64xf32> to vector<32x64xf32>
    %149 = arith.addf %146, %148 : vector<32x64xf32>
    %150 = arith.addf %107, %149 : vector<32x64xf32>
    %c400 = arith.constant 400 : index
    %c0_56 = arith.constant 0 : index
    %151 = vector.load %arg3[%c400, %c0_56] : memref<1336x64xf32, #tpu.memory_space<vmem>>, vector<1x64xf32>
    %c408 = arith.constant 408 : index
    %c0_57 = arith.constant 0 : index
    %152 = vector.load %arg3[%c408, %c0_57] : memref<1336x64xf32, #tpu.memory_space<vmem>>, vector<1x64xf32>
    %cst_58 = arith.constant dense<0.000000e+00> : vector<32xf32>
    %153 = vector.multi_reduction <add>, %150, %cst_58 [1] : vector<32x64xf32> to vector<32xf32>
    %154 = vector.shape_cast %153 : vector<32xf32> to vector<32x1xf32>
    %cst_59 = arith.constant 6.400000e+01 : f32
    %155 = vector.broadcast %cst_59 : f32 to vector<32x1xf32>
    %156 = arith.divf %154, %155 : vector<32x1xf32>
    %157 = vector.broadcast %156 : vector<32x1xf32> to vector<32x64xf32>
    %158 = arith.subf %150, %157 : vector<32x64xf32>
    %159 = arith.mulf %158, %158 : vector<32x64xf32>
    %cst_60 = arith.constant dense<0.000000e+00> : vector<32xf32>
    %160 = vector.multi_reduction <add>, %159, %cst_60 [1] : vector<32x64xf32> to vector<32xf32>
    %161 = vector.shape_cast %160 : vector<32xf32> to vector<32x1xf32>
    %cst_61 = arith.constant 6.400000e+01 : f32
    %162 = vector.broadcast %cst_61 : f32 to vector<32x1xf32>
    %163 = arith.divf %161, %162 : vector<32x1xf32>
    %164 = vector.broadcast %156 : vector<32x1xf32> to vector<32x64xf32>
    %165 = arith.subf %150, %164 : vector<32x64xf32>
    %cst_62 = arith.constant 9.99999974E-6 : f32
    %166 = vector.broadcast %cst_62 : f32 to vector<32x1xf32>
    %167 = arith.addf %163, %166 : vector<32x1xf32>
    %168 = math.rsqrt %167 : vector<32x1xf32>
    %169 = vector.broadcast %168 : vector<32x1xf32> to vector<32x64xf32>
    %170 = arith.mulf %165, %169 : vector<32x64xf32>
    %171 = vector.broadcast %151 : vector<1x64xf32> to vector<32x64xf32>
    %172 = arith.mulf %170, %171 : vector<32x64xf32>
    %173 = vector.broadcast %152 : vector<1x64xf32> to vector<32x64xf32>
    %174 = arith.addf %172, %173 : vector<32x64xf32>
    %c400_63 = arith.constant 400 : index
    %c0_64 = arith.constant 0 : index
    %175 = vector.load %arg3[%c400_63, %c0_64] : memref<1336x64xf32, #tpu.memory_space<vmem>>, vector<1x64xf32>
    %c408_65 = arith.constant 408 : index
    %c0_66 = arith.constant 0 : index
    %176 = vector.load %arg3[%c408_65, %c0_66] : memref<1336x64xf32, #tpu.memory_space<vmem>>, vector<1x64xf32>
    %cst_67 = arith.constant dense<0.000000e+00> : vector<32xf32>
    %177 = vector.multi_reduction <add>, %150, %cst_67 [1] : vector<32x64xf32> to vector<32xf32>
    %178 = vector.shape_cast %177 : vector<32xf32> to vector<32x1xf32>
    %cst_68 = arith.constant 6.400000e+01 : f32
    %179 = vector.broadcast %cst_68 : f32 to vector<32x1xf32>
    %180 = arith.divf %178, %179 : vector<32x1xf32>
    %181 = vector.broadcast %180 : vector<32x1xf32> to vector<32x64xf32>
    %182 = arith.subf %150, %181 : vector<32x64xf32>
    %183 = arith.mulf %182, %182 : vector<32x64xf32>
    %cst_69 = arith.constant dense<0.000000e+00> : vector<32xf32>
    %184 = vector.multi_reduction <add>, %183, %cst_69 [1] : vector<32x64xf32> to vector<32xf32>
    %185 = vector.shape_cast %184 : vector<32xf32> to vector<32x1xf32>
    %cst_70 = arith.constant 6.400000e+01 : f32
    %186 = vector.broadcast %cst_70 : f32 to vector<32x1xf32>
    %187 = arith.divf %185, %186 : vector<32x1xf32>
    %188 = vector.broadcast %180 : vector<32x1xf32> to vector<32x64xf32>
    %189 = arith.subf %150, %188 : vector<32x64xf32>
    %cst_71 = arith.constant 9.99999974E-6 : f32
    %190 = vector.broadcast %cst_71 : f32 to vector<32x1xf32>
    %191 = arith.addf %187, %190 : vector<32x1xf32>
    %192 = math.rsqrt %191 : vector<32x1xf32>
    %193 = vector.broadcast %192 : vector<32x1xf32> to vector<32x64xf32>
    %194 = arith.mulf %189, %193 : vector<32x64xf32>
    %195 = vector.broadcast %175 : vector<1x64xf32> to vector<32x64xf32>
    %196 = arith.mulf %194, %195 : vector<32x64xf32>
    %197 = vector.broadcast %176 : vector<1x64xf32> to vector<32x64xf32>
    %198 = arith.addf %196, %197 : vector<32x64xf32>
    %c416 = arith.constant 416 : index
    %c0_72 = arith.constant 0 : index
    %199 = vector.load %arg3[%c416, %c0_72] : memref<1336x64xf32, #tpu.memory_space<vmem>>, vector<64x64xf32>
    %cst_73 = arith.constant dense<0.000000e+00> : vector<32x64xf32>
    %200 = tpu.matmul %174, %199, %cst_73 {dimension_numbers = #tpu.dot_dimension_numbers<[1], [0], [0], [1], [0, 0, 1, 1], [], []>} : vector<32x64xf32>, vector<64x64xf32>, vector<32x64xf32> -> vector<32x64xf32>
    %c480 = arith.constant 480 : index
    %c0_74 = arith.constant 0 : index
    %201 = vector.load %arg3[%c480, %c0_74] : memref<1336x64xf32, #tpu.memory_space<vmem>>, vector<1x64xf32>
    %202 = vector.broadcast %201 : vector<1x64xf32> to vector<32x64xf32>
    %203 = arith.addf %200, %202 : vector<32x64xf32>
    %c488 = arith.constant 488 : index
    %c0_75 = arith.constant 0 : index
    %204 = vector.load %arg3[%c488, %c0_75] : memref<1336x64xf32, #tpu.memory_space<vmem>>, vector<64x64xf32>
    %cst_76 = arith.constant dense<0.000000e+00> : vector<32x64xf32>
    %205 = tpu.matmul %198, %204, %cst_76 {dimension_numbers = #tpu.dot_dimension_numbers<[1], [0], [0], [1], [0, 0, 1, 1], [], []>} : vector<32x64xf32>, vector<64x64xf32>, vector<32x64xf32> -> vector<32x64xf32>
    %c552 = arith.constant 552 : index
    %c0_77 = arith.constant 0 : index
    %206 = vector.load %arg3[%c552, %c0_77] : memref<1336x64xf32, #tpu.memory_space<vmem>>, vector<1x64xf32>
    %207 = vector.broadcast %206 : vector<1x64xf32> to vector<32x64xf32>
    %208 = arith.addf %205, %207 : vector<32x64xf32>
    %c560 = arith.constant 560 : index
    %c0_78 = arith.constant 0 : index
    %209 = vector.load %arg3[%c560, %c0_78] : memref<1336x64xf32, #tpu.memory_space<vmem>>, vector<64x64xf32>
    %cst_79 = arith.constant dense<0.000000e+00> : vector<32x64xf32>
    %210 = tpu.matmul %198, %209, %cst_79 {dimension_numbers = #tpu.dot_dimension_numbers<[1], [0], [0], [1], [0, 0, 1, 1], [], []>} : vector<32x64xf32>, vector<64x64xf32>, vector<32x64xf32> -> vector<32x64xf32>
    %c624 = arith.constant 624 : index
    %c0_80 = arith.constant 0 : index
    %211 = vector.load %arg3[%c624, %c0_80] : memref<1336x64xf32, #tpu.memory_space<vmem>>, vector<1x64xf32>
    %212 = vector.broadcast %211 : vector<1x64xf32> to vector<32x64xf32>
    %213 = arith.addf %210, %212 : vector<32x64xf32>
    %214 = vector.extract_strided_slice %203 {offsets = [0, 0], sizes = [16, 64], strides = [1, 1]} : vector<32x64xf32> to vector<16x64xf32>
    %215 = vector.extract_strided_slice %208 {offsets = [0, 0], sizes = [16, 64], strides = [1, 1]} : vector<32x64xf32> to vector<16x64xf32>
    %216 = vector.extract_strided_slice %213 {offsets = [0, 0], sizes = [16, 64], strides = [1, 1]} : vector<32x64xf32> to vector<16x64xf32>
    %217 = vector.extract_strided_slice %214 {offsets = [0, 0], sizes = [16, 16], strides = [1, 1]} : vector<16x64xf32> to vector<16x16xf32>
    %218 = vector.extract_strided_slice %215 {offsets = [0, 0], sizes = [16, 16], strides = [1, 1]} : vector<16x64xf32> to vector<16x16xf32>
    %cst_81 = arith.constant dense<0.000000e+00> : vector<16x16xf32>
    %219 = tpu.matmul %217, %218, %cst_81 {dimension_numbers = #tpu.dot_dimension_numbers<[1], [1], [0], [0], [0, 0, 1, 0], [], []>} : vector<16x16xf32>, vector<16x16xf32>, vector<16x16xf32> -> vector<16x16xf32>
    %cst_82 = arith.constant 2.500000e-01 : f32
    %220 = vector.broadcast %cst_82 : f32 to vector<16x16xf32>
    %221 = arith.mulf %219, %220 : vector<16x16xf32>
    %cst_83 = arith.constant dense<0xFF800000> : vector<16xf32>
    %222 = vector.multi_reduction <maximumf>, %221, %cst_83 [1] : vector<16x16xf32> to vector<16xf32>
    %223 = vector.shape_cast %222 : vector<16xf32> to vector<16x1xf32>
    %224 = vector.broadcast %223 : vector<16x1xf32> to vector<16x16xf32>
    %225 = arith.subf %221, %224 : vector<16x16xf32>
    %226 = math.exp %225 : vector<16x16xf32>
    %cst_84 = arith.constant dense<0.000000e+00> : vector<16xf32>
    %227 = vector.multi_reduction <add>, %226, %cst_84 [1] : vector<16x16xf32> to vector<16xf32>
    %228 = vector.shape_cast %227 : vector<16xf32> to vector<16x1xf32>
    %229 = tpu.reciprocal %228 {approx = true} : vector<16x1xf32> -> vector<16x1xf32>
    %230 = vector.broadcast %229 : vector<16x1xf32> to vector<16x16xf32>
    %231 = arith.mulf %226, %230 : vector<16x16xf32>
    %232 = vector.extract_strided_slice %216 {offsets = [0, 0], sizes = [16, 16], strides = [1, 1]} : vector<16x64xf32> to vector<16x16xf32>
    %cst_85 = arith.constant dense<0.000000e+00> : vector<16x16xf32>
    %233 = tpu.matmul %231, %232, %cst_85 {dimension_numbers = #tpu.dot_dimension_numbers<[1], [0], [0], [1], [0, 0, 1, 1], [], []>} : vector<16x16xf32>, vector<16x16xf32>, vector<16x16xf32> -> vector<16x16xf32>
    %234 = vector.extract_strided_slice %214 {offsets = [0, 16], sizes = [16, 16], strides = [1, 1]} : vector<16x64xf32> to vector<16x16xf32>
    %235 = vector.extract_strided_slice %215 {offsets = [0, 16], sizes = [16, 16], strides = [1, 1]} : vector<16x64xf32> to vector<16x16xf32>
    %cst_86 = arith.constant dense<0.000000e+00> : vector<16x16xf32>
    %236 = tpu.matmul %234, %235, %cst_86 {dimension_numbers = #tpu.dot_dimension_numbers<[1], [1], [0], [0], [0, 0, 1, 0], [], []>} : vector<16x16xf32>, vector<16x16xf32>, vector<16x16xf32> -> vector<16x16xf32>
    %cst_87 = arith.constant 2.500000e-01 : f32
    %237 = vector.broadcast %cst_87 : f32 to vector<16x16xf32>
    %238 = arith.mulf %236, %237 : vector<16x16xf32>
    %cst_88 = arith.constant dense<0xFF800000> : vector<16xf32>
    %239 = vector.multi_reduction <maximumf>, %238, %cst_88 [1] : vector<16x16xf32> to vector<16xf32>
    %240 = vector.shape_cast %239 : vector<16xf32> to vector<16x1xf32>
    %241 = vector.broadcast %240 : vector<16x1xf32> to vector<16x16xf32>
    %242 = arith.subf %238, %241 : vector<16x16xf32>
    %243 = math.exp %242 : vector<16x16xf32>
    %cst_89 = arith.constant dense<0.000000e+00> : vector<16xf32>
    %244 = vector.multi_reduction <add>, %243, %cst_89 [1] : vector<16x16xf32> to vector<16xf32>
    %245 = vector.shape_cast %244 : vector<16xf32> to vector<16x1xf32>
    %246 = tpu.reciprocal %245 {approx = true} : vector<16x1xf32> -> vector<16x1xf32>
    %247 = vector.broadcast %246 : vector<16x1xf32> to vector<16x16xf32>
    %248 = arith.mulf %243, %247 : vector<16x16xf32>
    %249 = vector.extract_strided_slice %216 {offsets = [0, 16], sizes = [16, 16], strides = [1, 1]} : vector<16x64xf32> to vector<16x16xf32>
    %cst_90 = arith.constant dense<0.000000e+00> : vector<16x16xf32>
    %250 = tpu.matmul %248, %249, %cst_90 {dimension_numbers = #tpu.dot_dimension_numbers<[1], [0], [0], [1], [0, 0, 1, 1], [], []>} : vector<16x16xf32>, vector<16x16xf32>, vector<16x16xf32> -> vector<16x16xf32>
    %251 = vector.extract_strided_slice %214 {offsets = [0, 32], sizes = [16, 16], strides = [1, 1]} : vector<16x64xf32> to vector<16x16xf32>
    %252 = vector.extract_strided_slice %215 {offsets = [0, 32], sizes = [16, 16], strides = [1, 1]} : vector<16x64xf32> to vector<16x16xf32>
    %cst_91 = arith.constant dense<0.000000e+00> : vector<16x16xf32>
    %253 = tpu.matmul %251, %252, %cst_91 {dimension_numbers = #tpu.dot_dimension_numbers<[1], [1], [0], [0], [0, 0, 1, 0], [], []>} : vector<16x16xf32>, vector<16x16xf32>, vector<16x16xf32> -> vector<16x16xf32>
    %cst_92 = arith.constant 2.500000e-01 : f32
    %254 = vector.broadcast %cst_92 : f32 to vector<16x16xf32>
    %255 = arith.mulf %253, %254 : vector<16x16xf32>
    %cst_93 = arith.constant dense<0xFF800000> : vector<16xf32>
    %256 = vector.multi_reduction <maximumf>, %255, %cst_93 [1] : vector<16x16xf32> to vector<16xf32>
    %257 = vector.shape_cast %256 : vector<16xf32> to vector<16x1xf32>
    %258 = vector.broadcast %257 : vector<16x1xf32> to vector<16x16xf32>
    %259 = arith.subf %255, %258 : vector<16x16xf32>
    %260 = math.exp %259 : vector<16x16xf32>
    %cst_94 = arith.constant dense<0.000000e+00> : vector<16xf32>
    %261 = vector.multi_reduction <add>, %260, %cst_94 [1] : vector<16x16xf32> to vector<16xf32>
    %262 = vector.shape_cast %261 : vector<16xf32> to vector<16x1xf32>
    %263 = tpu.reciprocal %262 {approx = true} : vector<16x1xf32> -> vector<16x1xf32>
    %264 = vector.broadcast %263 : vector<16x1xf32> to vector<16x16xf32>
    %265 = arith.mulf %260, %264 : vector<16x16xf32>
    %266 = vector.extract_strided_slice %216 {offsets = [0, 32], sizes = [16, 16], strides = [1, 1]} : vector<16x64xf32> to vector<16x16xf32>
    %cst_95 = arith.constant dense<0.000000e+00> : vector<16x16xf32>
    %267 = tpu.matmul %265, %266, %cst_95 {dimension_numbers = #tpu.dot_dimension_numbers<[1], [0], [0], [1], [0, 0, 1, 1], [], []>} : vector<16x16xf32>, vector<16x16xf32>, vector<16x16xf32> -> vector<16x16xf32>
    %268 = vector.extract_strided_slice %214 {offsets = [0, 48], sizes = [16, 16], strides = [1, 1]} : vector<16x64xf32> to vector<16x16xf32>
    %269 = vector.extract_strided_slice %215 {offsets = [0, 48], sizes = [16, 16], strides = [1, 1]} : vector<16x64xf32> to vector<16x16xf32>
    %cst_96 = arith.constant dense<0.000000e+00> : vector<16x16xf32>
    %270 = tpu.matmul %268, %269, %cst_96 {dimension_numbers = #tpu.dot_dimension_numbers<[1], [1], [0], [0], [0, 0, 1, 0], [], []>} : vector<16x16xf32>, vector<16x16xf32>, vector<16x16xf32> -> vector<16x16xf32>
    %cst_97 = arith.constant 2.500000e-01 : f32
    %271 = vector.broadcast %cst_97 : f32 to vector<16x16xf32>
    %272 = arith.mulf %270, %271 : vector<16x16xf32>
    %cst_98 = arith.constant dense<0xFF800000> : vector<16xf32>
    %273 = vector.multi_reduction <maximumf>, %272, %cst_98 [1] : vector<16x16xf32> to vector<16xf32>
    %274 = vector.shape_cast %273 : vector<16xf32> to vector<16x1xf32>
    %275 = vector.broadcast %274 : vector<16x1xf32> to vector<16x16xf32>
    %276 = arith.subf %272, %275 : vector<16x16xf32>
    %277 = math.exp %276 : vector<16x16xf32>
    %cst_99 = arith.constant dense<0.000000e+00> : vector<16xf32>
    %278 = vector.multi_reduction <add>, %277, %cst_99 [1] : vector<16x16xf32> to vector<16xf32>
    %279 = vector.shape_cast %278 : vector<16xf32> to vector<16x1xf32>
    %280 = tpu.reciprocal %279 {approx = true} : vector<16x1xf32> -> vector<16x1xf32>
    %281 = vector.broadcast %280 : vector<16x1xf32> to vector<16x16xf32>
    %282 = arith.mulf %277, %281 : vector<16x16xf32>
    %283 = vector.extract_strided_slice %216 {offsets = [0, 48], sizes = [16, 16], strides = [1, 1]} : vector<16x64xf32> to vector<16x16xf32>
    %cst_100 = arith.constant dense<0.000000e+00> : vector<16x16xf32>
    %284 = tpu.matmul %282, %283, %cst_100 {dimension_numbers = #tpu.dot_dimension_numbers<[1], [0], [0], [1], [0, 0, 1, 1], [], []>} : vector<16x16xf32>, vector<16x16xf32>, vector<16x16xf32> -> vector<16x16xf32>
    %285 = tpu.concatenate %233, %250, %267, %284 in 1 : vector<16x16xf32>, vector<16x16xf32>, vector<16x16xf32>, vector<16x16xf32> -> vector<16x64xf32>
    %286 = vector.extract_strided_slice %203 {offsets = [16, 0], sizes = [16, 64], strides = [1, 1]} : vector<32x64xf32> to vector<16x64xf32>
    %287 = vector.extract_strided_slice %208 {offsets = [16, 0], sizes = [16, 64], strides = [1, 1]} : vector<32x64xf32> to vector<16x64xf32>
    %288 = vector.extract_strided_slice %213 {offsets = [16, 0], sizes = [16, 64], strides = [1, 1]} : vector<32x64xf32> to vector<16x64xf32>
    %289 = vector.extract_strided_slice %286 {offsets = [0, 0], sizes = [16, 16], strides = [1, 1]} : vector<16x64xf32> to vector<16x16xf32>
    %290 = vector.extract_strided_slice %287 {offsets = [0, 0], sizes = [16, 16], strides = [1, 1]} : vector<16x64xf32> to vector<16x16xf32>
    %cst_101 = arith.constant dense<0.000000e+00> : vector<16x16xf32>
    %291 = tpu.matmul %289, %290, %cst_101 {dimension_numbers = #tpu.dot_dimension_numbers<[1], [1], [0], [0], [0, 0, 1, 0], [], []>} : vector<16x16xf32>, vector<16x16xf32>, vector<16x16xf32> -> vector<16x16xf32>
    %cst_102 = arith.constant 2.500000e-01 : f32
    %292 = vector.broadcast %cst_102 : f32 to vector<16x16xf32>
    %293 = arith.mulf %291, %292 : vector<16x16xf32>
    %cst_103 = arith.constant dense<0xFF800000> : vector<16xf32>
    %294 = vector.multi_reduction <maximumf>, %293, %cst_103 [1] : vector<16x16xf32> to vector<16xf32>
    %295 = vector.shape_cast %294 : vector<16xf32> to vector<16x1xf32>
    %296 = vector.broadcast %295 : vector<16x1xf32> to vector<16x16xf32>
    %297 = arith.subf %293, %296 : vector<16x16xf32>
    %298 = math.exp %297 : vector<16x16xf32>
    %cst_104 = arith.constant dense<0.000000e+00> : vector<16xf32>
    %299 = vector.multi_reduction <add>, %298, %cst_104 [1] : vector<16x16xf32> to vector<16xf32>
    %300 = vector.shape_cast %299 : vector<16xf32> to vector<16x1xf32>
    %301 = tpu.reciprocal %300 {approx = true} : vector<16x1xf32> -> vector<16x1xf32>
    %302 = vector.broadcast %301 : vector<16x1xf32> to vector<16x16xf32>
    %303 = arith.mulf %298, %302 : vector<16x16xf32>
    %304 = vector.extract_strided_slice %288 {offsets = [0, 0], sizes = [16, 16], strides = [1, 1]} : vector<16x64xf32> to vector<16x16xf32>
    %cst_105 = arith.constant dense<0.000000e+00> : vector<16x16xf32>
    %305 = tpu.matmul %303, %304, %cst_105 {dimension_numbers = #tpu.dot_dimension_numbers<[1], [0], [0], [1], [0, 0, 1, 1], [], []>} : vector<16x16xf32>, vector<16x16xf32>, vector<16x16xf32> -> vector<16x16xf32>
    %306 = vector.extract_strided_slice %286 {offsets = [0, 16], sizes = [16, 16], strides = [1, 1]} : vector<16x64xf32> to vector<16x16xf32>
    %307 = vector.extract_strided_slice %287 {offsets = [0, 16], sizes = [16, 16], strides = [1, 1]} : vector<16x64xf32> to vector<16x16xf32>
    %cst_106 = arith.constant dense<0.000000e+00> : vector<16x16xf32>
    %308 = tpu.matmul %306, %307, %cst_106 {dimension_numbers = #tpu.dot_dimension_numbers<[1], [1], [0], [0], [0, 0, 1, 0], [], []>} : vector<16x16xf32>, vector<16x16xf32>, vector<16x16xf32> -> vector<16x16xf32>
    %cst_107 = arith.constant 2.500000e-01 : f32
    %309 = vector.broadcast %cst_107 : f32 to vector<16x16xf32>
    %310 = arith.mulf %308, %309 : vector<16x16xf32>
    %cst_108 = arith.constant dense<0xFF800000> : vector<16xf32>
    %311 = vector.multi_reduction <maximumf>, %310, %cst_108 [1] : vector<16x16xf32> to vector<16xf32>
    %312 = vector.shape_cast %311 : vector<16xf32> to vector<16x1xf32>
    %313 = vector.broadcast %312 : vector<16x1xf32> to vector<16x16xf32>
    %314 = arith.subf %310, %313 : vector<16x16xf32>
    %315 = math.exp %314 : vector<16x16xf32>
    %cst_109 = arith.constant dense<0.000000e+00> : vector<16xf32>
    %316 = vector.multi_reduction <add>, %315, %cst_109 [1] : vector<16x16xf32> to vector<16xf32>
    %317 = vector.shape_cast %316 : vector<16xf32> to vector<16x1xf32>
    %318 = tpu.reciprocal %317 {approx = true} : vector<16x1xf32> -> vector<16x1xf32>
    %319 = vector.broadcast %318 : vector<16x1xf32> to vector<16x16xf32>
    %320 = arith.mulf %315, %319 : vector<16x16xf32>
    %321 = vector.extract_strided_slice %288 {offsets = [0, 16], sizes = [16, 16], strides = [1, 1]} : vector<16x64xf32> to vector<16x16xf32>
    %cst_110 = arith.constant dense<0.000000e+00> : vector<16x16xf32>
    %322 = tpu.matmul %320, %321, %cst_110 {dimension_numbers = #tpu.dot_dimension_numbers<[1], [0], [0], [1], [0, 0, 1, 1], [], []>} : vector<16x16xf32>, vector<16x16xf32>, vector<16x16xf32> -> vector<16x16xf32>
    %323 = vector.extract_strided_slice %286 {offsets = [0, 32], sizes = [16, 16], strides = [1, 1]} : vector<16x64xf32> to vector<16x16xf32>
    %324 = vector.extract_strided_slice %287 {offsets = [0, 32], sizes = [16, 16], strides = [1, 1]} : vector<16x64xf32> to vector<16x16xf32>
    %cst_111 = arith.constant dense<0.000000e+00> : vector<16x16xf32>
    %325 = tpu.matmul %323, %324, %cst_111 {dimension_numbers = #tpu.dot_dimension_numbers<[1], [1], [0], [0], [0, 0, 1, 0], [], []>} : vector<16x16xf32>, vector<16x16xf32>, vector<16x16xf32> -> vector<16x16xf32>
    %cst_112 = arith.constant 2.500000e-01 : f32
    %326 = vector.broadcast %cst_112 : f32 to vector<16x16xf32>
    %327 = arith.mulf %325, %326 : vector<16x16xf32>
    %cst_113 = arith.constant dense<0xFF800000> : vector<16xf32>
    %328 = vector.multi_reduction <maximumf>, %327, %cst_113 [1] : vector<16x16xf32> to vector<16xf32>
    %329 = vector.shape_cast %328 : vector<16xf32> to vector<16x1xf32>
    %330 = vector.broadcast %329 : vector<16x1xf32> to vector<16x16xf32>
    %331 = arith.subf %327, %330 : vector<16x16xf32>
    %332 = math.exp %331 : vector<16x16xf32>
    %cst_114 = arith.constant dense<0.000000e+00> : vector<16xf32>
    %333 = vector.multi_reduction <add>, %332, %cst_114 [1] : vector<16x16xf32> to vector<16xf32>
    %334 = vector.shape_cast %333 : vector<16xf32> to vector<16x1xf32>
    %335 = tpu.reciprocal %334 {approx = true} : vector<16x1xf32> -> vector<16x1xf32>
    %336 = vector.broadcast %335 : vector<16x1xf32> to vector<16x16xf32>
    %337 = arith.mulf %332, %336 : vector<16x16xf32>
    %338 = vector.extract_strided_slice %288 {offsets = [0, 32], sizes = [16, 16], strides = [1, 1]} : vector<16x64xf32> to vector<16x16xf32>
    %cst_115 = arith.constant dense<0.000000e+00> : vector<16x16xf32>
    %339 = tpu.matmul %337, %338, %cst_115 {dimension_numbers = #tpu.dot_dimension_numbers<[1], [0], [0], [1], [0, 0, 1, 1], [], []>} : vector<16x16xf32>, vector<16x16xf32>, vector<16x16xf32> -> vector<16x16xf32>
    %340 = vector.extract_strided_slice %286 {offsets = [0, 48], sizes = [16, 16], strides = [1, 1]} : vector<16x64xf32> to vector<16x16xf32>
    %341 = vector.extract_strided_slice %287 {offsets = [0, 48], sizes = [16, 16], strides = [1, 1]} : vector<16x64xf32> to vector<16x16xf32>
    %cst_116 = arith.constant dense<0.000000e+00> : vector<16x16xf32>
    %342 = tpu.matmul %340, %341, %cst_116 {dimension_numbers = #tpu.dot_dimension_numbers<[1], [1], [0], [0], [0, 0, 1, 0], [], []>} : vector<16x16xf32>, vector<16x16xf32>, vector<16x16xf32> -> vector<16x16xf32>
    %cst_117 = arith.constant 2.500000e-01 : f32
    %343 = vector.broadcast %cst_117 : f32 to vector<16x16xf32>
    %344 = arith.mulf %342, %343 : vector<16x16xf32>
    %cst_118 = arith.constant dense<0xFF800000> : vector<16xf32>
    %345 = vector.multi_reduction <maximumf>, %344, %cst_118 [1] : vector<16x16xf32> to vector<16xf32>
    %346 = vector.shape_cast %345 : vector<16xf32> to vector<16x1xf32>
    %347 = vector.broadcast %346 : vector<16x1xf32> to vector<16x16xf32>
    %348 = arith.subf %344, %347 : vector<16x16xf32>
    %349 = math.exp %348 : vector<16x16xf32>
    %cst_119 = arith.constant dense<0.000000e+00> : vector<16xf32>
    %350 = vector.multi_reduction <add>, %349, %cst_119 [1] : vector<16x16xf32> to vector<16xf32>
    %351 = vector.shape_cast %350 : vector<16xf32> to vector<16x1xf32>
    %352 = tpu.reciprocal %351 {approx = true} : vector<16x1xf32> -> vector<16x1xf32>
    %353 = vector.broadcast %352 : vector<16x1xf32> to vector<16x16xf32>
    %354 = arith.mulf %349, %353 : vector<16x16xf32>
    %355 = vector.extract_strided_slice %288 {offsets = [0, 48], sizes = [16, 16], strides = [1, 1]} : vector<16x64xf32> to vector<16x16xf32>
    %cst_120 = arith.constant dense<0.000000e+00> : vector<16x16xf32>
    %356 = tpu.matmul %354, %355, %cst_120 {dimension_numbers = #tpu.dot_dimension_numbers<[1], [0], [0], [1], [0, 0, 1, 1], [], []>} : vector<16x16xf32>, vector<16x16xf32>, vector<16x16xf32> -> vector<16x16xf32>
    %357 = tpu.concatenate %305, %322, %339, %356 in 1 : vector<16x16xf32>, vector<16x16xf32>, vector<16x16xf32>, vector<16x16xf32> -> vector<16x64xf32>
    %358 = tpu.concatenate %285, %357 in 0 : vector<16x64xf32>, vector<16x64xf32> -> vector<32x64xf32>
    %c632 = arith.constant 632 : index
    %c0_121 = arith.constant 0 : index
    %359 = vector.load %arg3[%c632, %c0_121] : memref<1336x64xf32, #tpu.memory_space<vmem>>, vector<64x64xf32>
    %cst_122 = arith.constant dense<0.000000e+00> : vector<32x64xf32>
    %360 = tpu.matmul %358, %359, %cst_122 {dimension_numbers = #tpu.dot_dimension_numbers<[1], [0], [0], [1], [0, 0, 1, 1], [], []>} : vector<32x64xf32>, vector<64x64xf32>, vector<32x64xf32> -> vector<32x64xf32>
    %c696 = arith.constant 696 : index
    %c0_123 = arith.constant 0 : index
    %361 = vector.load %arg3[%c696, %c0_123] : memref<1336x64xf32, #tpu.memory_space<vmem>>, vector<1x64xf32>
    %362 = vector.broadcast %361 : vector<1x64xf32> to vector<32x64xf32>
    %363 = arith.addf %360, %362 : vector<32x64xf32>
    %364 = arith.addf %150, %363 : vector<32x64xf32>
    %c704 = arith.constant 704 : index
    %c0_124 = arith.constant 0 : index
    %365 = vector.load %arg3[%c704, %c0_124] : memref<1336x64xf32, #tpu.memory_space<vmem>>, vector<1x64xf32>
    %c712 = arith.constant 712 : index
    %c0_125 = arith.constant 0 : index
    %366 = vector.load %arg3[%c712, %c0_125] : memref<1336x64xf32, #tpu.memory_space<vmem>>, vector<1x64xf32>
    %cst_126 = arith.constant dense<0.000000e+00> : vector<32xf32>
    %367 = vector.multi_reduction <add>, %364, %cst_126 [1] : vector<32x64xf32> to vector<32xf32>
    %368 = vector.shape_cast %367 : vector<32xf32> to vector<32x1xf32>
    %cst_127 = arith.constant 6.400000e+01 : f32
    %369 = vector.broadcast %cst_127 : f32 to vector<32x1xf32>
    %370 = arith.divf %368, %369 : vector<32x1xf32>
    %371 = vector.broadcast %370 : vector<32x1xf32> to vector<32x64xf32>
    %372 = arith.subf %364, %371 : vector<32x64xf32>
    %373 = arith.mulf %372, %372 : vector<32x64xf32>
    %cst_128 = arith.constant dense<0.000000e+00> : vector<32xf32>
    %374 = vector.multi_reduction <add>, %373, %cst_128 [1] : vector<32x64xf32> to vector<32xf32>
    %375 = vector.shape_cast %374 : vector<32xf32> to vector<32x1xf32>
    %cst_129 = arith.constant 6.400000e+01 : f32
    %376 = vector.broadcast %cst_129 : f32 to vector<32x1xf32>
    %377 = arith.divf %375, %376 : vector<32x1xf32>
    %378 = vector.broadcast %370 : vector<32x1xf32> to vector<32x64xf32>
    %379 = arith.subf %364, %378 : vector<32x64xf32>
    %cst_130 = arith.constant 9.99999974E-6 : f32
    %380 = vector.broadcast %cst_130 : f32 to vector<32x1xf32>
    %381 = arith.addf %377, %380 : vector<32x1xf32>
    %382 = math.rsqrt %381 : vector<32x1xf32>
    %383 = vector.broadcast %382 : vector<32x1xf32> to vector<32x64xf32>
    %384 = arith.mulf %379, %383 : vector<32x64xf32>
    %385 = vector.broadcast %365 : vector<1x64xf32> to vector<32x64xf32>
    %386 = arith.mulf %384, %385 : vector<32x64xf32>
    %387 = vector.broadcast %366 : vector<1x64xf32> to vector<32x64xf32>
    %388 = arith.addf %386, %387 : vector<32x64xf32>
    %c0_131 = arith.constant 0 : index
    %c0_132 = arith.constant 0 : index
    %389 = vector.load %arg4[%c0_131, %c0_132] : memref<112x256xf32, #tpu.memory_space<vmem>>, vector<64x256xf32>
    %cst_133 = arith.constant dense<0.000000e+00> : vector<32x256xf32>
    %390 = tpu.matmul %388, %389, %cst_133 {dimension_numbers = #tpu.dot_dimension_numbers<[1], [0], [0], [1], [0, 0, 1, 1], [], []>} : vector<32x64xf32>, vector<64x256xf32>, vector<32x256xf32> -> vector<32x256xf32>
    %c64 = arith.constant 64 : index
    %c0_134 = arith.constant 0 : index
    %391 = vector.load %arg4[%c64, %c0_134] : memref<112x256xf32, #tpu.memory_space<vmem>>, vector<1x256xf32>
    %392 = vector.broadcast %391 : vector<1x256xf32> to vector<32x256xf32>
    %393 = arith.addf %390, %392 : vector<32x256xf32>
    %cst_135 = arith.constant 5.000000e-01 : f32
    %394 = vector.broadcast %cst_135 : f32 to vector<32x256xf32>
    %395 = arith.mulf %394, %393 : vector<32x256xf32>
    %cst_136 = arith.constant 0.707106769 : f32
    %396 = vector.broadcast %cst_136 : f32 to vector<32x256xf32>
    %397 = arith.mulf %393, %396 : vector<32x256xf32>
    %398 = math.erf %397 : vector<32x256xf32>
    %cst_137 = arith.constant 1.000000e+00 : f32
    %399 = vector.broadcast %cst_137 : f32 to vector<32x256xf32>
    %400 = arith.addf %399, %398 : vector<32x256xf32>
    %401 = arith.mulf %395, %400 : vector<32x256xf32>
    %c720 = arith.constant 720 : index
    %c0_138 = arith.constant 0 : index
    %402 = vector.load %arg3[%c720, %c0_138] : memref<1336x64xf32, #tpu.memory_space<vmem>>, vector<256x64xf32>
    %cst_139 = arith.constant dense<0.000000e+00> : vector<32x64xf32>
    %403 = tpu.matmul %401, %402, %cst_139 {dimension_numbers = #tpu.dot_dimension_numbers<[1], [0], [0], [1], [0, 0, 1, 1], [], []>} : vector<32x256xf32>, vector<256x64xf32>, vector<32x64xf32> -> vector<32x64xf32>
    %c976 = arith.constant 976 : index
    %c0_140 = arith.constant 0 : index
    %404 = vector.load %arg3[%c976, %c0_140] : memref<1336x64xf32, #tpu.memory_space<vmem>>, vector<1x64xf32>
    %405 = vector.broadcast %404 : vector<1x64xf32> to vector<32x64xf32>
    %406 = arith.addf %403, %405 : vector<32x64xf32>
    %407 = arith.addf %364, %406 : vector<32x64xf32>
    %c400_141 = arith.constant 400 : index
    %c0_142 = arith.constant 0 : index
    %408 = vector.load %arg3[%c400_141, %c0_142] : memref<1336x64xf32, #tpu.memory_space<vmem>>, vector<1x64xf32>
    %c408_143 = arith.constant 408 : index
    %c0_144 = arith.constant 0 : index
    %409 = vector.load %arg3[%c408_143, %c0_144] : memref<1336x64xf32, #tpu.memory_space<vmem>>, vector<1x64xf32>
    %cst_145 = arith.constant dense<0.000000e+00> : vector<32xf32>
    %410 = vector.multi_reduction <add>, %407, %cst_145 [1] : vector<32x64xf32> to vector<32xf32>
    %411 = vector.shape_cast %410 : vector<32xf32> to vector<32x1xf32>
    %cst_146 = arith.constant 6.400000e+01 : f32
    %412 = vector.broadcast %cst_146 : f32 to vector<32x1xf32>
    %413 = arith.divf %411, %412 : vector<32x1xf32>
    %414 = vector.broadcast %413 : vector<32x1xf32> to vector<32x64xf32>
    %415 = arith.subf %407, %414 : vector<32x64xf32>
    %416 = arith.mulf %415, %415 : vector<32x64xf32>
    %cst_147 = arith.constant dense<0.000000e+00> : vector<32xf32>
    %417 = vector.multi_reduction <add>, %416, %cst_147 [1] : vector<32x64xf32> to vector<32xf32>
    %418 = vector.shape_cast %417 : vector<32xf32> to vector<32x1xf32>
    %cst_148 = arith.constant 6.400000e+01 : f32
    %419 = vector.broadcast %cst_148 : f32 to vector<32x1xf32>
    %420 = arith.divf %418, %419 : vector<32x1xf32>
    %421 = vector.broadcast %413 : vector<32x1xf32> to vector<32x64xf32>
    %422 = arith.subf %407, %421 : vector<32x64xf32>
    %cst_149 = arith.constant 9.99999974E-6 : f32
    %423 = vector.broadcast %cst_149 : f32 to vector<32x1xf32>
    %424 = arith.addf %420, %423 : vector<32x1xf32>
    %425 = math.rsqrt %424 : vector<32x1xf32>
    %426 = vector.broadcast %425 : vector<32x1xf32> to vector<32x64xf32>
    %427 = arith.mulf %422, %426 : vector<32x64xf32>
    %428 = vector.broadcast %408 : vector<1x64xf32> to vector<32x64xf32>
    %429 = arith.mulf %427, %428 : vector<32x64xf32>
    %430 = vector.broadcast %409 : vector<1x64xf32> to vector<32x64xf32>
    %431 = arith.addf %429, %430 : vector<32x64xf32>
    %c400_150 = arith.constant 400 : index
    %c0_151 = arith.constant 0 : index
    %432 = vector.load %arg3[%c400_150, %c0_151] : memref<1336x64xf32, #tpu.memory_space<vmem>>, vector<1x64xf32>
    %c408_152 = arith.constant 408 : index
    %c0_153 = arith.constant 0 : index
    %433 = vector.load %arg3[%c408_152, %c0_153] : memref<1336x64xf32, #tpu.memory_space<vmem>>, vector<1x64xf32>
    %cst_154 = arith.constant dense<0.000000e+00> : vector<32xf32>
    %434 = vector.multi_reduction <add>, %407, %cst_154 [1] : vector<32x64xf32> to vector<32xf32>
    %435 = vector.shape_cast %434 : vector<32xf32> to vector<32x1xf32>
    %cst_155 = arith.constant 6.400000e+01 : f32
    %436 = vector.broadcast %cst_155 : f32 to vector<32x1xf32>
    %437 = arith.divf %435, %436 : vector<32x1xf32>
    %438 = vector.broadcast %437 : vector<32x1xf32> to vector<32x64xf32>
    %439 = arith.subf %407, %438 : vector<32x64xf32>
    %440 = arith.mulf %439, %439 : vector<32x64xf32>
    %cst_156 = arith.constant dense<0.000000e+00> : vector<32xf32>
    %441 = vector.multi_reduction <add>, %440, %cst_156 [1] : vector<32x64xf32> to vector<32xf32>
    %442 = vector.shape_cast %441 : vector<32xf32> to vector<32x1xf32>
    %cst_157 = arith.constant 6.400000e+01 : f32
    %443 = vector.broadcast %cst_157 : f32 to vector<32x1xf32>
    %444 = arith.divf %442, %443 : vector<32x1xf32>
    %445 = vector.broadcast %437 : vector<32x1xf32> to vector<32x64xf32>
    %446 = arith.subf %407, %445 : vector<32x64xf32>
    %cst_158 = arith.constant 9.99999974E-6 : f32
    %447 = vector.broadcast %cst_158 : f32 to vector<32x1xf32>
    %448 = arith.addf %444, %447 : vector<32x1xf32>
    %449 = math.rsqrt %448 : vector<32x1xf32>
    %450 = vector.broadcast %449 : vector<32x1xf32> to vector<32x64xf32>
    %451 = arith.mulf %446, %450 : vector<32x64xf32>
    %452 = vector.broadcast %432 : vector<1x64xf32> to vector<32x64xf32>
    %453 = arith.mulf %451, %452 : vector<32x64xf32>
    %454 = vector.broadcast %433 : vector<1x64xf32> to vector<32x64xf32>
    %455 = arith.addf %453, %454 : vector<32x64xf32>
    %c416_159 = arith.constant 416 : index
    %c0_160 = arith.constant 0 : index
    %456 = vector.load %arg3[%c416_159, %c0_160] : memref<1336x64xf32, #tpu.memory_space<vmem>>, vector<64x64xf32>
    %cst_161 = arith.constant dense<0.000000e+00> : vector<32x64xf32>
    %457 = tpu.matmul %431, %456, %cst_161 {dimension_numbers = #tpu.dot_dimension_numbers<[1], [0], [0], [1], [0, 0, 1, 1], [], []>} : vector<32x64xf32>, vector<64x64xf32>, vector<32x64xf32> -> vector<32x64xf32>
    %c480_162 = arith.constant 480 : index
    %c0_163 = arith.constant 0 : index
    %458 = vector.load %arg3[%c480_162, %c0_163] : memref<1336x64xf32, #tpu.memory_space<vmem>>, vector<1x64xf32>
    %459 = vector.broadcast %458 : vector<1x64xf32> to vector<32x64xf32>
    %460 = arith.addf %457, %459 : vector<32x64xf32>
    %c488_164 = arith.constant 488 : index
    %c0_165 = arith.constant 0 : index
    %461 = vector.load %arg3[%c488_164, %c0_165] : memref<1336x64xf32, #tpu.memory_space<vmem>>, vector<64x64xf32>
    %cst_166 = arith.constant dense<0.000000e+00> : vector<32x64xf32>
    %462 = tpu.matmul %455, %461, %cst_166 {dimension_numbers = #tpu.dot_dimension_numbers<[1], [0], [0], [1], [0, 0, 1, 1], [], []>} : vector<32x64xf32>, vector<64x64xf32>, vector<32x64xf32> -> vector<32x64xf32>
    %c552_167 = arith.constant 552 : index
    %c0_168 = arith.constant 0 : index
    %463 = vector.load %arg3[%c552_167, %c0_168] : memref<1336x64xf32, #tpu.memory_space<vmem>>, vector<1x64xf32>
    %464 = vector.broadcast %463 : vector<1x64xf32> to vector<32x64xf32>
    %465 = arith.addf %462, %464 : vector<32x64xf32>
    %c560_169 = arith.constant 560 : index
    %c0_170 = arith.constant 0 : index
    %466 = vector.load %arg3[%c560_169, %c0_170] : memref<1336x64xf32, #tpu.memory_space<vmem>>, vector<64x64xf32>
    %cst_171 = arith.constant dense<0.000000e+00> : vector<32x64xf32>
    %467 = tpu.matmul %455, %466, %cst_171 {dimension_numbers = #tpu.dot_dimension_numbers<[1], [0], [0], [1], [0, 0, 1, 1], [], []>} : vector<32x64xf32>, vector<64x64xf32>, vector<32x64xf32> -> vector<32x64xf32>
    %c624_172 = arith.constant 624 : index
    %c0_173 = arith.constant 0 : index
    %468 = vector.load %arg3[%c624_172, %c0_173] : memref<1336x64xf32, #tpu.memory_space<vmem>>, vector<1x64xf32>
    %469 = vector.broadcast %468 : vector<1x64xf32> to vector<32x64xf32>
    %470 = arith.addf %467, %469 : vector<32x64xf32>
    %471 = vector.extract_strided_slice %460 {offsets = [0, 0], sizes = [16, 64], strides = [1, 1]} : vector<32x64xf32> to vector<16x64xf32>
    %472 = vector.extract_strided_slice %465 {offsets = [0, 0], sizes = [16, 64], strides = [1, 1]} : vector<32x64xf32> to vector<16x64xf32>
    %473 = vector.extract_strided_slice %470 {offsets = [0, 0], sizes = [16, 64], strides = [1, 1]} : vector<32x64xf32> to vector<16x64xf32>
    %474 = vector.extract_strided_slice %471 {offsets = [0, 0], sizes = [16, 16], strides = [1, 1]} : vector<16x64xf32> to vector<16x16xf32>
    %475 = vector.extract_strided_slice %472 {offsets = [0, 0], sizes = [16, 16], strides = [1, 1]} : vector<16x64xf32> to vector<16x16xf32>
    %cst_174 = arith.constant dense<0.000000e+00> : vector<16x16xf32>
    %476 = tpu.matmul %474, %475, %cst_174 {dimension_numbers = #tpu.dot_dimension_numbers<[1], [1], [0], [0], [0, 0, 1, 0], [], []>} : vector<16x16xf32>, vector<16x16xf32>, vector<16x16xf32> -> vector<16x16xf32>
    %cst_175 = arith.constant 2.500000e-01 : f32
    %477 = vector.broadcast %cst_175 : f32 to vector<16x16xf32>
    %478 = arith.mulf %476, %477 : vector<16x16xf32>
    %cst_176 = arith.constant dense<0xFF800000> : vector<16xf32>
    %479 = vector.multi_reduction <maximumf>, %478, %cst_176 [1] : vector<16x16xf32> to vector<16xf32>
    %480 = vector.shape_cast %479 : vector<16xf32> to vector<16x1xf32>
    %481 = vector.broadcast %480 : vector<16x1xf32> to vector<16x16xf32>
    %482 = arith.subf %478, %481 : vector<16x16xf32>
    %483 = math.exp %482 : vector<16x16xf32>
    %cst_177 = arith.constant dense<0.000000e+00> : vector<16xf32>
    %484 = vector.multi_reduction <add>, %483, %cst_177 [1] : vector<16x16xf32> to vector<16xf32>
    %485 = vector.shape_cast %484 : vector<16xf32> to vector<16x1xf32>
    %486 = tpu.reciprocal %485 {approx = true} : vector<16x1xf32> -> vector<16x1xf32>
    %487 = vector.broadcast %486 : vector<16x1xf32> to vector<16x16xf32>
    %488 = arith.mulf %483, %487 : vector<16x16xf32>
    %489 = vector.extract_strided_slice %473 {offsets = [0, 0], sizes = [16, 16], strides = [1, 1]} : vector<16x64xf32> to vector<16x16xf32>
    %cst_178 = arith.constant dense<0.000000e+00> : vector<16x16xf32>
    %490 = tpu.matmul %488, %489, %cst_178 {dimension_numbers = #tpu.dot_dimension_numbers<[1], [0], [0], [1], [0, 0, 1, 1], [], []>} : vector<16x16xf32>, vector<16x16xf32>, vector<16x16xf32> -> vector<16x16xf32>
    %491 = vector.extract_strided_slice %471 {offsets = [0, 16], sizes = [16, 16], strides = [1, 1]} : vector<16x64xf32> to vector<16x16xf32>
    %492 = vector.extract_strided_slice %472 {offsets = [0, 16], sizes = [16, 16], strides = [1, 1]} : vector<16x64xf32> to vector<16x16xf32>
    %cst_179 = arith.constant dense<0.000000e+00> : vector<16x16xf32>
    %493 = tpu.matmul %491, %492, %cst_179 {dimension_numbers = #tpu.dot_dimension_numbers<[1], [1], [0], [0], [0, 0, 1, 0], [], []>} : vector<16x16xf32>, vector<16x16xf32>, vector<16x16xf32> -> vector<16x16xf32>
    %cst_180 = arith.constant 2.500000e-01 : f32
    %494 = vector.broadcast %cst_180 : f32 to vector<16x16xf32>
    %495 = arith.mulf %493, %494 : vector<16x16xf32>
    %cst_181 = arith.constant dense<0xFF800000> : vector<16xf32>
    %496 = vector.multi_reduction <maximumf>, %495, %cst_181 [1] : vector<16x16xf32> to vector<16xf32>
    %497 = vector.shape_cast %496 : vector<16xf32> to vector<16x1xf32>
    %498 = vector.broadcast %497 : vector<16x1xf32> to vector<16x16xf32>
    %499 = arith.subf %495, %498 : vector<16x16xf32>
    %500 = math.exp %499 : vector<16x16xf32>
    %cst_182 = arith.constant dense<0.000000e+00> : vector<16xf32>
    %501 = vector.multi_reduction <add>, %500, %cst_182 [1] : vector<16x16xf32> to vector<16xf32>
    %502 = vector.shape_cast %501 : vector<16xf32> to vector<16x1xf32>
    %503 = tpu.reciprocal %502 {approx = true} : vector<16x1xf32> -> vector<16x1xf32>
    %504 = vector.broadcast %503 : vector<16x1xf32> to vector<16x16xf32>
    %505 = arith.mulf %500, %504 : vector<16x16xf32>
    %506 = vector.extract_strided_slice %473 {offsets = [0, 16], sizes = [16, 16], strides = [1, 1]} : vector<16x64xf32> to vector<16x16xf32>
    %cst_183 = arith.constant dense<0.000000e+00> : vector<16x16xf32>
    %507 = tpu.matmul %505, %506, %cst_183 {dimension_numbers = #tpu.dot_dimension_numbers<[1], [0], [0], [1], [0, 0, 1, 1], [], []>} : vector<16x16xf32>, vector<16x16xf32>, vector<16x16xf32> -> vector<16x16xf32>
    %508 = vector.extract_strided_slice %471 {offsets = [0, 32], sizes = [16, 16], strides = [1, 1]} : vector<16x64xf32> to vector<16x16xf32>
    %509 = vector.extract_strided_slice %472 {offsets = [0, 32], sizes = [16, 16], strides = [1, 1]} : vector<16x64xf32> to vector<16x16xf32>
    %cst_184 = arith.constant dense<0.000000e+00> : vector<16x16xf32>
    %510 = tpu.matmul %508, %509, %cst_184 {dimension_numbers = #tpu.dot_dimension_numbers<[1], [1], [0], [0], [0, 0, 1, 0], [], []>} : vector<16x16xf32>, vector<16x16xf32>, vector<16x16xf32> -> vector<16x16xf32>
    %cst_185 = arith.constant 2.500000e-01 : f32
    %511 = vector.broadcast %cst_185 : f32 to vector<16x16xf32>
    %512 = arith.mulf %510, %511 : vector<16x16xf32>
    %cst_186 = arith.constant dense<0xFF800000> : vector<16xf32>
    %513 = vector.multi_reduction <maximumf>, %512, %cst_186 [1] : vector<16x16xf32> to vector<16xf32>
    %514 = vector.shape_cast %513 : vector<16xf32> to vector<16x1xf32>
    %515 = vector.broadcast %514 : vector<16x1xf32> to vector<16x16xf32>
    %516 = arith.subf %512, %515 : vector<16x16xf32>
    %517 = math.exp %516 : vector<16x16xf32>
    %cst_187 = arith.constant dense<0.000000e+00> : vector<16xf32>
    %518 = vector.multi_reduction <add>, %517, %cst_187 [1] : vector<16x16xf32> to vector<16xf32>
    %519 = vector.shape_cast %518 : vector<16xf32> to vector<16x1xf32>
    %520 = tpu.reciprocal %519 {approx = true} : vector<16x1xf32> -> vector<16x1xf32>
    %521 = vector.broadcast %520 : vector<16x1xf32> to vector<16x16xf32>
    %522 = arith.mulf %517, %521 : vector<16x16xf32>
    %523 = vector.extract_strided_slice %473 {offsets = [0, 32], sizes = [16, 16], strides = [1, 1]} : vector<16x64xf32> to vector<16x16xf32>
    %cst_188 = arith.constant dense<0.000000e+00> : vector<16x16xf32>
    %524 = tpu.matmul %522, %523, %cst_188 {dimension_numbers = #tpu.dot_dimension_numbers<[1], [0], [0], [1], [0, 0, 1, 1], [], []>} : vector<16x16xf32>, vector<16x16xf32>, vector<16x16xf32> -> vector<16x16xf32>
    %525 = vector.extract_strided_slice %471 {offsets = [0, 48], sizes = [16, 16], strides = [1, 1]} : vector<16x64xf32> to vector<16x16xf32>
    %526 = vector.extract_strided_slice %472 {offsets = [0, 48], sizes = [16, 16], strides = [1, 1]} : vector<16x64xf32> to vector<16x16xf32>
    %cst_189 = arith.constant dense<0.000000e+00> : vector<16x16xf32>
    %527 = tpu.matmul %525, %526, %cst_189 {dimension_numbers = #tpu.dot_dimension_numbers<[1], [1], [0], [0], [0, 0, 1, 0], [], []>} : vector<16x16xf32>, vector<16x16xf32>, vector<16x16xf32> -> vector<16x16xf32>
    %cst_190 = arith.constant 2.500000e-01 : f32
    %528 = vector.broadcast %cst_190 : f32 to vector<16x16xf32>
    %529 = arith.mulf %527, %528 : vector<16x16xf32>
    %cst_191 = arith.constant dense<0xFF800000> : vector<16xf32>
    %530 = vector.multi_reduction <maximumf>, %529, %cst_191 [1] : vector<16x16xf32> to vector<16xf32>
    %531 = vector.shape_cast %530 : vector<16xf32> to vector<16x1xf32>
    %532 = vector.broadcast %531 : vector<16x1xf32> to vector<16x16xf32>
    %533 = arith.subf %529, %532 : vector<16x16xf32>
    %534 = math.exp %533 : vector<16x16xf32>
    %cst_192 = arith.constant dense<0.000000e+00> : vector<16xf32>
    %535 = vector.multi_reduction <add>, %534, %cst_192 [1] : vector<16x16xf32> to vector<16xf32>
    %536 = vector.shape_cast %535 : vector<16xf32> to vector<16x1xf32>
    %537 = tpu.reciprocal %536 {approx = true} : vector<16x1xf32> -> vector<16x1xf32>
    %538 = vector.broadcast %537 : vector<16x1xf32> to vector<16x16xf32>
    %539 = arith.mulf %534, %538 : vector<16x16xf32>
    %540 = vector.extract_strided_slice %473 {offsets = [0, 48], sizes = [16, 16], strides = [1, 1]} : vector<16x64xf32> to vector<16x16xf32>
    %cst_193 = arith.constant dense<0.000000e+00> : vector<16x16xf32>
    %541 = tpu.matmul %539, %540, %cst_193 {dimension_numbers = #tpu.dot_dimension_numbers<[1], [0], [0], [1], [0, 0, 1, 1], [], []>} : vector<16x16xf32>, vector<16x16xf32>, vector<16x16xf32> -> vector<16x16xf32>
    %542 = tpu.concatenate %490, %507, %524, %541 in 1 : vector<16x16xf32>, vector<16x16xf32>, vector<16x16xf32>, vector<16x16xf32> -> vector<16x64xf32>
    %543 = vector.extract_strided_slice %460 {offsets = [16, 0], sizes = [16, 64], strides = [1, 1]} : vector<32x64xf32> to vector<16x64xf32>
    %544 = vector.extract_strided_slice %465 {offsets = [16, 0], sizes = [16, 64], strides = [1, 1]} : vector<32x64xf32> to vector<16x64xf32>
    %545 = vector.extract_strided_slice %470 {offsets = [16, 0], sizes = [16, 64], strides = [1, 1]} : vector<32x64xf32> to vector<16x64xf32>
    %546 = vector.extract_strided_slice %543 {offsets = [0, 0], sizes = [16, 16], strides = [1, 1]} : vector<16x64xf32> to vector<16x16xf32>
    %547 = vector.extract_strided_slice %544 {offsets = [0, 0], sizes = [16, 16], strides = [1, 1]} : vector<16x64xf32> to vector<16x16xf32>
    %cst_194 = arith.constant dense<0.000000e+00> : vector<16x16xf32>
    %548 = tpu.matmul %546, %547, %cst_194 {dimension_numbers = #tpu.dot_dimension_numbers<[1], [1], [0], [0], [0, 0, 1, 0], [], []>} : vector<16x16xf32>, vector<16x16xf32>, vector<16x16xf32> -> vector<16x16xf32>
    %cst_195 = arith.constant 2.500000e-01 : f32
    %549 = vector.broadcast %cst_195 : f32 to vector<16x16xf32>
    %550 = arith.mulf %548, %549 : vector<16x16xf32>
    %cst_196 = arith.constant dense<0xFF800000> : vector<16xf32>
    %551 = vector.multi_reduction <maximumf>, %550, %cst_196 [1] : vector<16x16xf32> to vector<16xf32>
    %552 = vector.shape_cast %551 : vector<16xf32> to vector<16x1xf32>
    %553 = vector.broadcast %552 : vector<16x1xf32> to vector<16x16xf32>
    %554 = arith.subf %550, %553 : vector<16x16xf32>
    %555 = math.exp %554 : vector<16x16xf32>
    %cst_197 = arith.constant dense<0.000000e+00> : vector<16xf32>
    %556 = vector.multi_reduction <add>, %555, %cst_197 [1] : vector<16x16xf32> to vector<16xf32>
    %557 = vector.shape_cast %556 : vector<16xf32> to vector<16x1xf32>
    %558 = tpu.reciprocal %557 {approx = true} : vector<16x1xf32> -> vector<16x1xf32>
    %559 = vector.broadcast %558 : vector<16x1xf32> to vector<16x16xf32>
    %560 = arith.mulf %555, %559 : vector<16x16xf32>
    %561 = vector.extract_strided_slice %545 {offsets = [0, 0], sizes = [16, 16], strides = [1, 1]} : vector<16x64xf32> to vector<16x16xf32>
    %cst_198 = arith.constant dense<0.000000e+00> : vector<16x16xf32>
    %562 = tpu.matmul %560, %561, %cst_198 {dimension_numbers = #tpu.dot_dimension_numbers<[1], [0], [0], [1], [0, 0, 1, 1], [], []>} : vector<16x16xf32>, vector<16x16xf32>, vector<16x16xf32> -> vector<16x16xf32>
    %563 = vector.extract_strided_slice %543 {offsets = [0, 16], sizes = [16, 16], strides = [1, 1]} : vector<16x64xf32> to vector<16x16xf32>
    %564 = vector.extract_strided_slice %544 {offsets = [0, 16], sizes = [16, 16], strides = [1, 1]} : vector<16x64xf32> to vector<16x16xf32>
    %cst_199 = arith.constant dense<0.000000e+00> : vector<16x16xf32>
    %565 = tpu.matmul %563, %564, %cst_199 {dimension_numbers = #tpu.dot_dimension_numbers<[1], [1], [0], [0], [0, 0, 1, 0], [], []>} : vector<16x16xf32>, vector<16x16xf32>, vector<16x16xf32> -> vector<16x16xf32>
    %cst_200 = arith.constant 2.500000e-01 : f32
    %566 = vector.broadcast %cst_200 : f32 to vector<16x16xf32>
    %567 = arith.mulf %565, %566 : vector<16x16xf32>
    %cst_201 = arith.constant dense<0xFF800000> : vector<16xf32>
    %568 = vector.multi_reduction <maximumf>, %567, %cst_201 [1] : vector<16x16xf32> to vector<16xf32>
    %569 = vector.shape_cast %568 : vector<16xf32> to vector<16x1xf32>
    %570 = vector.broadcast %569 : vector<16x1xf32> to vector<16x16xf32>
    %571 = arith.subf %567, %570 : vector<16x16xf32>
    %572 = math.exp %571 : vector<16x16xf32>
    %cst_202 = arith.constant dense<0.000000e+00> : vector<16xf32>
    %573 = vector.multi_reduction <add>, %572, %cst_202 [1] : vector<16x16xf32> to vector<16xf32>
    %574 = vector.shape_cast %573 : vector<16xf32> to vector<16x1xf32>
    %575 = tpu.reciprocal %574 {approx = true} : vector<16x1xf32> -> vector<16x1xf32>
    %576 = vector.broadcast %575 : vector<16x1xf32> to vector<16x16xf32>
    %577 = arith.mulf %572, %576 : vector<16x16xf32>
    %578 = vector.extract_strided_slice %545 {offsets = [0, 16], sizes = [16, 16], strides = [1, 1]} : vector<16x64xf32> to vector<16x16xf32>
    %cst_203 = arith.constant dense<0.000000e+00> : vector<16x16xf32>
    %579 = tpu.matmul %577, %578, %cst_203 {dimension_numbers = #tpu.dot_dimension_numbers<[1], [0], [0], [1], [0, 0, 1, 1], [], []>} : vector<16x16xf32>, vector<16x16xf32>, vector<16x16xf32> -> vector<16x16xf32>
    %580 = vector.extract_strided_slice %543 {offsets = [0, 32], sizes = [16, 16], strides = [1, 1]} : vector<16x64xf32> to vector<16x16xf32>
    %581 = vector.extract_strided_slice %544 {offsets = [0, 32], sizes = [16, 16], strides = [1, 1]} : vector<16x64xf32> to vector<16x16xf32>
    %cst_204 = arith.constant dense<0.000000e+00> : vector<16x16xf32>
    %582 = tpu.matmul %580, %581, %cst_204 {dimension_numbers = #tpu.dot_dimension_numbers<[1], [1], [0], [0], [0, 0, 1, 0], [], []>} : vector<16x16xf32>, vector<16x16xf32>, vector<16x16xf32> -> vector<16x16xf32>
    %cst_205 = arith.constant 2.500000e-01 : f32
    %583 = vector.broadcast %cst_205 : f32 to vector<16x16xf32>
    %584 = arith.mulf %582, %583 : vector<16x16xf32>
    %cst_206 = arith.constant dense<0xFF800000> : vector<16xf32>
    %585 = vector.multi_reduction <maximumf>, %584, %cst_206 [1] : vector<16x16xf32> to vector<16xf32>
    %586 = vector.shape_cast %585 : vector<16xf32> to vector<16x1xf32>
    %587 = vector.broadcast %586 : vector<16x1xf32> to vector<16x16xf32>
    %588 = arith.subf %584, %587 : vector<16x16xf32>
    %589 = math.exp %588 : vector<16x16xf32>
    %cst_207 = arith.constant dense<0.000000e+00> : vector<16xf32>
    %590 = vector.multi_reduction <add>, %589, %cst_207 [1] : vector<16x16xf32> to vector<16xf32>
    %591 = vector.shape_cast %590 : vector<16xf32> to vector<16x1xf32>
    %592 = tpu.reciprocal %591 {approx = true} : vector<16x1xf32> -> vector<16x1xf32>
    %593 = vector.broadcast %592 : vector<16x1xf32> to vector<16x16xf32>
    %594 = arith.mulf %589, %593 : vector<16x16xf32>
    %595 = vector.extract_strided_slice %545 {offsets = [0, 32], sizes = [16, 16], strides = [1, 1]} : vector<16x64xf32> to vector<16x16xf32>
    %cst_208 = arith.constant dense<0.000000e+00> : vector<16x16xf32>
    %596 = tpu.matmul %594, %595, %cst_208 {dimension_numbers = #tpu.dot_dimension_numbers<[1], [0], [0], [1], [0, 0, 1, 1], [], []>} : vector<16x16xf32>, vector<16x16xf32>, vector<16x16xf32> -> vector<16x16xf32>
    %597 = vector.extract_strided_slice %543 {offsets = [0, 48], sizes = [16, 16], strides = [1, 1]} : vector<16x64xf32> to vector<16x16xf32>
    %598 = vector.extract_strided_slice %544 {offsets = [0, 48], sizes = [16, 16], strides = [1, 1]} : vector<16x64xf32> to vector<16x16xf32>
    %cst_209 = arith.constant dense<0.000000e+00> : vector<16x16xf32>
    %599 = tpu.matmul %597, %598, %cst_209 {dimension_numbers = #tpu.dot_dimension_numbers<[1], [1], [0], [0], [0, 0, 1, 0], [], []>} : vector<16x16xf32>, vector<16x16xf32>, vector<16x16xf32> -> vector<16x16xf32>
    %cst_210 = arith.constant 2.500000e-01 : f32
    %600 = vector.broadcast %cst_210 : f32 to vector<16x16xf32>
    %601 = arith.mulf %599, %600 : vector<16x16xf32>
    %cst_211 = arith.constant dense<0xFF800000> : vector<16xf32>
    %602 = vector.multi_reduction <maximumf>, %601, %cst_211 [1] : vector<16x16xf32> to vector<16xf32>
    %603 = vector.shape_cast %602 : vector<16xf32> to vector<16x1xf32>
    %604 = vector.broadcast %603 : vector<16x1xf32> to vector<16x16xf32>
    %605 = arith.subf %601, %604 : vector<16x16xf32>
    %606 = math.exp %605 : vector<16x16xf32>
    %cst_212 = arith.constant dense<0.000000e+00> : vector<16xf32>
    %607 = vector.multi_reduction <add>, %606, %cst_212 [1] : vector<16x16xf32> to vector<16xf32>
    %608 = vector.shape_cast %607 : vector<16xf32> to vector<16x1xf32>
    %609 = tpu.reciprocal %608 {approx = true} : vector<16x1xf32> -> vector<16x1xf32>
    %610 = vector.broadcast %609 : vector<16x1xf32> to vector<16x16xf32>
    %611 = arith.mulf %606, %610 : vector<16x16xf32>
    %612 = vector.extract_strided_slice %545 {offsets = [0, 48], sizes = [16, 16], strides = [1, 1]} : vector<16x64xf32> to vector<16x16xf32>
    %cst_213 = arith.constant dense<0.000000e+00> : vector<16x16xf32>
    %613 = tpu.matmul %611, %612, %cst_213 {dimension_numbers = #tpu.dot_dimension_numbers<[1], [0], [0], [1], [0, 0, 1, 1], [], []>} : vector<16x16xf32>, vector<16x16xf32>, vector<16x16xf32> -> vector<16x16xf32>
    %614 = tpu.concatenate %562, %579, %596, %613 in 1 : vector<16x16xf32>, vector<16x16xf32>, vector<16x16xf32>, vector<16x16xf32> -> vector<16x64xf32>
    %615 = tpu.concatenate %542, %614 in 0 : vector<16x64xf32>, vector<16x64xf32> -> vector<32x64xf32>
    %c632_214 = arith.constant 632 : index
    %c0_215 = arith.constant 0 : index
    %616 = vector.load %arg3[%c632_214, %c0_215] : memref<1336x64xf32, #tpu.memory_space<vmem>>, vector<64x64xf32>
    %cst_216 = arith.constant dense<0.000000e+00> : vector<32x64xf32>
    %617 = tpu.matmul %615, %616, %cst_216 {dimension_numbers = #tpu.dot_dimension_numbers<[1], [0], [0], [1], [0, 0, 1, 1], [], []>} : vector<32x64xf32>, vector<64x64xf32>, vector<32x64xf32> -> vector<32x64xf32>
    %c696_217 = arith.constant 696 : index
    %c0_218 = arith.constant 0 : index
    %618 = vector.load %arg3[%c696_217, %c0_218] : memref<1336x64xf32, #tpu.memory_space<vmem>>, vector<1x64xf32>
    %619 = vector.broadcast %618 : vector<1x64xf32> to vector<32x64xf32>
    %620 = arith.addf %617, %619 : vector<32x64xf32>
    %621 = arith.addf %407, %620 : vector<32x64xf32>
    %c704_219 = arith.constant 704 : index
    %c0_220 = arith.constant 0 : index
    %622 = vector.load %arg3[%c704_219, %c0_220] : memref<1336x64xf32, #tpu.memory_space<vmem>>, vector<1x64xf32>
    %c712_221 = arith.constant 712 : index
    %c0_222 = arith.constant 0 : index
    %623 = vector.load %arg3[%c712_221, %c0_222] : memref<1336x64xf32, #tpu.memory_space<vmem>>, vector<1x64xf32>
    %cst_223 = arith.constant dense<0.000000e+00> : vector<32xf32>
    %624 = vector.multi_reduction <add>, %621, %cst_223 [1] : vector<32x64xf32> to vector<32xf32>
    %625 = vector.shape_cast %624 : vector<32xf32> to vector<32x1xf32>
    %cst_224 = arith.constant 6.400000e+01 : f32
    %626 = vector.broadcast %cst_224 : f32 to vector<32x1xf32>
    %627 = arith.divf %625, %626 : vector<32x1xf32>
    %628 = vector.broadcast %627 : vector<32x1xf32> to vector<32x64xf32>
    %629 = arith.subf %621, %628 : vector<32x64xf32>
    %630 = arith.mulf %629, %629 : vector<32x64xf32>
    %cst_225 = arith.constant dense<0.000000e+00> : vector<32xf32>
    %631 = vector.multi_reduction <add>, %630, %cst_225 [1] : vector<32x64xf32> to vector<32xf32>
    %632 = vector.shape_cast %631 : vector<32xf32> to vector<32x1xf32>
    %cst_226 = arith.constant 6.400000e+01 : f32
    %633 = vector.broadcast %cst_226 : f32 to vector<32x1xf32>
    %634 = arith.divf %632, %633 : vector<32x1xf32>
    %635 = vector.broadcast %627 : vector<32x1xf32> to vector<32x64xf32>
    %636 = arith.subf %621, %635 : vector<32x64xf32>
    %cst_227 = arith.constant 9.99999974E-6 : f32
    %637 = vector.broadcast %cst_227 : f32 to vector<32x1xf32>
    %638 = arith.addf %634, %637 : vector<32x1xf32>
    %639 = math.rsqrt %638 : vector<32x1xf32>
    %640 = vector.broadcast %639 : vector<32x1xf32> to vector<32x64xf32>
    %641 = arith.mulf %636, %640 : vector<32x64xf32>
    %642 = vector.broadcast %622 : vector<1x64xf32> to vector<32x64xf32>
    %643 = arith.mulf %641, %642 : vector<32x64xf32>
    %644 = vector.broadcast %623 : vector<1x64xf32> to vector<32x64xf32>
    %645 = arith.addf %643, %644 : vector<32x64xf32>
    %c0_228 = arith.constant 0 : index
    %c0_229 = arith.constant 0 : index
    %646 = vector.load %arg4[%c0_228, %c0_229] : memref<112x256xf32, #tpu.memory_space<vmem>>, vector<64x256xf32>
    %cst_230 = arith.constant dense<0.000000e+00> : vector<32x256xf32>
    %647 = tpu.matmul %645, %646, %cst_230 {dimension_numbers = #tpu.dot_dimension_numbers<[1], [0], [0], [1], [0, 0, 1, 1], [], []>} : vector<32x64xf32>, vector<64x256xf32>, vector<32x256xf32> -> vector<32x256xf32>
    %c64_231 = arith.constant 64 : index
    %c0_232 = arith.constant 0 : index
    %648 = vector.load %arg4[%c64_231, %c0_232] : memref<112x256xf32, #tpu.memory_space<vmem>>, vector<1x256xf32>
    %649 = vector.broadcast %648 : vector<1x256xf32> to vector<32x256xf32>
    %650 = arith.addf %647, %649 : vector<32x256xf32>
    %cst_233 = arith.constant 5.000000e-01 : f32
    %651 = vector.broadcast %cst_233 : f32 to vector<32x256xf32>
    %652 = arith.mulf %651, %650 : vector<32x256xf32>
    %cst_234 = arith.constant 0.707106769 : f32
    %653 = vector.broadcast %cst_234 : f32 to vector<32x256xf32>
    %654 = arith.mulf %650, %653 : vector<32x256xf32>
    %655 = math.erf %654 : vector<32x256xf32>
    %cst_235 = arith.constant 1.000000e+00 : f32
    %656 = vector.broadcast %cst_235 : f32 to vector<32x256xf32>
    %657 = arith.addf %656, %655 : vector<32x256xf32>
    %658 = arith.mulf %652, %657 : vector<32x256xf32>
    %c720_236 = arith.constant 720 : index
    %c0_237 = arith.constant 0 : index
    %659 = vector.load %arg3[%c720_236, %c0_237] : memref<1336x64xf32, #tpu.memory_space<vmem>>, vector<256x64xf32>
    %cst_238 = arith.constant dense<0.000000e+00> : vector<32x64xf32>
    %660 = tpu.matmul %658, %659, %cst_238 {dimension_numbers = #tpu.dot_dimension_numbers<[1], [0], [0], [1], [0, 0, 1, 1], [], []>} : vector<32x256xf32>, vector<256x64xf32>, vector<32x64xf32> -> vector<32x64xf32>
    %c976_239 = arith.constant 976 : index
    %c0_240 = arith.constant 0 : index
    %661 = vector.load %arg3[%c976_239, %c0_240] : memref<1336x64xf32, #tpu.memory_space<vmem>>, vector<1x64xf32>
    %662 = vector.broadcast %661 : vector<1x64xf32> to vector<32x64xf32>
    %663 = arith.addf %660, %662 : vector<32x64xf32>
    %664 = arith.addf %621, %663 : vector<32x64xf32>
    %c984 = arith.constant 984 : index
    %c0_241 = arith.constant 0 : index
    %665 = vector.load %arg3[%c984, %c0_241] : memref<1336x64xf32, #tpu.memory_space<vmem>>, vector<1x64xf32>
    %c992 = arith.constant 992 : index
    %c0_242 = arith.constant 0 : index
    %666 = vector.load %arg3[%c992, %c0_242] : memref<1336x64xf32, #tpu.memory_space<vmem>>, vector<1x64xf32>
    %cst_243 = arith.constant dense<0.000000e+00> : vector<32xf32>
    %667 = vector.multi_reduction <add>, %664, %cst_243 [1] : vector<32x64xf32> to vector<32xf32>
    %668 = vector.shape_cast %667 : vector<32xf32> to vector<32x1xf32>
    %cst_244 = arith.constant 6.400000e+01 : f32
    %669 = vector.broadcast %cst_244 : f32 to vector<32x1xf32>
    %670 = arith.divf %668, %669 : vector<32x1xf32>
    %671 = vector.broadcast %670 : vector<32x1xf32> to vector<32x64xf32>
    %672 = arith.subf %664, %671 : vector<32x64xf32>
    %673 = arith.mulf %672, %672 : vector<32x64xf32>
    %cst_245 = arith.constant dense<0.000000e+00> : vector<32xf32>
    %674 = vector.multi_reduction <add>, %673, %cst_245 [1] : vector<32x64xf32> to vector<32xf32>
    %675 = vector.shape_cast %674 : vector<32xf32> to vector<32x1xf32>
    %cst_246 = arith.constant 6.400000e+01 : f32
    %676 = vector.broadcast %cst_246 : f32 to vector<32x1xf32>
    %677 = arith.divf %675, %676 : vector<32x1xf32>
    %678 = vector.broadcast %670 : vector<32x1xf32> to vector<32x64xf32>
    %679 = arith.subf %664, %678 : vector<32x64xf32>
    %cst_247 = arith.constant 9.99999974E-6 : f32
    %680 = vector.broadcast %cst_247 : f32 to vector<32x1xf32>
    %681 = arith.addf %677, %680 : vector<32x1xf32>
    %682 = math.rsqrt %681 : vector<32x1xf32>
    %683 = vector.broadcast %682 : vector<32x1xf32> to vector<32x64xf32>
    %684 = arith.mulf %679, %683 : vector<32x64xf32>
    %685 = vector.broadcast %665 : vector<1x64xf32> to vector<32x64xf32>
    %686 = arith.mulf %684, %685 : vector<32x64xf32>
    %687 = vector.broadcast %666 : vector<1x64xf32> to vector<32x64xf32>
    %688 = arith.addf %686, %687 : vector<32x64xf32>
    %c1000 = arith.constant 1000 : index
    %c0_248 = arith.constant 0 : index
    %689 = vector.load %arg3[%c1000, %c0_248] : memref<1336x64xf32, #tpu.memory_space<vmem>>, vector<1x32xf32>
    %c1008 = arith.constant 1008 : index
    %c0_249 = arith.constant 0 : index
    %690 = vector.load %arg3[%c1008, %c0_249] : memref<1336x64xf32, #tpu.memory_space<vmem>>, vector<1x32xf32>
    %cst_250 = arith.constant dense<0.000000e+00> : vector<16xf32>
    %691 = vector.multi_reduction <add>, %1, %cst_250 [1] : vector<16x32xf32> to vector<16xf32>
    %692 = vector.shape_cast %691 : vector<16xf32> to vector<16x1xf32>
    %cst_251 = arith.constant 3.200000e+01 : f32
    %693 = vector.broadcast %cst_251 : f32 to vector<16x1xf32>
    %694 = arith.divf %692, %693 : vector<16x1xf32>
    %695 = vector.broadcast %694 : vector<16x1xf32> to vector<16x32xf32>
    %696 = arith.subf %1, %695 : vector<16x32xf32>
    %697 = arith.mulf %696, %696 : vector<16x32xf32>
    %cst_252 = arith.constant dense<0.000000e+00> : vector<16xf32>
    %698 = vector.multi_reduction <add>, %697, %cst_252 [1] : vector<16x32xf32> to vector<16xf32>
    %699 = vector.shape_cast %698 : vector<16xf32> to vector<16x1xf32>
    %cst_253 = arith.constant 3.200000e+01 : f32
    %700 = vector.broadcast %cst_253 : f32 to vector<16x1xf32>
    %701 = arith.divf %699, %700 : vector<16x1xf32>
    %702 = vector.broadcast %694 : vector<16x1xf32> to vector<16x32xf32>
    %703 = arith.subf %1, %702 : vector<16x32xf32>
    %cst_254 = arith.constant 9.99999974E-6 : f32
    %704 = vector.broadcast %cst_254 : f32 to vector<16x1xf32>
    %705 = arith.addf %701, %704 : vector<16x1xf32>
    %706 = math.rsqrt %705 : vector<16x1xf32>
    %707 = vector.broadcast %706 : vector<16x1xf32> to vector<16x32xf32>
    %708 = arith.mulf %703, %707 : vector<16x32xf32>
    %709 = vector.broadcast %689 : vector<1x32xf32> to vector<16x32xf32>
    %710 = arith.mulf %708, %709 : vector<16x32xf32>
    %711 = vector.broadcast %690 : vector<1x32xf32> to vector<16x32xf32>
    %712 = arith.addf %710, %711 : vector<16x32xf32>
    %c1016 = arith.constant 1016 : index
    %c0_255 = arith.constant 0 : index
    %713 = vector.load %arg3[%c1016, %c0_255] : memref<1336x64xf32, #tpu.memory_space<vmem>>, vector<32x32xf32>
    %cst_256 = arith.constant dense<0.000000e+00> : vector<16x32xf32>
    %714 = tpu.matmul %712, %713, %cst_256 {dimension_numbers = #tpu.dot_dimension_numbers<[1], [0], [0], [1], [0, 0, 1, 1], [], []>} : vector<16x32xf32>, vector<32x32xf32>, vector<16x32xf32> -> vector<16x32xf32>
    %c1048 = arith.constant 1048 : index
    %c0_257 = arith.constant 0 : index
    %715 = vector.load %arg3[%c1048, %c0_257] : memref<1336x64xf32, #tpu.memory_space<vmem>>, vector<1x32xf32>
    %716 = vector.broadcast %715 : vector<1x32xf32> to vector<16x32xf32>
    %717 = arith.addf %714, %716 : vector<16x32xf32>
    %c1056 = arith.constant 1056 : index
    %c0_258 = arith.constant 0 : index
    %718 = vector.load %arg3[%c1056, %c0_258] : memref<1336x64xf32, #tpu.memory_space<vmem>>, vector<64x32xf32>
    %cst_259 = arith.constant dense<0.000000e+00> : vector<32x32xf32>
    %719 = tpu.matmul %688, %718, %cst_259 {dimension_numbers = #tpu.dot_dimension_numbers<[1], [0], [0], [1], [0, 0, 1, 1], [], []>} : vector<32x64xf32>, vector<64x32xf32>, vector<32x32xf32> -> vector<32x32xf32>
    %c1120 = arith.constant 1120 : index
    %c0_260 = arith.constant 0 : index
    %720 = vector.load %arg3[%c1120, %c0_260] : memref<1336x64xf32, #tpu.memory_space<vmem>>, vector<1x32xf32>
    %721 = vector.broadcast %720 : vector<1x32xf32> to vector<32x32xf32>
    %722 = arith.addf %719, %721 : vector<32x32xf32>
    %c1128 = arith.constant 1128 : index
    %c0_261 = arith.constant 0 : index
    %723 = vector.load %arg3[%c1128, %c0_261] : memref<1336x64xf32, #tpu.memory_space<vmem>>, vector<64x32xf32>
    %cst_262 = arith.constant dense<0.000000e+00> : vector<32x32xf32>
    %724 = tpu.matmul %688, %723, %cst_262 {dimension_numbers = #tpu.dot_dimension_numbers<[1], [0], [0], [1], [0, 0, 1, 1], [], []>} : vector<32x64xf32>, vector<64x32xf32>, vector<32x32xf32> -> vector<32x32xf32>
    %c1192 = arith.constant 1192 : index
    %c0_263 = arith.constant 0 : index
    %725 = vector.load %arg3[%c1192, %c0_263] : memref<1336x64xf32, #tpu.memory_space<vmem>>, vector<1x32xf32>
    %726 = vector.broadcast %725 : vector<1x32xf32> to vector<32x32xf32>
    %727 = arith.addf %724, %726 : vector<32x32xf32>
    %728 = vector.extract_strided_slice %717 {offsets = [0, 0], sizes = [8, 32], strides = [1, 1]} : vector<16x32xf32> to vector<8x32xf32>
    %729 = vector.extract_strided_slice %722 {offsets = [0, 0], sizes = [16, 32], strides = [1, 1]} : vector<32x32xf32> to vector<16x32xf32>
    %730 = vector.extract_strided_slice %727 {offsets = [0, 0], sizes = [16, 32], strides = [1, 1]} : vector<32x32xf32> to vector<16x32xf32>
    %cst_264 = arith.constant dense<0.000000e+00> : vector<8x16xf32>
    %731 = tpu.matmul %728, %729, %cst_264 {dimension_numbers = #tpu.dot_dimension_numbers<[1], [1], [0], [0], [0, 0, 1, 0], [], []>} : vector<8x32xf32>, vector<16x32xf32>, vector<8x16xf32> -> vector<8x16xf32>
    %cst_265 = arith.constant 0.176776692 : f32
    %732 = vector.broadcast %cst_265 : f32 to vector<8x16xf32>
    %733 = arith.mulf %731, %732 : vector<8x16xf32>
    %cst_266 = arith.constant dense<0xFF800000> : vector<8xf32>
    %734 = vector.multi_reduction <maximumf>, %733, %cst_266 [1] : vector<8x16xf32> to vector<8xf32>
    %735 = vector.shape_cast %734 : vector<8xf32> to vector<8x1xf32>
    %736 = vector.broadcast %735 : vector<8x1xf32> to vector<8x16xf32>
    %737 = arith.subf %733, %736 : vector<8x16xf32>
    %738 = math.exp %737 : vector<8x16xf32>
    %cst_267 = arith.constant dense<0.000000e+00> : vector<8xf32>
    %739 = vector.multi_reduction <add>, %738, %cst_267 [1] : vector<8x16xf32> to vector<8xf32>
    %740 = vector.shape_cast %739 : vector<8xf32> to vector<8x1xf32>
    %741 = tpu.reciprocal %740 {approx = true} : vector<8x1xf32> -> vector<8x1xf32>
    %742 = vector.broadcast %741 : vector<8x1xf32> to vector<8x16xf32>
    %743 = arith.mulf %738, %742 : vector<8x16xf32>
    %cst_268 = arith.constant dense<0.000000e+00> : vector<8x32xf32>
    %744 = tpu.matmul %743, %730, %cst_268 {dimension_numbers = #tpu.dot_dimension_numbers<[1], [0], [0], [1], [0, 0, 1, 1], [], []>} : vector<8x16xf32>, vector<16x32xf32>, vector<8x32xf32> -> vector<8x32xf32>
    %745 = vector.extract_strided_slice %717 {offsets = [8, 0], sizes = [8, 32], strides = [1, 1]} : vector<16x32xf32> to vector<8x32xf32>
    %746 = vector.extract_strided_slice %722 {offsets = [16, 0], sizes = [16, 32], strides = [1, 1]} : vector<32x32xf32> to vector<16x32xf32>
    %747 = vector.extract_strided_slice %727 {offsets = [16, 0], sizes = [16, 32], strides = [1, 1]} : vector<32x32xf32> to vector<16x32xf32>
    %cst_269 = arith.constant dense<0.000000e+00> : vector<8x16xf32>
    %748 = tpu.matmul %745, %746, %cst_269 {dimension_numbers = #tpu.dot_dimension_numbers<[1], [1], [0], [0], [0, 0, 1, 0], [], []>} : vector<8x32xf32>, vector<16x32xf32>, vector<8x16xf32> -> vector<8x16xf32>
    %cst_270 = arith.constant 0.176776692 : f32
    %749 = vector.broadcast %cst_270 : f32 to vector<8x16xf32>
    %750 = arith.mulf %748, %749 : vector<8x16xf32>
    %cst_271 = arith.constant dense<0xFF800000> : vector<8xf32>
    %751 = vector.multi_reduction <maximumf>, %750, %cst_271 [1] : vector<8x16xf32> to vector<8xf32>
    %752 = vector.shape_cast %751 : vector<8xf32> to vector<8x1xf32>
    %753 = vector.broadcast %752 : vector<8x1xf32> to vector<8x16xf32>
    %754 = arith.subf %750, %753 : vector<8x16xf32>
    %755 = math.exp %754 : vector<8x16xf32>
    %cst_272 = arith.constant dense<0.000000e+00> : vector<8xf32>
    %756 = vector.multi_reduction <add>, %755, %cst_272 [1] : vector<8x16xf32> to vector<8xf32>
    %757 = vector.shape_cast %756 : vector<8xf32> to vector<8x1xf32>
    %758 = tpu.reciprocal %757 {approx = true} : vector<8x1xf32> -> vector<8x1xf32>
    %759 = vector.broadcast %758 : vector<8x1xf32> to vector<8x16xf32>
    %760 = arith.mulf %755, %759 : vector<8x16xf32>
    %cst_273 = arith.constant dense<0.000000e+00> : vector<8x32xf32>
    %761 = tpu.matmul %760, %747, %cst_273 {dimension_numbers = #tpu.dot_dimension_numbers<[1], [0], [0], [1], [0, 0, 1, 1], [], []>} : vector<8x16xf32>, vector<16x32xf32>, vector<8x32xf32> -> vector<8x32xf32>
    %762 = tpu.concatenate %744, %761 in 0 : vector<8x32xf32>, vector<8x32xf32> -> vector<16x32xf32>
    %c1200 = arith.constant 1200 : index
    %c0_274 = arith.constant 0 : index
    %763 = vector.load %arg3[%c1200, %c0_274] : memref<1336x64xf32, #tpu.memory_space<vmem>>, vector<32x32xf32>
    %cst_275 = arith.constant dense<0.000000e+00> : vector<16x32xf32>
    %764 = tpu.matmul %762, %763, %cst_275 {dimension_numbers = #tpu.dot_dimension_numbers<[1], [0], [0], [1], [0, 0, 1, 1], [], []>} : vector<16x32xf32>, vector<32x32xf32>, vector<16x32xf32> -> vector<16x32xf32>
    %c1232 = arith.constant 1232 : index
    %c0_276 = arith.constant 0 : index
    %765 = vector.load %arg3[%c1232, %c0_276] : memref<1336x64xf32, #tpu.memory_space<vmem>>, vector<1x32xf32>
    %766 = vector.broadcast %765 : vector<1x32xf32> to vector<16x32xf32>
    %767 = arith.addf %764, %766 : vector<16x32xf32>
    %c1240 = arith.constant 1240 : index
    %c0_277 = arith.constant 0 : index
    %768 = vector.load %arg3[%c1240, %c0_277] : memref<1336x64xf32, #tpu.memory_space<vmem>>, vector<1x32xf32>
    %c1248 = arith.constant 1248 : index
    %c0_278 = arith.constant 0 : index
    %769 = vector.load %arg3[%c1248, %c0_278] : memref<1336x64xf32, #tpu.memory_space<vmem>>, vector<1x32xf32>
    %cst_279 = arith.constant dense<0.000000e+00> : vector<16xf32>
    %770 = vector.multi_reduction <add>, %767, %cst_279 [1] : vector<16x32xf32> to vector<16xf32>
    %771 = vector.shape_cast %770 : vector<16xf32> to vector<16x1xf32>
    %cst_280 = arith.constant 3.200000e+01 : f32
    %772 = vector.broadcast %cst_280 : f32 to vector<16x1xf32>
    %773 = arith.divf %771, %772 : vector<16x1xf32>
    %774 = vector.broadcast %773 : vector<16x1xf32> to vector<16x32xf32>
    %775 = arith.subf %767, %774 : vector<16x32xf32>
    %776 = arith.mulf %775, %775 : vector<16x32xf32>
    %cst_281 = arith.constant dense<0.000000e+00> : vector<16xf32>
    %777 = vector.multi_reduction <add>, %776, %cst_281 [1] : vector<16x32xf32> to vector<16xf32>
    %778 = vector.shape_cast %777 : vector<16xf32> to vector<16x1xf32>
    %cst_282 = arith.constant 3.200000e+01 : f32
    %779 = vector.broadcast %cst_282 : f32 to vector<16x1xf32>
    %780 = arith.divf %778, %779 : vector<16x1xf32>
    %781 = vector.broadcast %773 : vector<16x1xf32> to vector<16x32xf32>
    %782 = arith.subf %767, %781 : vector<16x32xf32>
    %cst_283 = arith.constant 9.99999974E-6 : f32
    %783 = vector.broadcast %cst_283 : f32 to vector<16x1xf32>
    %784 = arith.addf %780, %783 : vector<16x1xf32>
    %785 = math.rsqrt %784 : vector<16x1xf32>
    %786 = vector.broadcast %785 : vector<16x1xf32> to vector<16x32xf32>
    %787 = arith.mulf %782, %786 : vector<16x32xf32>
    %788 = vector.broadcast %768 : vector<1x32xf32> to vector<16x32xf32>
    %789 = arith.mulf %787, %788 : vector<16x32xf32>
    %790 = vector.broadcast %769 : vector<1x32xf32> to vector<16x32xf32>
    %791 = arith.addf %789, %790 : vector<16x32xf32>
    %c1256 = arith.constant 1256 : index
    %c0_284 = arith.constant 0 : index
    %792 = vector.load %arg3[%c1256, %c0_284] : memref<1336x64xf32, #tpu.memory_space<vmem>>, vector<32x32xf32>
    %cst_285 = arith.constant dense<0.000000e+00> : vector<16x32xf32>
    %793 = tpu.matmul %791, %792, %cst_285 {dimension_numbers = #tpu.dot_dimension_numbers<[1], [0], [0], [1], [0, 0, 1, 1], [], []>} : vector<16x32xf32>, vector<32x32xf32>, vector<16x32xf32> -> vector<16x32xf32>
    %c1288 = arith.constant 1288 : index
    %c0_286 = arith.constant 0 : index
    %794 = vector.load %arg3[%c1288, %c0_286] : memref<1336x64xf32, #tpu.memory_space<vmem>>, vector<1x32xf32>
    %795 = vector.broadcast %794 : vector<1x32xf32> to vector<16x32xf32>
    %796 = arith.addf %793, %795 : vector<16x32xf32>
    %cst_287 = arith.constant 5.000000e-01 : f32
    %797 = vector.broadcast %cst_287 : f32 to vector<16x32xf32>
    %798 = arith.mulf %797, %796 : vector<16x32xf32>
    %cst_288 = arith.constant 0.707106769 : f32
    %799 = vector.broadcast %cst_288 : f32 to vector<16x32xf32>
    %800 = arith.mulf %796, %799 : vector<16x32xf32>
    %801 = math.erf %800 : vector<16x32xf32>
    %cst_289 = arith.constant 1.000000e+00 : f32
    %802 = vector.broadcast %cst_289 : f32 to vector<16x32xf32>
    %803 = arith.addf %802, %801 : vector<16x32xf32>
    %804 = arith.mulf %798, %803 : vector<16x32xf32>
    %c1296 = arith.constant 1296 : index
    %c0_290 = arith.constant 0 : index
    %805 = vector.load %arg3[%c1296, %c0_290] : memref<1336x64xf32, #tpu.memory_space<vmem>>, vector<32x32xf32>
    %cst_291 = arith.constant dense<0.000000e+00> : vector<16x32xf32>
    %806 = tpu.matmul %804, %805, %cst_291 {dimension_numbers = #tpu.dot_dimension_numbers<[1], [0], [0], [1], [0, 0, 1, 1], [], []>} : vector<16x32xf32>, vector<32x32xf32>, vector<16x32xf32> -> vector<16x32xf32>
    %c1328 = arith.constant 1328 : index
    %c0_292 = arith.constant 0 : index
    %807 = vector.load %arg3[%c1328, %c0_292] : memref<1336x64xf32, #tpu.memory_space<vmem>>, vector<1x32xf32>
    %808 = vector.broadcast %807 : vector<1x32xf32> to vector<16x32xf32>
    %809 = arith.addf %806, %808 : vector<16x32xf32>
    %810 = arith.addf %767, %809 : vector<16x32xf32>
    %c72 = arith.constant 72 : index
    %c0_293 = arith.constant 0 : index
    %811 = vector.load %arg4[%c72, %c0_293] : memref<112x256xf32, #tpu.memory_space<vmem>>, vector<32x128xf32>
    %cst_294 = arith.constant dense<0.000000e+00> : vector<16x128xf32>
    %812 = tpu.matmul %810, %811, %cst_294 {dimension_numbers = #tpu.dot_dimension_numbers<[1], [0], [0], [1], [0, 0, 1, 1], [], []>} : vector<16x32xf32>, vector<32x128xf32>, vector<16x128xf32> -> vector<16x128xf32>
    %c104 = arith.constant 104 : index
    %c0_295 = arith.constant 0 : index
    %813 = vector.load %arg4[%c104, %c0_295] : memref<112x256xf32, #tpu.memory_space<vmem>>, vector<1x128xf32>
    %814 = vector.broadcast %813 : vector<1x128xf32> to vector<16x128xf32>
    %815 = arith.addf %812, %814 : vector<16x128xf32>
    %c0_296 = arith.constant 0 : index
    %c0_297 = arith.constant 0 : index
    %816 = vector.load %arg5[%c0_296, %c0_297] : memref<16x128xf32, #tpu.memory_space<vmem>>, vector<16x128xf32>
    tpu.vector_store %arg5[%c0_296, %c0_297], %815 {strides = array<i32>} : memref<16x128xf32, #tpu.memory_space<vmem>>, vector<16x128xf32>,
    return
  }
  func.func @transform_0(%arg0: i32) -> (i32, i32) {
    %c0_i32 = arith.constant 0 : i32
    %c0_i32_0 = arith.constant 0 : i32
    %c0_i32_1 = arith.constant 0 : i32
    return %c0_i32, %c0_i32_0 : i32, i32
  }
  func.func @transform_1(%arg0: i32) -> (i32, i32) {
    %c0_i32 = arith.constant 0 : i32
    %c0_i32_0 = arith.constant 0 : i32
    %c0_i32_1 = arith.constant 0 : i32
    return %c0_i32, %c0_i32_0 : i32, i32
  }
  func.func @transform_2(%arg0: i32) -> (i32, i32) {
    %c0_i32 = arith.constant 0 : i32
    %c0_i32_0 = arith.constant 0 : i32
    %c0_i32_1 = arith.constant 0 : i32
    return %c0_i32, %c0_i32_0 : i32, i32
  }
  func.func @transform_3(%arg0: i32) -> (i32, i32) {
    %c0_i32 = arith.constant 0 : i32
    %c0_i32_0 = arith.constant 0 : i32
    %c0_i32_1 = arith.constant 0 : i32
    return %c0_i32, %c0_i32_0 : i32, i32
  }
  func.func @transform_4(%arg0: i32) -> (i32, i32) {
    %c0_i32 = arith.constant 0 : i32
    %c0_i32_0 = arith.constant 0 : i32
    %c0_i32_1 = arith.constant 0 : i32
    return %c0_i32, %c0_i32_0 : i32, i32
  }
}

</mosaic_0001>

<bundles_post_ra>
// kernel: forward.1
= control target key start
LH: loop header
LB: loop body
LE: loop exit
PB: predicated region body
PF: predicated region fallthrough
CT: control target
= control target key end

     0   :  { %vm31_vm0 = vcmask 130048   ;;  %vm163_vm1 = vcmask 523264   ;;  %vm650_vm3 = vcmask 261120   ;;  %s9823_s25 = smov 112   ;;  %s9824_s28 = smov 96   ;;  %vm2584_vm5 = vcmask 392192   ;;  %s11754_s0 = inlined_call_operand.vmem [shape: f32[64,16], index: 0, kind: input, shape index: {}]   ;;  %s11755_s2 = inlined_call_operand.vmem [shape: f32[1336,64], index: 2, kind: input, shape index: {}]   ;;  %s11756_s3 = inlined_call_operand.vmem [shape: f32[112,256], index: 3, kind: input, shape index: {}]   ;;  %s11757_s1 = inlined_call_operand.vmem [shape: f32[16,32], index: 1, kind: input, shape index: {}]   ;;  %s11758_s4 = inlined_call_operand.vmem [shape: f32[16,128], index: 4, kind: output, shape index: {}]  }
   0x1   :  { %v17_v0 = vld [vmem:[%s11754_s0] sm:$0xff]  ;;  %v19_v1 = vld [vmem:[%s11754_s0 + $0x10] sm:$0xff]  ;;  %v18_v2 = vld [vmem:[%s11754_s0 + $0x8] sm:$0xff]  ;;  %s9825_s29 = smov 80   ;;  %s9826_s30 = smov 16   ;;  %vm9831_vm7 = vmmov 0  }
   0x2   :  { %v32_v3 = vsel %vm31_vm0, %v17_v0, 0.0  ;;  %v38_v4 = vsel %vm31_vm0, %v19_v1, 0.0  ;;  %v20_v5 = vld [vmem:[%s11754_s0 + $0x18] sm:$0xff]  ;;  %v35_v6 = vsel %vm31_vm0, %v18_v2, 0.0  ;;  %v9876_v8 = vld [vmem:[%s11755_s2] sm:$0xff]  ;;  %v9881_v9 = vld [vmem:[%s11755_s2 + $0x8] sm:$0xff] }
   0x3   :  { %33 = vadd.xlane.f32.xlu0 %v32_v3  ;;  %39 = vadd.xlane.f32.xlu1 %v38_v4  ;;  %v41_v7 = vsel %vm31_vm0, %v20_v5, 0.0  ;;  %v164_v10 = vsel %vm163_vm1, %v9876_v8, 0.0  ;;  %v167_v11 = vsel %vm163_vm1, %v9881_v9, 0.0  ;;  %v9920_v40 = vld [vmem:[%s11754_s0 + $0x20] sm:$0xff]  ;;  %v9929_v44 = vld [vmem:[%s11754_s0 + $0x28] sm:$0xff]  ;;  %v9934_v45 = vld [vmem:[%s11754_s0 + $0x30] sm:$0xff] }
   0x4   :  { %v44_v43 = vsel %vm31_vm0, %v9920_v40, 0.0  ;;  %v47_v46 = vsel %vm31_vm0, %v9929_v44, 0.0  ;;  %v50_v47 = vsel %vm31_vm0, %v9934_v45, 0.0  ;;  %v9943_v48 = vld [vmem:[%s11754_s0 + $0x38] sm:$0xff]  ;;  %v203_v50 = vld [vmem:[%s11755_s2 + $0x30] sm:$0xff]  ;;  %v205_v53 = vld [vmem:[%s11755_s2 + $0x40] sm:$0xff] }
   0x5   :  { %v53_v49 = vsel %vm31_vm0, %v9943_v48, 0.0  ;;  %v204_v51 = vld [vmem:[%s11755_s2 + $0x38] sm:$0xff]  ;;  %v206_v54 = vld [vmem:[%s11755_s2 + $0x48] sm:$0xff]  ;;  %v308_v57 = vld [vmem:[%s11755_s2 + $0x80] sm:$0xff]  ;;  %s9827_s5 = smov 32   ;;  %s9828_s6 = smov 48  }
   0x6   :  { %v8831_v52 = vpack.c.bf16 %v204_v51, %v203_v50  ;;  %v307_v55 = vld [vmem:[%s11755_s2 + $0x78] sm:$0xff]  ;;  %v8835_v56 = vpack.c.bf16 %v206_v54, %v205_v53  ;;  %v207_v59 = vld [vmem:[%s11755_s2 + $0x50] sm:$0xff]  ;;  %v209_v62 = vld [vmem:[%s11755_s2 + $0x60] sm:$0xff] }
   0x7   :  { %36 = vadd.xlane.f32.xlu0 %v35_v6  ;;  %42 = vadd.xlane.f32.xlu1 %v41_v7  ;;  %v8847_v58 = vpack.c.bf16 %v308_v57, %v307_v55  ;;  %v208_v60 = vld [vmem:[%s11755_s2 + $0x58] sm:$0xff]  ;;  %v210_v63 = vld [vmem:[%s11755_s2 + $0x68] sm:$0xff]  ;;  %vm10086_vm2 = vmpackc.low %vm163_vm1, %vm163_vm1 }
   0x8   :  { %8832 = vmatprep.subr.bf16.mxu0 %v8831_v52  ;;  %v8839_v61 = vpack.c.bf16 %v208_v60, %v207_v59  ;;  %vm10444_vm4 = vmpackc.low %vm31_vm0, %vm31_vm0 }
   0x9   :  { %8834 = vmatpush3.bf16.msra.mxu0 %v8831_v52  ;;  %8848 = vmatprep.subr.bf16.mxu1 %v8847_v58  ;;  %vm11627_vm6 = vmpackc.low %vm650_vm3, %vm650_vm3 }
   0xa   :  { %8836 = vmatprep.subr.bf16.mxu0 %v8835_v56  ;;  %8850 = vmatpush3.bf16.msra.mxu1 %v8847_v58  ;;  %v7428_v58 = vld [vmem:[%s11755_s2 + $0x20] ss:$0 sm:$0xff] }
   0xb   :  { %165 = vadd.xlane.f32.xlu0 %v164_v10  ;;  %168 = vadd.xlane.f32.xlu1 %v167_v11 }
   0xd   :  { %8838 = vmatpush3.bf16.msra.mxu0 %v8835_v56 }
   0xe   :  { %8840 = vmatprep.subr.bf16.mxu0 %v8839_v61 }
  0x11   :  { %8842 = vmatpush3.bf16.msra.mxu0 %v8839_v61 }
  0x90   :  { %v34_v12 = vpop.xlane.xlu0 %33  ;;  %v40_v13 = vpop.xlane.xlu1 %39 }
  0x91   :  { %v57_v14 = vmul.f32 0.0625, %v34_v12  ;;  %v59_v15 = vmul.f32 0.0625, %v40_v13 }
  0x93   :  { %v9887_v16 = vsub.f32 %v17_v0, %v57_v14  ;;  %v9889_v17 = vsub.f32 %v19_v1, %v59_v15  ;;  %v8843_v0 = vpack.c.bf16 %v210_v63, %v209_v62  ;;  %v7429_v62 = vld [vmem:[%s11755_s2 + $0x28] ss:$0 sm:$0xff] }
  0x94   :  { %v37_v18 = vpop.xlane.xlu0 %36  ;;  %v43_v19 = vpop.xlane.xlu1 %42 }
  0x95   :  { %v58_v20 = vmul.f32 0.0625, %v37_v18  ;;  %v60_v21 = vmul.f32 0.0625, %v43_v19  ;;  %v73_v22 = vmul.f32 %v9887_v16, %v9887_v16  ;;  %v75_v23 = vmul.f32 %v9889_v17, %v9889_v17  ;;  %8844 = vmatprep.subr.bf16.mxu0 %v8843_v0 }
  0x96   :  { %8846 = vmatpush3.bf16.msra.mxu0 %v8843_v0 }
  0x97   :  { %v9895_v24 = vsub.f32 %v18_v2, %v58_v20  ;;  %v9897_v25 = vsub.f32 %v20_v5, %v60_v21  ;;  %v81_v26 = vsel %vm31_vm0, %v73_v22, 0.0  ;;  %v87_v29 = vsel %vm31_vm0, %v75_v23, 0.0 }
  0x98   :  { %82 = vadd.xlane.f32.xlu0 %v81_v26  ;;  %v166_v27 = vpop.xlane.xlu0 %165  ;;  %v169_v28 = vpop.xlane.xlu1 %168 }
  0x99   :  { %v171_v30 = vmul.f32 0.015625, %v166_v27  ;;  %v172_v31 = vmul.f32 0.015625, %v169_v28  ;;  %v74_v32 = vmul.f32 %v9895_v24, %v9895_v24  ;;  %v76_v33 = vmul.f32 %v9897_v25, %v9897_v25 }
  0x9b   :  { %v9906_v34 = vsub.f32 %v9876_v8, %v171_v30  ;;  %v9909_v35 = vsub.f32 %v9881_v9, %v172_v31  ;;  %v84_v36 = vsel %vm31_vm0, %v74_v32, 0.0  ;;  %v90_v37 = vsel %vm31_vm0, %v76_v33, 0.0 }
  0x9c   :  { %88 = vadd.xlane.f32.xlu0 %v87_v29  ;;  %85 = vadd.xlane.f32.xlu1 %v84_v36  ;;  %v9983_v29 = vld [vmem:[%s11755_s2 + $0x10] ss:$0 sm:$0xff] }
  0x9d   :  { %v175_v38 = vmul.f32 %v9906_v34, %v9906_v34  ;;  %v176_v39 = vmul.f32 %v9909_v35, %v9909_v35 }
  0x9f   :  { %v177_v41 = vsel %vm163_vm1, %v175_v38, 0.0  ;;  %v180_v42 = vsel %vm163_vm1, %v176_v39, 0.0  ;;  %v9991_v38 = vld [vmem:[%s11755_s2 + $0x18] ss:$0 sm:$0xff] }
  0xa0   :  { %91 = vadd.xlane.f32.xlu1 %v90_v37  ;;  %178 = vadd.xlane.f32.xlu0 %v177_v41 }
  0xa4   :  { %181 = vadd.xlane.f32.xlu1 %v180_v42  ;;  %45 = vadd.xlane.f32.xlu0 %v44_v43 }
  0xa8   :  { %48 = vadd.xlane.f32.xlu1 %v47_v46  ;;  %51 = vadd.xlane.f32.xlu0 %v50_v47 }
  0xac   :  { %54 = vadd.xlane.f32.xlu1 %v53_v49 }
 0x125   :  { %v83_v1 = vpop.xlane.xlu0 %82 }
 0x126   :  { %v105_v2 = vmul.f32 0.0625, %v83_v1 }
 0x128   :  { %v113_v3 = vadd.f32 1e-05, %v105_v2 }
 0x129   :  { %v86_v4 = vpop.xlane.xlu1 %85  ;;  %v89_v5 = vpop.xlane.xlu0 %88 }
 0x12a   :  { %9542 = vrsqrt.f32 %v113_v3  ;;  %v106_v6 = vmul.f32 0.0625, %v86_v4  ;;  %v107_v7 = vmul.f32 0.0625, %v89_v5 }
 0x12c   :  { %v114_v10 = vadd.f32 1e-05, %v106_v6  ;;  %v115_v11 = vadd.f32 1e-05, %v107_v7  ;;  %v443_v6 = vld [vmem:[%s11755_s2 + $0x90] sm:$0xff] }
 0x12d   :  { %v92_v12 = vpop.xlane.xlu1 %91  ;;  %v179_v13 = vpop.xlane.xlu0 %178 }
 0x12e   :  { %9544 = vrsqrt.f32 %v114_v10  ;;  %v108_v14 = vmul.f32 0.0625, %v92_v12  ;;  %v183_v15 = vmul.f32 0.015625, %v179_v13 }
 0x12f   :  { %9546 = vrsqrt.f32 %v115_v11 }
 0x130   :  { %v116_v18 = vadd.f32 1e-05, %v108_v14  ;;  %v185_v19 = vadd.f32 1e-05, %v183_v15 }
 0x131   :  { %v182_v20 = vpop.xlane.xlu1 %181  ;;  %v46_v21 = vpop.xlane.xlu0 %45 }
 0x132   :  { %9548 = vrsqrt.f32 %v116_v18  ;;  %v184_v22 = vmul.f32 0.015625, %v182_v20  ;;  %v61_v23 = vmul.f32 0.0625, %v46_v21 }
 0x133   :  { %9550 = vrsqrt.f32 %v185_v19 }
 0x134   :  { %v9543_v26 = vpop.eup %9542  ;;  %v186_v27 = vadd.f32 1e-05, %v184_v22  ;;  %v9978_v28 = vsub.f32 %v9920_v40, %v61_v23 }
 0x135   :  { %v49_v30 = vpop.xlane.xlu1 %48  ;;  %v52_v31 = vpop.xlane.xlu0 %51  ;;  %v129_v32 = vmul.f32 %v9543_v26, %v9887_v16 }
 0x136   :  { %9552 = vrsqrt.f32 %v186_v27  ;;  %v62_v33 = vmul.f32 0.0625, %v49_v30  ;;  %v63_v36 = vmul.f32 0.0625, %v52_v31  ;;  %v77_v37 = vmul.f32 %v9978_v28, %v9978_v28 }
 0x137   :  { %v141_v39 = vmul.f32 %v9983_v29, %v129_v32 }
 0x138   :  { %v9545_v40 = vpop.eup %9544  ;;  %v9995_v41 = vsub.f32 %v9929_v44, %v62_v33  ;;  %v9998_v42 = vsub.f32 %v9934_v45, %v63_v36  ;;  %v93_v16 = vsel %vm31_vm0, %v77_v37, 0.0 }
 0x139   :  { %v9547_v43 = vpop.eup %9546  ;;  %v55_v46 = vpop.xlane.xlu1 %54  ;;  %94 = vadd.xlane.f32.xlu0 %v93_v16  ;;  %v10002_v47 = vadd.f32 %v9991_v38, %v141_v39  ;;  %v130_v49 = vmul.f32 %v9545_v40, %v9895_v24 }
 0x13a   :  { %v64_v50 = vmul.f32 0.0625, %v55_v46  ;;  %v78_v51 = vmul.f32 %v9995_v41, %v9995_v41  ;;  %v79_v44 = vmul.f32 %v9998_v42, %v9998_v42  ;;  %v131_v45 = vmul.f32 %v9547_v43, %v9889_v17 }
 0x13b   :  { %8166 = vmatprep.mubr.msk.f32.mxu1 %vm31_vm0, %v10002_v47  ;;  %v142_v52 = vmul.f32 %v9983_v29, %v130_v49 }
 0x13c   :  { %v9549_v53 = vpop.eup %9548  ;;  %v10014_v54 = vsub.f32 %v9943_v48, %v64_v50  ;;  %v96_v24 = vsel %vm31_vm0, %v78_v51, 0.0  ;;  %v99_v55 = vsel %vm31_vm0, %v79_v44, 0.0  ;;  %v143_v56 = vmul.f32 %v9983_v29, %v131_v45 }
 0x13d   :  { %v9551_v57 = vpop.eup %9550  ;;  %97 = vadd.xlane.f32.xlu1 %v96_v24  ;;  %100 = vadd.xlane.f32.xlu0 %v99_v55  ;;  %v10020_v17 = vadd.f32 %v9991_v38, %v142_v52  ;;  %v132_v59 = vmul.f32 %v9549_v53, %v9897_v25  ;;  %v7430_v24 = vld [vmem:[%s11755_s2 + $0x70] ss:$0 sm:$0xff] }
 0x13e   :  { %v10027_v48 = vadd.f32 %v9991_v38, %v143_v56  ;;  %v80_v60 = vmul.f32 %v10014_v54, %v10014_v54  ;;  %v189_v61 = vmul.f32 %v9551_v57, %v9906_v34 }
 0x13f   :  { %8167 = vmatmul.mubr.msk.f32.vlgmr.msra.gmra.mrb[0].mxu1 %vm31_vm0, %v10020_v17  ;;  %v144_v63 = vmul.f32 %v9983_v29, %v132_v59 }
 0x140   :  { %v9553_v0 = vpop.eup %9552  ;;  %8169 = vmatprep.mubr.msk.f32.mxu1 %vm31_vm0, %v10027_v48  ;;  %v102_v25 = vsel %vm31_vm0, %v80_v60, 0.0  ;;  %v195_v1 = vmul.f32 %v7428_v58, %v189_v61 }
 0x141   :  { %103 = vadd.xlane.f32.xlu1 %v102_v25  ;;  %v190_v2 = vmul.f32 %v9553_v0, %v9909_v35  ;;  %v156_v34 = vadd.f32 %v9991_v38, %v144_v63  ;;  %v444_v35 = vld [vmem:[%s11755_s2 + $0x98] sm:$0xff] }
 0x142   :  { %v201_v3 = vadd.f32 %v7429_v62, %v195_v1  ;;  %v8851_v7 = vpack.c.bf16 %v444_v35, %v443_v6 }
 0x143   :  { %v196_v4 = vmul.f32 %v7428_v58, %v190_v2  ;;  %8170 = vmatmul.mubr.msk.f32.gmra.mrb[2].mxu1 %vm31_vm0, %v156_v34 }
 0x144   :  { %8156 = vmatprep.mubr.msk.f32.mxu0 %vm163_vm1, %v201_v3  ;;  %8852 = vmatprep.subr.bf16.mxu1 %v8851_v7 }
 0x145   :  { %v202_v5 = vadd.f32 %v7429_v62, %v196_v4  ;;  %8854 = vmatpush3.bf16.msra.mxu1 %v8851_v7 }
 0x147   :  { %8157 = vmatmul.mubr.msk.f32.vlgmr.msra.gmra.mrb[0].mxu0 %vm163_vm1, %v202_v5 }
 0x148   :  { %8159 = vmatprep.mubr.msk.f32.mxu0 %vm163_vm1, %v201_v3 }
 0x14b   :  { %8160 = vmatmul.mubr.msk.f32.gmra.mrb[2].mxu0 %vm163_vm1, %v202_v5  ;;  %v7444_v5 = vld [vmem:[%s11755_s2 + $0xa0] ss:$0 sm:$0xff] }
 0x1c6   :  { %v95_v10 = vpop.xlane.xlu0 %94 }
 0x1c7   :  { %v109_v11 = vmul.f32 0.0625, %v95_v10 }
 0x1c9   :  { %v117_v12 = vadd.f32 1e-05, %v109_v11 }
 0x1ca   :  { %v98_v13 = vpop.xlane.xlu1 %97  ;;  %v101_v14 = vpop.xlane.xlu0 %100 }
 0x1cb   :  { %9554 = vrsqrt.f32 %v117_v12  ;;  %v110_v15 = vmul.f32 0.0625, %v98_v13  ;;  %v111_v18 = vmul.f32 0.0625, %v101_v14 }
 0x1cd   :  { %v118_v19 = vadd.f32 1e-05, %v110_v15  ;;  %v119_v20 = vadd.f32 1e-05, %v111_v18 }
 0x1ce   :  { %v104_v21 = vpop.xlane.xlu1 %103 }
 0x1cf   :  { %9556 = vrsqrt.f32 %v118_v19  ;;  %v112_v22 = vmul.f32 0.0625, %v104_v21 }
 0x1d0   :  { %9558 = vrsqrt.f32 %v119_v20 }
 0x1d1   :  { %v120_v23 = vadd.f32 1e-05, %v112_v22 }
 0x1d3   :  { %9560 = vrsqrt.f32 %v120_v23 }
 0x1d5   :  { %v9555_v26 = vpop.eup %9554 }
 0x1d6   :  { %v133_v27 = vmul.f32 %v9555_v26, %v9978_v28 }
 0x1d8   :  { %v145_v30 = vmul.f32 %v9983_v29, %v133_v27 }
 0x1d9   :  { %v9557_v31 = vpop.eup %9556 }
 0x1da   :  { %v9559_v32 = vpop.eup %9558  ;;  %v157_v33 = vadd.f32 %v9991_v38, %v145_v30  ;;  %v134_v36 = vmul.f32 %v9557_v31, %v9995_v41 }
 0x1db   :  { %v135_v37 = vmul.f32 %v9559_v32, %v9998_v42 }
 0x1dc   :  { %8172 = vmatprep.mubr.msk.f32.mxu1 %vm31_vm0, %v157_v33  ;;  %v146_v39 = vmul.f32 %v9983_v29, %v134_v36 }
 0x1dd   :  { %v9561_v40 = vpop.eup %9560  ;;  %v147_v16 = vmul.f32 %v9983_v29, %v135_v37 }
 0x1de   :  { %v158_v43 = vadd.f32 %v9991_v38, %v146_v39  ;;  %v136_v28 = vmul.f32 %v9561_v40, %v10014_v54 }
 0x1df   :  { %v159_v46 = vadd.f32 %v9991_v38, %v147_v16 }
 0x1e0   :  { %8173 = vmatmul.mubr.msk.f32.gmra.mrb[4].mxu1 %vm31_vm0, %v158_v43  ;;  %v148_v49 = vmul.f32 %v9983_v29, %v136_v28  ;;  %v7435_v29 = vld [vmem:[%s11755_s2 + $0x88] ss:$0 sm:$0xff] }
 0x1e1   :  { %8175 = vmatprep.mubr.msk.f32.mxu1 %vm31_vm0, %v159_v46 }
 0x1e2   :  { %v160_v41 = vadd.f32 %v9991_v38, %v148_v49 }
 0x1e4   :  { %8176 = vmatmul.mubr.msk.f32.gmra.mrb[6].mxu1 %vm31_vm0, %v160_v41 }
 0x1e5   :  { %8182 = vmatprep.mubr.msk.f32.mxu1 %vm31_vm0, %v10002_v47 }
 0x1e8   :  { %8183 = vmatmul.mubr.msk.f32.vlgmr.msra.gmra.mrb[8].mxu1 %vm31_vm0, %v10020_v17 }
 0x1e9   :  { %8185 = vmatprep.mubr.msk.f32.mxu1 %vm31_vm0, %v10027_v48 }
 0x1ec   :  { %8186 = vmatmul.mubr.msk.f32.gmra.mrb[10].mxu1 %vm31_vm0, %v156_v34 }
 0x1ed   :  { %8188 = vmatprep.mubr.msk.f32.mxu1 %vm31_vm0, %v157_v33 }
 0x1f0   :  { %8189 = vmatmul.mubr.msk.f32.gmra.mrb[12].mxu1 %vm31_vm0, %v158_v43 }
 0x1f1   :  { %8191 = vmatprep.mubr.msk.f32.mxu1 %vm31_vm0, %v159_v46 }
 0x1f4   :  { %8192 = vmatmul.mubr.msk.f32.gmra.mrb[14].mxu1 %vm31_vm0, %v160_v41 }
 0x212   :  { %v8168_v38 = vpop.f32.mrb[0].mxu1 }
 0x213   :  { %v410_v42 = vadd.f32 %v8168_v38, %v7435_v29  ;;  %v404_v47 = vpop.f32.mrb[1].mxu1 }
 0x214   :  { %v405_v50 = vadd.f32 %v7435_v29, %v404_v47 }
 0x216   :  { %v8855_v44 = vpack.c.bf16 %v410_v42, %v405_v50  ;;  %v8171_v45 = vpop.f32.mrb[2].mxu1 }
 0x217   :  { %v420_v52 = vadd.f32 %v8171_v45, %v7435_v29  ;;  %v414_v53 = vpop.f32.mrb[3].mxu1 }
 0x218   :  { %v415_v54 = vadd.f32 %v7435_v29, %v414_v53  ;;  %8857 = vmatprep.subr.msk.bf16.mxu0 %vm10086_vm2, %v8855_v44 }
 0x219   :  { %8860 = vmatpush3.bf16.xpose.msk.msra.mxu0 %vm10086_vm2, %v8855_v44 }
 0x21a   :  { %v8861_v55 = vpack.c.bf16 %v420_v52, %v415_v54  ;;  %v8158_v56 = vpop.f32.mrb[0].mxu0 }
 0x21b   :  { %v288_v57 = vpop.f32.mrb[1].mxu0  ;;  %v294_v60 = vadd.f32 %v8158_v56, %v7430_v24 }
 0x21c   :  { %v289_v17 = vadd.f32 %v7430_v24, %v288_v57  ;;  %8863 = vmatprep.subr.msk.bf16.mxu0 %vm10086_vm2, %v8861_v55 }
 0x21e   :  { %v8161_v58 = vpop.f32.mrb[2].mxu0  ;;  %8202 = vmatprep.mubr.msk.f32.mxu0 %vm163_vm1, %v289_v17 }
 0x21f   :  { %v304_v59 = vadd.f32 %v8161_v58, %v7430_v24  ;;  %v298_v48 = vpop.f32.mrb[3].mxu0 }
 0x220   :  { %v299_v61 = vadd.f32 %v7430_v24, %v298_v48 }
 0x221   :  { %8866 = vmatpush3.bf16.xpose.msk.msra.mxu0 %vm10086_vm2, %v8861_v55 }
 0x228   :  { %8203 = vmatmul.mubr.msk.f32.vlgmr.msra.gmra.mrb[4].mxu0 %vm163_vm1, %v294_v60 }
 0x229   :  { %8224 = vmatprep.mubr.msk.f32.mxu0 %vm163_vm1, %v299_v61 }
 0x2b3   :  { %v8174_v62 = vpop.f32.mrb[4].mxu1 }
 0x2b4   :  { %v430_v63 = vadd.f32 %v8174_v62, %v7435_v29  ;;  %v424_v0 = vpop.f32.mrb[5].mxu1 }
 0x2b5   :  { %v425_v25 = vadd.f32 %v7435_v29, %v424_v0 }
 0x2b7   :  { %v8875_v1 = vpack.c.bf16 %v430_v63, %v425_v25  ;;  %v8177_v2 = vpop.f32.mrb[6].mxu1 }
 0x2b8   :  { %v440_v34 = vadd.f32 %v8177_v2, %v7435_v29  ;;  %v434_v3 = vpop.f32.mrb[7].mxu1 }
 0x2b9   :  { %v435_v4 = vadd.f32 %v7435_v29, %v434_v3  ;;  %8877 = vmatprep.subr.msk.bf16.mxu0 %vm10086_vm2, %v8875_v1  ;;  %v952_v3 = vld [vmem:[%s11755_s2 + $0xa8] sm:$0xff] }
 0x2ba   :  { %8880 = vmatpush3.bf16.xpose.msk.msra.mxu0 %vm10086_vm2, %v8875_v1 }
 0x2bb   :  { %v8881_v6 = vpack.c.bf16 %v440_v34, %v435_v4  ;;  %v8184_v35 = vpop.f32.mrb[8].mxu1  ;;  %v953_v4 = vld [vmem:[%s11755_s2 + $0xb0] sm:$0xff] }
 0x2bc   :  { %v522_v7 = vadd.f32 %v8184_v35, %v7444_v5  ;;  %v516_v10 = vpop.f32.mrb[9].mxu1 }
 0x2bd   :  { %v517_v11 = vadd.f32 %v7444_v5, %v516_v10  ;;  %8883 = vmatprep.subr.msk.bf16.mxu0 %vm10086_vm2, %v8881_v6  ;;  %v954_v10 = vld [vmem:[%s11755_s2 + $0xb8] sm:$0xff] }
 0x2bf   :  { %v8867_v12 = vpack.c.bf16 %v522_v7, %v517_v11  ;;  %v8187_v13 = vpop.f32.mrb[10].mxu1  ;;  %v955_v11 = vld [vmem:[%s11755_s2 + $0xc0] sm:$0xff] }
 0x2c0   :  { %v532_v14 = vadd.f32 %v8187_v13, %v7444_v5  ;;  %v526_v15 = vpop.f32.mrb[11].mxu1 }
 0x2c1   :  { %v527_v18 = vadd.f32 %v7444_v5, %v526_v15  ;;  %8868 = vmatprep.subr.bf16.mxu1 %v8867_v12  ;;  %v8899_v15 = vpack.c.bf16 %v955_v11, %v954_v10 }
 0x2c2   :  { %8870 = vmatpush3.bf16.msra.mxu1 %v8867_v12  ;;  %8886 = vmatpush3.bf16.xpose.msk.msra.mxu0 %vm10086_vm2, %v8881_v6 }
 0x2c3   :  { %v8871_v19 = vpack.c.bf16 %v532_v14, %v527_v18  ;;  %v8190_v20 = vpop.f32.mrb[12].mxu1  ;;  %v956_v18 = vld [vmem:[%s11755_s2 + $0xc8] sm:$0xff] }
 0x2c4   :  { %v542_v21 = vadd.f32 %v8190_v20, %v7444_v5  ;;  %v536_v22 = vpop.f32.mrb[13].mxu1 }
 0x2c5   :  { %v537_v23 = vadd.f32 %v7444_v5, %v536_v22  ;;  %8872 = vmatprep.subr.bf16.mxu1 %v8871_v19  ;;  %v959_v22 = vld [vmem:[%s11755_s2 + $0xe0] sm:$0xff] }
 0x2c6   :  { %8874 = vmatpush3.bf16.msra.mxu1 %v8871_v19  ;;  %v957_v19 = vld [vmem:[%s11755_s2 + $0xd0] sm:$0xff] }
 0x2c7   :  { %v8887_v26 = vpack.c.bf16 %v542_v21, %v537_v23  ;;  %v8193_v27 = vpop.f32.mrb[14].mxu1  ;;  %v8903_v20 = vpack.c.bf16 %v957_v19, %v956_v18  ;;  %v958_v21 = vld [vmem:[%s11755_s2 + $0xd8] sm:$0xff] }
 0x2c8   :  { %v552_v30 = vadd.f32 %v8193_v27, %v7444_v5  ;;  %v546_v31 = vpop.f32.mrb[15].mxu1  ;;  %v8907_v23 = vpack.c.bf16 %v959_v22, %v958_v21  ;;  %v7475_v21 = vld [vmem:[%s11755_s2 + $0xf8] ss:$0 sm:$0xff] }
 0x2c9   :  { %v547_v32 = vadd.f32 %v7444_v5, %v546_v31  ;;  %8225 = vmatmul.mubr.msk.f32.vlgmr.msra.gmra.mrb[6].mxu0 %vm163_vm1, %v304_v59  ;;  %8888 = vmatprep.subr.bf16.mxu1 %v8887_v26  ;;  %v8895_v5 = vpack.c.bf16 %v953_v4, %v952_v3 }
 0x2cb   :  { %v8891_v33 = vpack.c.bf16 %v552_v30, %v547_v32  ;;  %v7469_v32 = vld [vmem:[%s11755_s2 + $0xe8] ss:$0 sm:$0xff] }
 0x2fb   :  { %v8204_v36 = vpop.f32.mrb[4].mxu0 }
 0x2fc   :  { %v649_v37 = vmul.f32 0.125, %v8204_v36  ;;  %v639_v39 = vpop.f32.mrb[5].mxu0 }
 0x2fd   :  { %v648_v40 = vmul.f32 0.125, %v639_v39 }
 0x2fe   :  { %v654_v16 = vsel %vm650_vm3, %v649_v37, -inf }
 0x2ff   :  { %655 = vmax.xlane.f32.xlu1 %v654_v16  ;;  %v651_v43 = vsel %vm650_vm3, %v648_v40, -inf }
 0x300   :  { %652 = vmax.xlane.f32.xlu0 %v651_v43 }
 0x38c   :  { %v656_v28 = vpop.xlane.xlu1 %655 }
 0x38d   :  { %v658_v46 = vsub.f32 %v649_v37, %v656_v28  ;;  %v653_v49 = vpop.xlane.xlu0 %652 }
 0x38e   :  { %v657_v41 = vsub.f32 %v648_v40, %v653_v49 }
 0x38f   :  { %v661_v29 = vmul.f32 1.442695, %v658_v46 }
 0x390   :  { %v659_v38 = vmul.f32 1.442695, %v657_v41 }
 0x391   :  { %9562 = vpow2.f32 %v661_v29 }
 0x392   :  { %9564 = vpow2.f32 %v659_v38 }
 0x39b   :  { %v9563_v42 = vpop.eup %9562 }
 0x39c   :  { %v9565_v47 = vpop.eup %9564  ;;  %v8226_v50 = vpop.f32.mrb[6].mxu0  ;;  %v666_v51 = vsel %vm650_vm3, %v9563_v42, 0.0 }
 0x39d   :  { %v848_v44 = vmul.f32 0.125, %v8226_v50  ;;  %667 = vadd.xlane.f32.xlu1 %v666_v51  ;;  %v838_v45 = vpop.f32.mrb[7].mxu0  ;;  %v663_v52 = vsel %vm650_vm3, %v9565_v47, 0.0 }
 0x39e   :  { %v847_v53 = vmul.f32 0.125, %v838_v45  ;;  %664 = vadd.xlane.f32.xlu0 %v663_v52 }
 0x39f   :  { %v852_v54 = vsel %vm650_vm3, %v848_v44, -inf }
 0x3a0   :  { %v849_v24 = vsel %vm650_vm3, %v847_v53, -inf }
 0x3a1   :  { %853 = vmax.xlane.f32.xlu1 %v852_v54 }
 0x3a2   :  { %850 = vmax.xlane.f32.xlu0 %v849_v24 }
 0x42a   :  { %v668_v55 = vpop.xlane.xlu1 %667 }
 0x42b   :  { %9566 = vrcp.f32 %v668_v55  ;;  %v665_v56 = vpop.xlane.xlu0 %664 }
 0x42c   :  { %9568 = vrcp.f32 %v665_v56 }
 0x42e   :  { %v854_v57 = vpop.xlane.xlu1 %853 }
 0x42f   :  { %v856_v17 = vsub.f32 %v848_v44, %v854_v57  ;;  %v851_v58 = vpop.xlane.xlu0 %850 }
 0x430   :  { %v855_v59 = vsub.f32 %v847_v53, %v851_v58 }
 0x431   :  { %v859_v48 = vmul.f32 1.442695, %v856_v17  ;;  %v1136_v17 = vld [vmem:[%s11755_s2 + $0x100] sm:$0xff] }
 0x432   :  { %v857_v60 = vmul.f32 1.442695, %v855_v59  ;;  %v1139_v59 = vld [vmem:[%s11755_s2 + $0x118] sm:$0xff] }
 0x433   :  { %9570 = vpow2.f32 %v859_v48 }
 0x434   :  { %9572 = vpow2.f32 %v857_v60  ;;  %v1140_v60 = vld [vmem:[%s11755_s2 + $0x120] sm:$0xff] }
 0x435   :  { %v9567_v61 = vpop.eup %9566 }
 0x436   :  { %v9569_v62 = vpop.eup %9568  ;;  %v672_v0 = vmul.f32 %v9567_v61, %v9563_v42  ;;  %v1141_v61 = vld [vmem:[%s11755_s2 + $0x128] sm:$0xff] }
 0x437   :  { %v671_v63 = vmul.f32 %v9569_v62, %v9565_v47  ;;  %v8919_v62 = vpack.c.bf16 %v1141_v61, %v1140_v60 }
 0x439   :  { %8213 = vmatprep.mubr.msk.f32.mxu1 %vm650_vm3, %v671_v63  ;;  %v1142_v63 = vld [vmem:[%s11755_s2 + $0x130] sm:$0xff] }
 0x43a   :  { %8214 = vmatmul.mubr.msk.f32.vlgmr.msra.gmra.mrb[16].mxu1 %vm650_vm3, %v672_v0  ;;  %v1143_v0 = vld [vmem:[%s11755_s2 + $0x138] sm:$0xff] }
 0x43b   :  { %8890 = vmatpush3.bf16.msra.mxu1 %v8887_v26 }
 0x43c   :  { %8892 = vmatprep.subr.bf16.mxu1 %v8891_v33 }
 0x43d   :  { %v9571_v25 = vpop.eup %9570 }
 0x43e   :  { %v9573_v1 = vpop.eup %9572  ;;  %v864_v2 = vsel %vm650_vm3, %v9571_v25, 0.0 }
 0x43f   :  { %8894 = vmatpush3.bf16.msra.mxu1 %v8891_v33  ;;  %865 = vadd.xlane.f32.xlu1 %v864_v2  ;;  %v861_v34 = vsel %vm650_vm3, %v9573_v1, 0.0 }
 0x440   :  { %862 = vadd.xlane.f32.xlu0 %v861_v34  ;;  %8896 = vmatprep.subr.bf16.mxu1 %v8895_v5 }
 0x4cc   :  { %v866_v6 = vpop.xlane.xlu1 %865 }
 0x4cd   :  { %9574 = vrcp.f32 %v866_v6  ;;  %v863_v35 = vpop.xlane.xlu0 %862 }
 0x4ce   :  { %9576 = vrcp.f32 %v863_v35 }
 0x4d7   :  { %v9575_v7 = vpop.eup %9574 }
 0x4d8   :  { %v9577_v12 = vpop.eup %9576  ;;  %v870_v14 = vmul.f32 %v9575_v7, %v9571_v25  ;;  %v8923_v25 = vpack.c.bf16 %v1143_v0, %v1142_v63 }
 0x4d9   :  { %v869_v13 = vmul.f32 %v9577_v12, %v9573_v1  ;;  %v7474_v12 = vld [vmem:[%s11755_s2 + $0xf0] ss:$0 sm:$0xff] }
 0x4db   :  { %8235 = vmatprep.mubr.msk.f32.mxu1 %vm650_vm3, %v869_v13 }
 0x4dc   :  { %8236 = vmatmul.mubr.msk.f32.vlgmr.msra.gmra.mrb[18].mxu1 %vm650_vm3, %v870_v14 }
 0x4dd   :  { %8898 = vmatpush3.bf16.msra.mxu1 %v8895_v5 }
 0x4de   :  { %8900 = vmatprep.subr.bf16.mxu1 %v8899_v15 }
 0x4e1   :  { %8902 = vmatpush3.bf16.msra.mxu1 %v8899_v15 }
 0x4e2   :  { %8904 = vmatprep.subr.bf16.mxu1 %v8903_v20 }
 0x4e5   :  { %8906 = vmatpush3.bf16.msra.mxu1 %v8903_v20 }
 0x4e6   :  { %8908 = vmatprep.subr.bf16.mxu1 %v8907_v23 }
 0x4e9   :  { %8910 = vmatpush3.bf16.msra.mxu1 %v8907_v23 }
 0x50d   :  { %v8215_v26 = vpop.f32.mrb[16].mxu1 }
 0x50e   :  { %v745_v27 = vpop.f32.mrb[17].mxu1 }
 0x50f   :  { %8254 = vmatprep.mubr.msk.f32.mxu1 %vm163_vm1, %v745_v27 }
 0x510   :  { %8255 = vmatmul.mubr.msk.f32.vlgmr.msra.gmra.mrb[20].mxu1 %vm163_vm1, %v8215_v26 }
 0x5af   :  { %v8237_v30 = vpop.f32.mrb[18].mxu1 }
 0x5b0   :  { %v943_v31 = vpop.f32.mrb[19].mxu1 }
 0x5b1   :  { %8257 = vmatprep.mubr.msk.f32.mxu1 %vm163_vm1, %v943_v31 }
 0x5b2   :  { %8258 = vmatmul.mubr.msk.f32.gmra.mrb[22].mxu1 %vm163_vm1, %v8237_v30 }
 0x5e3   :  { %v8256_v33 = vpop.f32.mrb[20].mxu1 }
 0x5e4   :  { %v1049_v36 = vadd.f32 %v8256_v33, %v7469_v32  ;;  %v1043_v37 = vpop.f32.mrb[21].mxu1  ;;  %v1266_v33 = vld [vmem:[%s11755_s2 + $0x148] sm:$0xff] }
 0x5e5   :  { %v1044_v39 = vadd.f32 %v7469_v32, %v1043_v37 }
 0x5e6   :  { %v10160_v40 = vadd.f32 %v1049_v36, %v9881_v9  ;;  %v1267_v36 = vld [vmem:[%s11755_s2 + $0x150] sm:$0xff] }
 0x5e7   :  { %v10163_v16 = vadd.f32 %v1044_v39, %v9876_v8  ;;  %v8927_v37 = vpack.c.bf16 %v1267_v36, %v1266_v33  ;;  %v1268_v39 = vld [vmem:[%s11755_s2 + $0x158] sm:$0xff] }
 0x5e8   :  { %v1071_v43 = vsel %vm163_vm1, %v10160_v40, 0.0 }
 0x5e9   :  { %1072 = vadd.xlane.f32.xlu1 %v1071_v43  ;;  %v1068_v28 = vsel %vm163_vm1, %v10163_v16, 0.0  ;;  %8928 = vmatprep.subr.bf16.mxu1 %v8927_v37  ;;  %v1269_v43 = vld [vmem:[%s11755_s2 + $0x160] sm:$0xff] }
 0x5ea   :  { %1069 = vadd.xlane.f32.xlu0 %v1068_v28  ;;  %8930 = vmatpush3.bf16.msra.mxu1 %v8927_v37  ;;  %v8931_v28 = vpack.c.bf16 %v1269_v43, %v1268_v39 }
 0x5ec   :  { %8932 = vmatprep.subr.bf16.mxu1 %v8931_v28 }
 0x5ee   :  { %8934 = vmatpush3.bf16.msra.mxu1 %v8931_v28 }
 0x676   :  { %v1073_v46 = vpop.xlane.xlu1 %1072 }
 0x677   :  { %v1081_v49 = vmul.f32 0.015625, %v1073_v46  ;;  %v1070_v41 = vpop.xlane.xlu0 %1069  ;;  %v1270_v46 = vld [vmem:[%s11755_s2 + $0x168] sm:$0xff] }
 0x678   :  { %v1080_v29 = vmul.f32 0.015625, %v1070_v41 }
 0x679   :  { %v1085_v38 = vsub.f32 %v10160_v40, %v1081_v49  ;;  %v1271_v49 = vld [vmem:[%s11755_s2 + $0x170] sm:$0xff] }
 0x67a   :  { %v1084_v42 = vsub.f32 %v10163_v16, %v1080_v29  ;;  %v8935_v41 = vpack.c.bf16 %v1271_v49, %v1270_v46  ;;  %v1272_v29 = vld [vmem:[%s11755_s2 + $0x178] sm:$0xff] }
 0x67b   :  { %v1089_v47 = vmul.f32 %v1085_v38, %v1085_v38 }
 0x67c   :  { %v1088_v50 = vmul.f32 %v1084_v42, %v1084_v42  ;;  %8936 = vmatprep.subr.bf16.mxu1 %v8935_v41 }
 0x67d   :  { %v1095_v51 = vsel %vm163_vm1, %v1089_v47, 0.0  ;;  %8938 = vmatpush3.bf16.msra.mxu1 %v8935_v41 }
 0x67e   :  { %1096 = vadd.xlane.f32.xlu1 %v1095_v51  ;;  %v1092_v44 = vsel %vm163_vm1, %v1088_v50, 0.0 }
 0x67f   :  { %1093 = vadd.xlane.f32.xlu0 %v1092_v44 }
 0x685   :  { %v8259_v45 = vpop.f32.mrb[22].mxu1 }
 0x686   :  { %v1059_v52 = vadd.f32 %v8259_v45, %v7469_v32  ;;  %v1053_v53 = vpop.f32.mrb[23].mxu1 }
 0x687   :  { %v1054_v54 = vadd.f32 %v7469_v32, %v1053_v53 }
 0x688   :  { %v10174_v24 = vadd.f32 %v1059_v52, %v9881_v9  ;;  %v1137_v9 = vld [vmem:[%s11755_s2 + $0x108] sm:$0xff] }
 0x689   :  { %v10177_v55 = vadd.f32 %v1054_v54, %v9876_v8  ;;  %v8911_v58 = vpack.c.bf16 %v1137_v9, %v1136_v17  ;;  %v1138_v8 = vld [vmem:[%s11755_s2 + $0x110] sm:$0xff] }
 0x68a   :  { %v1077_v56 = vsel %vm163_vm1, %v10174_v24, 0.0  ;;  %v8915_v48 = vpack.c.bf16 %v1139_v59, %v1138_v8  ;;  %v7476_v59 = vld [vmem:[%s11755_s2 + $0x140] ss:$0 sm:$0xff] }
 0x68b   :  { %1078 = vadd.xlane.f32.xlu1 %v1077_v56  ;;  %v1074_v57 = vsel %vm163_vm1, %v10177_v55, 0.0  ;;  %8912 = vmatprep.subr.bf16.mxu0 %v8911_v58 }
 0x68c   :  { %1075 = vadd.xlane.f32.xlu0 %v1074_v57  ;;  %8914 = vmatpush3.bf16.msra.mxu0 %v8911_v58 }
 0x68d   :  { %8916 = vmatprep.subr.bf16.mxu0 %v8915_v48 }
 0x690   :  { %8918 = vmatpush3.bf16.msra.mxu0 %v8915_v48 }
 0x691   :  { %8920 = vmatprep.subr.bf16.mxu0 %v8919_v62 }
 0x694   :  { %8922 = vmatpush3.bf16.msra.mxu0 %v8919_v62 }
 0x695   :  { %8924 = vmatprep.subr.bf16.mxu0 %v8923_v25 }
 0x698   :  { %8926 = vmatpush3.bf16.msra.mxu0 %v8923_v25 }
 0x70b   :  { %v1097_v1 = vpop.xlane.xlu1 %1096 }
 0x70c   :  { %v1105_v2 = vmul.f32 0.015625, %v1097_v1  ;;  %v1094_v34 = vpop.xlane.xlu0 %1093 }
 0x70d   :  { %v1104_v3 = vmul.f32 0.015625, %v1094_v34 }
 0x70e   :  { %v1109_v4 = vadd.f32 1e-05, %v1105_v2 }
 0x70f   :  { %v1108_v5 = vadd.f32 1e-05, %v1104_v3 }
 0x710   :  { %9578 = vrsqrt.f32 %v1109_v4 }
 0x711   :  { %9580 = vrsqrt.f32 %v1108_v5 }
 0x718   :  { %v1079_v6 = vpop.xlane.xlu1 %1078 }
 0x719   :  { %v1083_v35 = vmul.f32 0.015625, %v1079_v6  ;;  %v1076_v7 = vpop.xlane.xlu0 %1075 }
 0x71a   :  { %v9579_v10 = vpop.eup %9578  ;;  %v1082_v11 = vmul.f32 0.015625, %v1076_v7 }
 0x71b   :  { %v9581_v13 = vpop.eup %9580  ;;  %v1117_v14 = vmul.f32 %v9579_v10, %v1085_v38  ;;  %v1087_v15 = vsub.f32 %v10174_v24, %v1083_v35  ;;  %v1273_v38 = vld [vmem:[%s11755_s2 + $0x180] sm:$0xff] }
 0x71c   :  { %v1086_v18 = vsub.f32 %v10177_v55, %v1082_v11  ;;  %v1116_v19 = vmul.f32 %v9581_v13, %v1084_v42  ;;  %v8939_v42 = vpack.c.bf16 %v1273_v38, %v1272_v29 }
 0x71d   :  { %v1091_v20 = vmul.f32 %v1087_v15, %v1087_v15  ;;  %v1125_v22 = vmul.f32 %v7474_v12, %v1117_v14 }
 0x71e   :  { %v1090_v23 = vmul.f32 %v1086_v18, %v1086_v18  ;;  %v1124_v26 = vmul.f32 %v7474_v12, %v1116_v19  ;;  %8940 = vmatprep.subr.bf16.mxu1 %v8939_v42 }
 0x71f   :  { %v1101_v27 = vsel %vm163_vm1, %v1091_v20, 0.0  ;;  %v1133_v32 = vadd.f32 %v7475_v21, %v1125_v22  ;;  %8942 = vmatpush3.bf16.msra.mxu1 %v8939_v42 }
 0x720   :  { %1102 = vadd.xlane.f32.xlu1 %v1101_v27  ;;  %v1098_v30 = vsel %vm163_vm1, %v1090_v23, 0.0  ;;  %v1132_v31 = vadd.f32 %v7475_v21, %v1124_v26  ;;  %v7481_v26 = vld [vmem:[%s11755_s2 + $0x188] ss:$0 sm:$0xff] }
 0x721   :  { %1099 = vadd.xlane.f32.xlu0 %v1098_v30 }
 0x722   :  { %8276 = vmatprep.mubr.msk.f32.mxu0 %vm163_vm1, %v1132_v31 }
 0x723   :  { %8277 = vmatmul.mubr.msk.f32.vlgmr.msra.gmra.mrb[8].mxu0 %vm163_vm1, %v1133_v32 }
 0x7ad   :  { %v1103_v47 = vpop.xlane.xlu1 %1102 }
 0x7ae   :  { %v1107_v50 = vmul.f32 0.015625, %v1103_v47  ;;  %v1100_v51 = vpop.xlane.xlu0 %1099 }
 0x7af   :  { %v1106_v44 = vmul.f32 0.015625, %v1100_v51 }
 0x7b0   :  { %v1111_v45 = vadd.f32 1e-05, %v1107_v50 }
 0x7b1   :  { %v1110_v52 = vadd.f32 1e-05, %v1106_v44 }
 0x7b2   :  { %9582 = vrsqrt.f32 %v1111_v45 }
 0x7b3   :  { %9584 = vrsqrt.f32 %v1110_v52 }
 0x7bc   :  { %v9583_v53 = vpop.eup %9582 }
 0x7bd   :  { %v9585_v54 = vpop.eup %9584  ;;  %v1119_v56 = vmul.f32 %v9583_v53, %v1087_v15 }
 0x7be   :  { %v1118_v57 = vmul.f32 %v9585_v54, %v1086_v18 }
 0x7bf   :  { %v1127_v17 = vmul.f32 %v7474_v12, %v1119_v56  ;;  %v1450_v56 = vld [vmem:[%s11755_s2 + $0x1a0] sm:$0xff] }
 0x7c0   :  { %v1126_v9 = vmul.f32 %v7474_v12, %v1118_v57 }
 0x7c1   :  { %v1135_v8 = vadd.f32 %v7475_v21, %v1127_v17  ;;  %v1561_v17 = vld [vmem:[%s11755_s2 + $0x1f0] sm:$0xff] }
 0x7c2   :  { %v1134_v58 = vadd.f32 %v7475_v21, %v1126_v9 }
 0x7c4   :  { %8279 = vmatprep.mubr.msk.f32.mxu0 %vm163_vm1, %v1134_v58  ;;  %v1452_v58 = vld [vmem:[%s11755_s2 + $0x1b0] sm:$0xff] }
 0x7c5   :  { %8280 = vmatmul.mubr.msk.f32.gmra.mrb[10].mxu0 %vm163_vm1, %v1135_v8  ;;  %v1453_v8 = vld [vmem:[%s11755_s2 + $0x1b8] sm:$0xff] }
 0x7f6   :  { %v8278_v48 = vpop.f32.mrb[8].mxu0 }
 0x7f7   :  { %v1233_v60 = vadd.f32 %v8278_v48, %v7476_v59  ;;  %v1227_v61 = vpop.f32.mrb[9].mxu0  ;;  %v10316_v48 = vpack.c.bf16 %v1453_v8, %v1452_v58 }
 0x7f8   :  { %v1228_v62 = vadd.f32 %v7476_v59, %v1227_v61 }
 0x7f9   :  { %v1251_v63 = vmul.f32 0.70710677, %v1233_v60  ;;  %v1247_v4 = vmul.f32 0.5, %v1233_v60  ;;  %v1563_v60 = vld [vmem:[%s11755_s2 + $0x200] sm:$0xff] }
 0x7fa   :  { %v1250_v0 = vmul.f32 0.70710677, %v1228_v62  ;;  %v1246_v34 = vmul.f32 0.5, %v1228_v62  ;;  %v1454_v62 = vld [vmem:[%s11755_s2 + $0x1c0] sm:$0xff] }
 0x7fb   :  { %9586 = verf.f32 %v1251_v63  ;;  %v1455_v63 = vld [vmem:[%s11755_s2 + $0x1c8] sm:$0xff] }
 0x7fc   :  { %9588 = verf.f32 %v1250_v0  ;;  %v1564_v0 = vld [vmem:[%s11755_s2 + $0x208] sm:$0xff] }
 0x805   :  { %v9587_v25 = vpop.eup %9586 }
 0x806   :  { %v9589_v1 = vpop.eup %9588  ;;  %v1259_v2 = vadd.f32 1.0, %v9587_v25  ;;  %v10336_v25 = vpack.c.bf16 %v1455_v63, %v1454_v62 }
 0x807   :  { %v1258_v3 = vadd.f32 1.0, %v9589_v1  ;;  %v1565_v1 = vld [vmem:[%s11755_s2 + $0x210] sm:$0xff] }
 0x808   :  { %v1263_v6 = vmul.f32 %v1259_v2, %v1247_v4  ;;  %v10341_v2 = vpack.c.bf16 %v1565_v1, %v1564_v0  ;;  %v1566_v4 = vld [vmem:[%s11755_s2 + $0x218] sm:$0xff] }
 0x809   :  { %v1262_v5 = vmul.f32 %v1258_v3, %v1246_v34  ;;  %v1456_v34 = vld [vmem:[%s11755_s2 + $0x1d0] sm:$0xff]  ;;  %v1457_v3 = vld [vmem:[%s11755_s2 + $0x1d8] sm:$0xff] }
 0x80b   :  { %8298 = vmatprep.mubr.msk.f32.mxu1 %vm163_vm1, %v1262_v5  ;;  %v10356_v5 = vpack.c.bf16 %v1457_v3, %v1456_v34 }
 0x80c   :  { %8299 = vmatmul.mubr.msk.f32.vlgmr.msra.gmra.mrb[24].mxu1 %vm163_vm1, %v1263_v6  ;;  %v1567_v6 = vld [vmem:[%s11755_s2 + $0x220] sm:$0xff] }
 0x898   :  { %v8281_v35 = vpop.f32.mrb[10].mxu0 }
 0x899   :  { %v1243_v7 = vadd.f32 %v8281_v35, %v7476_v59  ;;  %v1237_v10 = vpop.f32.mrb[11].mxu0  ;;  %v10361_v35 = vpack.c.bf16 %v1567_v6, %v1566_v4 }
 0x89a   :  { %v1238_v11 = vadd.f32 %v7476_v59, %v1237_v10  ;;  %v1562_v59 = vld [vmem:[%s11755_s2 + $0x1f8] sm:$0xff] }
 0x89b   :  { %v1253_v12 = vmul.f32 0.70710677, %v1243_v7  ;;  %v1249_v21 = vmul.f32 0.5, %v1243_v7  ;;  %v10321_v61 = vpack.c.bf16 %v1563_v60, %v1562_v59 }
 0x89c   :  { %v1252_v13 = vmul.f32 0.70710677, %v1238_v11  ;;  %v1248_v19 = vmul.f32 0.5, %v1238_v11 }
 0x89d   :  { %9590 = verf.f32 %v1253_v12 }
 0x89e   :  { %9592 = verf.f32 %v1252_v13 }
 0x8a7   :  { %v9591_v14 = vpop.eup %9590 }
 0x8a8   :  { %v9593_v15 = vpop.eup %9592  ;;  %v1261_v18 = vadd.f32 1.0, %v9591_v14 }
 0x8a9   :  { %v1260_v20 = vadd.f32 1.0, %v9593_v15 }
 0x8aa   :  { %v1265_v23 = vmul.f32 %v1261_v18, %v1249_v21  ;;  %v7486_v21 = vld [vmem:[%s11755_s2 + $0x190] ss:$0 sm:$0xff] }
 0x8ab   :  { %v1264_v22 = vmul.f32 %v1260_v20, %v1248_v19 }
 0x8ad   :  { %8301 = vmatprep.mubr.msk.f32.mxu1 %vm163_vm1, %v1264_v22 }
 0x8ae   :  { %8302 = vmatmul.mubr.msk.f32.gmra.mrb[26].mxu1 %vm163_vm1, %v1265_v23 }
 0x8df   :  { %v8300_v27 = vpop.f32.mrb[24].mxu1 }
 0x8e0   :  { %v1363_v30 = vadd.f32 %v8300_v27, %v7481_v26  ;;  %v1357_v31 = vpop.f32.mrb[25].mxu1 }
 0x8e1   :  { %v1358_v32 = vadd.f32 %v7481_v26, %v1357_v31 }
 0x8e2   :  { %v10256_v33 = vadd.f32 %v1363_v30, %v10160_v40 }
 0x8e3   :  { %v10259_v36 = vadd.f32 %v1358_v32, %v10163_v16 }
 0x8e4   :  { %v1385_v37 = vsel %vm163_vm1, %v10256_v33, 0.0 }
 0x8e5   :  { %1386 = vadd.xlane.f32.xlu1 %v1385_v37  ;;  %v1382_v39 = vsel %vm163_vm1, %v10259_v36, 0.0 }
 0x8e6   :  { %1383 = vadd.xlane.f32.xlu0 %v1382_v39  ;;  %v7487_v39 = vld [vmem:[%s11755_s2 + $0x198] ss:$0 sm:$0xff] }
 0x972   :  { %v1387_v43 = vpop.xlane.xlu1 %1386 }
 0x973   :  { %v1395_v28 = vmul.f32 0.015625, %v1387_v43  ;;  %v1384_v46 = vpop.xlane.xlu0 %1383 }
 0x974   :  { %v1394_v49 = vmul.f32 0.015625, %v1384_v46 }
 0x975   :  { %v10266_v41 = vsub.f32 %v10256_v33, %v1395_v28 }
 0x976   :  { %v10269_v40 = vsub.f32 %v10259_v36, %v1394_v49 }
 0x977   :  { %v1403_v16 = vmul.f32 %v10266_v41, %v10266_v41 }
 0x978   :  { %v1402_v29 = vmul.f32 %v10269_v40, %v10269_v40 }
 0x979   :  { %v1409_v38 = vsel %vm163_vm1, %v1403_v16, 0.0 }
 0x97a   :  { %1410 = vadd.xlane.f32.xlu1 %v1409_v38  ;;  %v1406_v42 = vsel %vm163_vm1, %v1402_v29, 0.0  ;;  %v1659_v29 = vld [vmem:[%s11755_s2 + $0x238] sm:$0xff]  ;;  %v1660_v38 = vld [vmem:[%s11755_s2 + $0x240] sm:$0xff] }
 0x97b   :  { %1407 = vadd.xlane.f32.xlu0 %v1406_v42 }
 0x981   :  { %v8303_v47 = vpop.f32.mrb[26].mxu1 }
 0x982   :  { %v1373_v50 = vadd.f32 %v8303_v47, %v7481_v26  ;;  %v1367_v51 = vpop.f32.mrb[27].mxu1  ;;  %v1661_v47 = vld [vmem:[%s11755_s2 + $0x248] sm:$0xff] }
 0x983   :  { %v1368_v44 = vadd.f32 %v7481_v26, %v1367_v51  ;;  %v1662_v51 = vld [vmem:[%s11755_s2 + $0x250] sm:$0xff] }
 0x984   :  { %v10278_v45 = vadd.f32 %v1373_v50, %v10174_v24  ;;  %v1451_v24 = vld [vmem:[%s11755_s2 + $0x1a8] sm:$0xff]  ;;  %v10397_v50 = vpack.c.bf16 %v1661_v47, %v1660_v38 }
 0x985   :  { %v10281_v52 = vadd.f32 %v1368_v44, %v10177_v55  ;;  %v1560_v55 = vld [vmem:[%s11755_s2 + $0x1e8] sm:$0xff]  ;;  %v10296_v57 = vpack.c.bf16 %v1451_v24, %v1450_v56  ;;  %v1663_v44 = vld [vmem:[%s11755_s2 + $0x258] sm:$0xff] }
 0x986   :  { %v1391_v53 = vsel %vm163_vm1, %v10278_v45, 0.0  ;;  %v10301_v9 = vpack.c.bf16 %v1561_v17, %v1560_v55  ;;  %v1665_v56 = vld [vmem:[%s11755_s2 + $0x268] sm:$0xff] }
 0x987   :  { %1392 = vadd.xlane.f32.xlu1 %v1391_v53  ;;  %v1388_v54 = vsel %vm163_vm1, %v10281_v52, 0.0  ;;  %8944 = vmatprep.subr.bf16.mxu0 %v10296_v57  ;;  %v10408_v53 = vpack.c.bf16 %v1663_v44, %v1662_v51 }
 0x988   :  { %1389 = vadd.xlane.f32.xlu0 %v1388_v54  ;;  %8960 = vmatprep.subr.bf16.mxu1 %v10301_v9  ;;  %v1664_v54 = vld [vmem:[%s11755_s2 + $0x260] sm:$0xff] }
 0x989   :  { %8946 = vmatpush3.bf16.msra.mxu0 %v10296_v57  ;;  %8962 = vmatpush3.bf16.msra.mxu1 %v10301_v9  ;;  %v10419_v24 = vpack.c.bf16 %v1665_v56, %v1664_v54 }
 0x98a   :  { %8948 = vmatprep.subr.bf16.mxu0 %v10316_v48  ;;  %8964 = vmatprep.subr.bf16.mxu1 %v10321_v61 }
 0x98d   :  { %8950 = vmatpush3.bf16.msra.mxu0 %v10316_v48  ;;  %8966 = vmatpush3.bf16.msra.mxu1 %v10321_v61 }
 0x98e   :  { %8952 = vmatprep.subr.bf16.mxu0 %v10336_v25  ;;  %8968 = vmatprep.subr.bf16.mxu1 %v10341_v2 }
 0x991   :  { %8954 = vmatpush3.bf16.msra.mxu0 %v10336_v25  ;;  %8970 = vmatpush3.bf16.msra.mxu1 %v10341_v2 }
 0x992   :  { %8956 = vmatprep.subr.bf16.mxu0 %v10356_v5  ;;  %8972 = vmatprep.subr.bf16.mxu1 %v10361_v35 }
 0x995   :  { %8958 = vmatpush3.bf16.msra.mxu0 %v10356_v5  ;;  %8974 = vmatpush3.bf16.msra.mxu1 %v10361_v35 }
 0xa07   :  { %v1411_v7 = vpop.xlane.xlu1 %1410 }
 0xa08   :  { %v1419_v10 = vmul.f32 0.015625, %v1411_v7  ;;  %v1408_v11 = vpop.xlane.xlu0 %1407  ;;  %v7493_v7 = vld [vmem:[%s11755_s2 + $0x228] ss:$0 sm:$0xff] }
 0xa09   :  { %v1418_v12 = vmul.f32 0.015625, %v1408_v11 }
 0xa0a   :  { %v1423_v13 = vadd.f32 1e-05, %v1419_v10  ;;  %v10437_v10 = vld [vmem:[%s11755_s2 + $0x1e0] ss:$0 sm:$0xff] }
 0xa0b   :  { %v1422_v14 = vadd.f32 1e-05, %v1418_v12 }
 0xa0c   :  { %9594 = vrsqrt.f32 %v1423_v13 }
 0xa0d   :  { %9596 = vrsqrt.f32 %v1422_v14 }
 0xa14   :  { %v1393_v15 = vpop.xlane.xlu1 %1392 }
 0xa15   :  { %v1397_v18 = vmul.f32 0.015625, %v1393_v15  ;;  %v1390_v19 = vpop.xlane.xlu0 %1389 }
 0xa16   :  { %v9595_v20 = vpop.eup %9594  ;;  %v1396_v22 = vmul.f32 0.015625, %v1390_v19 }
 0xa17   :  { %v9597_v23 = vpop.eup %9596  ;;  %v1431_v26 = vmul.f32 %v9595_v20, %v10266_v41  ;;  %v1401_v27 = vsub.f32 %v10278_v45, %v1397_v18 }
 0xa18   :  { %v1400_v30 = vsub.f32 %v10281_v52, %v1396_v22  ;;  %v1430_v31 = vmul.f32 %v9597_v23, %v10269_v40  ;;  %v1658_v40 = vld [vmem:[%s11755_s2 + $0x230] sm:$0xff] }
 0xa19   :  { %v1439_v32 = vmul.f32 %v7486_v21, %v1431_v26  ;;  %v1405_v37 = vmul.f32 %v1401_v27, %v1401_v27  ;;  %v10392_v42 = vpack.c.bf16 %v1659_v29, %v1658_v40 }
 0xa1a   :  { %v1404_v43 = vmul.f32 %v1400_v30, %v1400_v30  ;;  %v1438_v28 = vmul.f32 %v7486_v21, %v1430_v31 }
 0xa1b   :  { %v1415_v46 = vsel %vm163_vm1, %v1405_v37, 0.0  ;;  %v1447_v16 = vadd.f32 %v7487_v39, %v1439_v32  ;;  %8976 = vmatprep.subr.bf16.mxu0 %v10392_v42 }
 0xa1c   :  { %1416 = vadd.xlane.f32.xlu1 %v1415_v46  ;;  %v1412_v49 = vsel %vm163_vm1, %v1404_v43, 0.0  ;;  %v1446_v41 = vadd.f32 %v7487_v39, %v1438_v28 }
 0xa1d   :  { %1413 = vadd.xlane.f32.xlu0 %v1412_v49 }
 0xa1e   :  { %8320 = vmatprep.mubr.msk.f32.mxu0 %vm163_vm1, %v1446_v41  ;;  %8342 = vmatprep.mubr.msk.f32.mxu1 %vm163_vm1, %v1446_v41 }
 0xa1f   :  { %8321 = vmatmul.mubr.msk.f32.vlgmr.msra.gmra.mrb[12].mxu0 %vm163_vm1, %v1447_v16  ;;  %8343 = vmatmul.mubr.msk.f32.vlgmr.msra.gmra.mrb[28].mxu1 %vm163_vm1, %v1447_v16 }
 0xa20   :  { %8978 = vmatpush3.bf16.msra.mxu0 %v10392_v42 }
 0xa21   :  { %8980 = vmatprep.subr.bf16.mxu0 %v10397_v50 }
 0xa24   :  { %8982 = vmatpush3.bf16.msra.mxu0 %v10397_v50 }
 0xa25   :  { %8984 = vmatprep.subr.bf16.mxu0 %v10408_v53 }
 0xa28   :  { %8986 = vmatpush3.bf16.msra.mxu0 %v10408_v53 }
 0xa29   :  { %8988 = vmatprep.subr.bf16.mxu0 %v10419_v24 }
 0xa2c   :  { %8990 = vmatpush3.bf16.msra.mxu0 %v10419_v24 }
 0xaa9   :  { %v1417_v55 = vpop.xlane.xlu1 %1416 }
 0xaaa   :  { %v1421_v17 = vmul.f32 0.015625, %v1417_v55  ;;  %v1414_v58 = vpop.xlane.xlu0 %1413 }
 0xaab   :  { %v1420_v8 = vmul.f32 0.015625, %v1414_v58 }
 0xaac   :  { %v1425_v59 = vadd.f32 1e-05, %v1421_v17 }
 0xaad   :  { %v1424_v60 = vadd.f32 1e-05, %v1420_v8 }
 0xaae   :  { %9598 = vrsqrt.f32 %v1425_v59 }
 0xaaf   :  { %9600 = vrsqrt.f32 %v1424_v60 }
 0xab8   :  { %v9599_v62 = vpop.eup %9598 }
 0xab9   :  { %v9601_v63 = vpop.eup %9600  ;;  %v1433_v0 = vmul.f32 %v9599_v62, %v1401_v27 }
 0xaba   :  { %v1432_v1 = vmul.f32 %v9601_v63, %v1400_v30 }
 0xabb   :  { %v1441_v34 = vmul.f32 %v7486_v21, %v1433_v0 }
 0xabc   :  { %v1440_v3 = vmul.f32 %v7486_v21, %v1432_v1 }
 0xabd   :  { %v1449_v6 = vadd.f32 %v7487_v39, %v1441_v34 }
 0xabe   :  { %v1448_v4 = vadd.f32 %v7487_v39, %v1440_v3 }
 0xac0   :  { %8323 = vmatprep.mubr.msk.f32.mxu0 %vm163_vm1, %v1448_v4  ;;  %8345 = vmatprep.mubr.msk.f32.mxu1 %vm163_vm1, %v1448_v4 }
 0xac1   :  { %8324 = vmatmul.mubr.msk.f32.gmra.mrb[14].mxu0 %vm163_vm1, %v1449_v6  ;;  %8346 = vmatmul.mubr.msk.f32.gmra.mrb[30].mxu1 %vm163_vm1, %v1449_v6 }
 0xac2   :  { %8364 = vmatprep.mubr.msk.f32.mxu0 %vm163_vm1, %v1446_v41 }
 0xac5   :  { %8365 = vmatmul.mubr.msk.f32.vlgmr.msra.gmra.mrb[16].mxu0 %vm163_vm1, %v1447_v16  ;;  %v7498_v16 = vld [vmem:[%s11755_s2 + $0x270] ss:$0 sm:$0xff] }
 0xac6   :  { %8367 = vmatprep.mubr.msk.f32.mxu0 %vm163_vm1, %v1448_v4 }
 0xac9   :  { %8368 = vmatmul.mubr.msk.f32.gmra.mrb[18].mxu0 %vm163_vm1, %v1449_v6 }
 0xaf2   :  { %v8322_v11 = vpop.f32.mrb[12].mxu0  ;;  %v8344_v12 = vpop.f32.mrb[28].mxu1 }
 0xaf3   :  { %v1645_v13 = vadd.f32 %v8344_v12, %v7493_v7  ;;  %v1541_v14 = vpop.f32.mrb[13].mxu0  ;;  %v1639_v15 = vpop.f32.mrb[29].mxu1  ;;  %v10455_v23 = vadd.f32 %v8322_v11, %v10437_v10 }
 0xaf4   :  { %v10440_v18 = vadd.f32 %v10437_v10, %v1541_v14  ;;  %v1640_v19 = vadd.f32 %v7493_v7, %v1639_v15 }
 0xaf6   :  { %1948 = vrot.lane.b32.xlu1 %v10440_v18, %s9823_s25  ;;  %8374 = vmatprep.mubr.msk.f32.mxu1 %vm31_vm0, %v10440_v18  ;;  %v8991_v21 = vpack.c.bf16 %v1645_v13, %v1640_v19  ;;  %v10452_v22 = vpack.i.bf16 %v1645_v13, %v1640_v19 }
 0xaf8   :  { %8993 = vmatprep.subr.msk.bf16.mxu1 %vm10444_vm4, %v8991_v21  ;;  %9423 = vrot.lane.b32.xlu0 %v10452_v22, %s9823_s25 }
 0xaf9   :  { %8996 = vmatpush3.bf16.xpose.msk.msra.mxu1 %vm10444_vm4, %v8991_v21 }
 0xafa   :  { %1950 = vrot.lane.b32.xlu1 %v10455_v23, %s9823_s25 }
 0xb00   :  { %8375 = vmatmul.mubr.msk.f32.vlgmr.msra.gmra.mrb[32].mxu1 %vm31_vm0, %v10455_v23 }
 0xb68   :  { %v1949_v26 = vpop.permute.xlu1 %1948 }
 0xb69   :  { %8388 = vmatprep.mubr.msk.f32.mxu1 %vm31_vm0, %v1949_v26 }
 0xb6a   :  { %v9424_v27 = vpop.permute.xlu0 %9423 }
 0xb6b   :  { %v9426_v30 = vunpack.i.h.bf16 %v9424_v27  ;;  %v9425_v31 = vunpack.i.l.bf16 %v9424_v27 }
 0xb6c   :  { %v1951_v37 = vpop.permute.xlu1 %1950 }
 0xb6d   :  { %v9001_v32 = vpack.c.bf16 %v9426_v30, %v9425_v31 }
 0xb6f   :  { %9003 = vmatprep.subr.msk.bf16.mxu1 %vm10444_vm4, %v9001_v32 }
 0xb70   :  { %9006 = vmatpush3.bf16.xpose.msk.msra.mxu1 %vm10444_vm4, %v9001_v32 }
 0xb77   :  { %8389 = vmatmul.mubr.msk.f32.vlgmr.msra.gmra.mrb[34].mxu1 %vm31_vm0, %v1951_v37 }
 0xb94   :  { %v10473_v39 = vpop.f32.mrb[14].mxu0  ;;  %v8347_v43 = vpop.f32.mrb[30].mxu1 }
 0xb95   :  { %v1655_v28 = vadd.f32 %v8347_v43, %v7493_v7  ;;  %v10475_v46 = vpop.f32.mrb[15].mxu0  ;;  %v1649_v49 = vpop.f32.mrb[31].mxu1 }
 0xb96   :  { %v1650_v41 = vadd.f32 %v7493_v7, %v1649_v49 }
 0xb98   :  { %v8366_v40 = vpop.f32.mrb[16].mxu0  ;;  %v10480_v29 = vpack.i.bf16 %v1655_v28, %v1650_v41  ;;  %v10482_v38 = vpack.c.bf16 %v1655_v28, %v1650_v41 }
 0xb99   :  { %v1743_v47 = vadd.f32 %v8366_v40, %v7498_v16  ;;  %v1737_v51 = vpop.f32.mrb[17].mxu0 }
 0xb9a   :  { %v1738_v44 = vadd.f32 %v7498_v16, %v1737_v51 }
 0xb9c   :  { %v8369_v54 = vpop.f32.mrb[18].mxu0  ;;  %v8997_v56 = vpack.c.bf16 %v1743_v47, %v1738_v44  ;;  %v10484_v55 = vpack.i.bf16 %v1743_v47, %v1738_v44 }
 0xb9d   :  { %v1753_v17 = vadd.f32 %v8369_v54, %v7498_v16  ;;  %v1747_v58 = vpop.f32.mrb[19].mxu0 }
 0xb9e   :  { %v1748_v8 = vadd.f32 %v7498_v16, %v1747_v58  ;;  %8998 = vmatprep.subr.bf16.mxu0 %v8997_v56 }
 0xb9f   :  { %9000 = vmatpush3.bf16.msra.mxu0 %v8997_v56 }
 0xba0   :  { %v10486_v59 = vpack.c.bf16 %v1753_v17, %v1748_v8  ;;  %v10488_v60 = vpack.i.bf16 %v1753_v17, %v1748_v8 }
 0xbd3   :  { %v8376_v62 = vpop.f32.mrb[32].mxu1 }
 0xbd4   :  { %v1844_v63 = vmul.f32 0.25, %v8376_v62  ;;  %v1834_v0 = vpop.f32.mrb[33].mxu1 }
 0xbd5   :  { %v1843_v1 = vmul.f32 0.25, %v1834_v0 }
 0xbd6   :  { %v1848_v34 = vsel %vm31_vm0, %v1844_v63, -inf }
 0xbd7   :  { %1849 = vmax.xlane.f32.xlu0 %v1848_v34  ;;  %v1845_v3 = vsel %vm31_vm0, %v1843_v1, -inf }
 0xbd8   :  { %1846 = vmax.xlane.f32.xlu1 %v1845_v3 }
 0xbe9   :  { %9428 = vrot.lane.b32.xlu1 %v10484_v55, %s9823_s25 }
 0xc4a   :  { %v8390_v4 = vpop.f32.mrb[34].mxu1 }
 0xc4b   :  { %v2030_v6 = vpop.f32.mrb[35].mxu1  ;;  %v2040_v11 = vmul.f32 0.25, %v8390_v4 }
 0xc4c   :  { %v2039_v7 = vmul.f32 0.25, %v2030_v6 }
 0xc4d   :  { %v2044_v13 = vsel %vm31_vm0, %v2040_v11, -inf }
 0xc4e   :  { %v2041_v12 = vsel %vm31_vm0, %v2039_v7, -inf }
 0xc4f   :  { %2042 = vmax.xlane.f32.xlu0 %v2041_v12 }
 0xc53   :  { %2045 = vmax.xlane.f32.xlu0 %v2044_v13 }
 0xc64   :  { %v1850_v14 = vpop.xlane.xlu0 %1849 }
 0xc65   :  { %v1852_v15 = vsub.f32 %v1844_v63, %v1850_v14  ;;  %v1847_v19 = vpop.xlane.xlu1 %1846 }
 0xc66   :  { %v1851_v21 = vsub.f32 %v1843_v1, %v1847_v19 }
 0xc67   :  { %v1855_v26 = vmul.f32 1.442695, %v1852_v15 }
 0xc68   :  { %v1853_v27 = vmul.f32 1.442695, %v1851_v21 }
 0xc69   :  { %9602 = vpow2.f32 %v1855_v26  ;;  %v9429_v30 = vpop.permute.xlu1 %9428 }
 0xc6a   :  { %9604 = vpow2.f32 %v1853_v27  ;;  %v9431_v31 = vunpack.i.h.bf16 %v9429_v30  ;;  %v9430_v32 = vunpack.i.l.bf16 %v9429_v30 }
 0xc6c   :  { %v9007_v37 = vpack.c.bf16 %v9431_v31, %v9430_v32 }
 0xc6e   :  { %9008 = vmatprep.subr.bf16.mxu0 %v9007_v37 }
 0xc73   :  { %v9603_v43 = vpop.eup %9602 }
 0xc74   :  { %v9605_v28 = vpop.eup %9604  ;;  %v1860_v49 = vsel %vm31_vm0, %v9603_v43, 0.0 }
 0xc75   :  { %1861 = vadd.xlane.f32.xlu0 %v1860_v49  ;;  %v1857_v41 = vsel %vm31_vm0, %v9605_v28, 0.0 }
 0xc76   :  { %1858 = vadd.xlane.f32.xlu1 %v1857_v41 }
 0xc87   :  { %2152 = vrot.lane.b32.xlu1 %v10440_v18, %s9824_s28 }
 0xcdc   :  { %v2043_v16 = vpop.xlane.xlu0 %2042 }
 0xcdd   :  { %v2047_v40 = vsub.f32 %v2039_v7, %v2043_v16 }
 0xcdf   :  { %v2049_v47 = vmul.f32 1.442695, %v2047_v40 }
 0xce0   :  { %v2046_v51 = vpop.xlane.xlu0 %2045 }
 0xce1   :  { %9606 = vpow2.f32 %v2049_v47  ;;  %v2048_v44 = vsub.f32 %v2040_v11, %v2046_v51 }
 0xce3   :  { %v2051_v54 = vmul.f32 1.442695, %v2048_v44 }
 0xce5   :  { %9608 = vpow2.f32 %v2051_v54 }
 0xceb   :  { %v9607_v56 = vpop.eup %9606 }
 0xcec   :  { %v2053_v17 = vsel %vm31_vm0, %v9607_v56, 0.0 }
 0xced   :  { %2054 = vadd.xlane.f32.xlu1 %v2053_v17 }
 0xcef   :  { %v9609_v58 = vpop.eup %9608 }
 0xcf0   :  { %v2056_v8 = vsel %vm31_vm0, %v9609_v58, 0.0 }
 0xcf1   :  { %2057 = vadd.xlane.f32.xlu0 %v2056_v8 }
 0xcfe   :  { %2154 = vrot.lane.b32.xlu1 %v10455_v23, %s9824_s28 }
 0xd02   :  { %v1862_v62 = vpop.xlane.xlu0 %1861 }
 0xd03   :  { %9610 = vrcp.f32 %v1862_v62  ;;  %v1859_v63 = vpop.xlane.xlu1 %1858 }
 0xd04   :  { %9612 = vrcp.f32 %v1859_v63 }
 0xd07   :  { %9433 = vrot.lane.b32.xlu0 %v10452_v22, %s9824_s28  ;;  %v2153_v4 = vpop.permute.xlu1 %2152 }
 0xd0d   :  { %v9611_v0 = vpop.eup %9610 }
 0xd0e   :  { %v9613_v1 = vpop.eup %9612  ;;  %v1866_v3 = vmul.f32 %v9611_v0, %v9603_v43 }
 0xd0f   :  { %v1865_v34 = vmul.f32 %v9613_v1, %v9605_v28 }
 0xd11   :  { %8381 = vmatprep.mubr.msk.f32.mxu0 %vm31_vm0, %v1865_v34 }
 0xd12   :  { %8382 = vmatmul.mubr.msk.f32.vlgmr.msra.gmra.mrb[20].mxu0 %vm31_vm0, %v1866_v3 }
 0xd13   :  { %9010 = vmatpush3.bf16.msra.mxu0 %v9007_v37 }
 0xd7a   :  { %v2055_v6 = vpop.xlane.xlu1 %2054 }
 0xd7b   :  { %9614 = vrcp.f32 %v2055_v6 }
 0xd7e   :  { %v2058_v7 = vpop.xlane.xlu0 %2057  ;;  %v2155_v27 = vpop.permute.xlu1 %2154 }
 0xd7f   :  { %9616 = vrcp.f32 %v2058_v7 }
 0xd82   :  { %v9434_v11 = vpop.permute.xlu0 %9433 }
 0xd83   :  { %v9436_v12 = vunpack.i.h.bf16 %v9434_v11  ;;  %v9435_v13 = vunpack.i.l.bf16 %v9434_v11 }
 0xd85   :  { %v9615_v14 = vpop.eup %9614  ;;  %v9011_v15 = vpack.c.bf16 %v9436_v12, %v9435_v13 }
 0xd86   :  { %v2061_v19 = vmul.f32 %v9615_v14, %v9607_v56 }
 0xd87   :  { %9013 = vmatprep.subr.msk.bf16.mxu0 %vm10444_vm4, %v9011_v15 }
 0xd88   :  { %8395 = vmatprep.mubr.msk.f32.mxu0 %vm31_vm0, %v2061_v19 }
 0xd89   :  { %v9617_v21 = vpop.eup %9616 }
 0xd8a   :  { %v2062_v26 = vmul.f32 %v9617_v21, %v9609_v58 }
 0xd8c   :  { %8396 = vmatmul.mubr.msk.f32.vlgmr.msra.gmra.mrb[22].mxu0 %vm31_vm0, %v2062_v26 }
 0xd8d   :  { %9016 = vmatpush3.bf16.xpose.msk.msra.mxu0 %vm10444_vm4, %v9011_v15  ;;  %8402 = vmatprep.mubr.msk.f32.mxu0 %vm31_vm0, %v2153_v4 }
 0xd94   :  { %8403 = vmatmul.mubr.msk.f32.vlgmr.msra.gmra.mrb[24].mxu0 %vm31_vm0, %v2155_v27 }
 0xde5   :  { %v10516_v30 = vpop.f32.mrb[20].mxu0 }
 0xde6   :  { %v10518_v31 = vpop.f32.mrb[21].mxu0 }
 0xe5f   :  { %v10520_v32 = vpop.f32.mrb[22].mxu0 }
 0xe60   :  { %v10522_v37 = vpop.f32.mrb[23].mxu0 }
 0xe67   :  { %v8404_v43 = vpop.f32.mrb[24].mxu0 }
 0xe68   :  { %v2244_v28 = vmul.f32 0.25, %v8404_v43  ;;  %v2234_v49 = vpop.f32.mrb[25].mxu0 }
 0xe69   :  { %v2243_v41 = vmul.f32 0.25, %v2234_v49 }
 0xe6a   :  { %v2248_v16 = vsel %vm31_vm0, %v2244_v28, -inf }
 0xe6b   :  { %2249 = vmax.xlane.f32.xlu0 %v2248_v16  ;;  %v2245_v40 = vsel %vm31_vm0, %v2243_v41, -inf }
 0xe6c   :  { %2246 = vmax.xlane.f32.xlu1 %v2245_v40 }
 0xe7d   :  { %9438 = vrot.lane.b32.xlu1 %v10484_v55, %s9824_s28 }
 0xe81   :  { %2354 = vrot.lane.b32.xlu1 %v10440_v18, %s9825_s29 }
 0xe85   :  { %2356 = vrot.lane.b32.xlu1 %v10455_v23, %s9825_s29 }
 0xef8   :  { %v2250_v47 = vpop.xlane.xlu0 %2249 }
 0xef9   :  { %v2252_v51 = vsub.f32 %v2244_v28, %v2250_v47  ;;  %v2247_v44 = vpop.xlane.xlu1 %2246 }
 0xefa   :  { %v2251_v54 = vsub.f32 %v2243_v41, %v2247_v44 }
 0xefb   :  { %v2255_v56 = vmul.f32 1.442695, %v2252_v51 }
 0xefc   :  { %v2253_v17 = vmul.f32 1.442695, %v2251_v54 }
 0xefd   :  { %9618 = vpow2.f32 %v2255_v56  ;;  %v9439_v58 = vpop.permute.xlu1 %9438 }
 0xefe   :  { %v9441_v8 = vunpack.i.h.bf16 %v9439_v58  ;;  %v9440_v62 = vunpack.i.l.bf16 %v9439_v58  ;;  %9620 = vpow2.f32 %v2253_v17 }
 0xf00   :  { %v9017_v63 = vpack.c.bf16 %v9441_v8, %v9440_v62 }
 0xf01   :  { %v2355_v19 = vpop.permute.xlu1 %2354 }
 0xf02   :  { %9018 = vmatprep.subr.bf16.mxu1 %v9017_v63 }
 0xf03   :  { %9020 = vmatpush3.bf16.msra.mxu1 %v9017_v63 }
 0xf07   :  { %v9619_v0 = vpop.eup %9618 }
 0xf08   :  { %v2260_v18 = vsel %vm31_vm0, %v9619_v0, 0.0  ;;  %v9621_v1 = vpop.eup %9620 }
 0xf09   :  { %2261 = vadd.xlane.f32.xlu0 %v2260_v18  ;;  %v2257_v23 = vsel %vm31_vm0, %v9621_v1, 0.0 }
 0xf0d   :  { %2258 = vadd.xlane.f32.xlu0 %v2257_v23 }
 0xf23   :  { %9443 = vrot.lane.b32.xlu0 %v10452_v22, %s9825_s29  ;;  %v2357_v22 = vpop.permute.xlu1 %2356 }
 0xf96   :  { %v2262_v34 = vpop.xlane.xlu0 %2261 }
 0xf97   :  { %9622 = vrcp.f32 %v2262_v34 }
 0xf9a   :  { %v2259_v3 = vpop.xlane.xlu0 %2258 }
 0xf9b   :  { %9624 = vrcp.f32 %v2259_v3 }
 0xf9e   :  { %v9444_v4 = vpop.permute.xlu0 %9443 }
 0xf9f   :  { %v9446_v6 = vunpack.i.h.bf16 %v9444_v4  ;;  %v9445_v7 = vunpack.i.l.bf16 %v9444_v4 }
 0xfa1   :  { %v9021_v11 = vpack.c.bf16 %v9446_v6, %v9445_v7  ;;  %v9623_v12 = vpop.eup %9622 }
 0xfa2   :  { %v2266_v15 = vmul.f32 %v9623_v12, %v9619_v0 }
 0xfa3   :  { %9023 = vmatprep.subr.msk.bf16.mxu1 %vm10444_vm4, %v9021_v11 }
 0xfa5   :  { %v9625_v13 = vpop.eup %9624 }
 0xfa6   :  { %v2265_v14 = vmul.f32 %v9625_v13, %v9621_v1  ;;  %v10572_v13 = vadd.f32 %v10437_v10, %v10475_v46 }
 0xfa8   :  { %8409 = vmatprep.mubr.msk.f32.mxu1 %vm31_vm0, %v2265_v14 }
 0xfa9   :  { %8410 = vmatmul.mubr.msk.f32.vlgmr.msra.gmra.mrb[36].mxu1 %vm31_vm0, %v2266_v15 }
 0xfaa   :  { %9026 = vmatpush3.bf16.xpose.msk.msra.mxu1 %vm10444_vm4, %v9021_v11  ;;  %8416 = vmatprep.mubr.msk.f32.mxu1 %vm31_vm0, %v2355_v19 }
 0xfab   :  { %9038 = vmatprep.subr.bf16.mxu1 %v10486_v59 }
 0xfb1   :  { %8417 = vmatmul.mubr.msk.f32.vlgmr.msra.gmra.mrb[38].mxu1 %vm31_vm0, %v2357_v22 }
 0xfb2   :  { %9040 = vmatpush3.bf16.msra.mxu1 %v10486_v59  ;;  %v10558_v59 = vadd.f32 %v10473_v39, %v10437_v10 }
0x107c   :  { %v10546_v21 = vpop.f32.mrb[36].mxu1 }
0x107d   :  { %v10548_v26 = vpop.f32.mrb[37].mxu1 }
0x1084   :  { %v8418_v27 = vpop.f32.mrb[38].mxu1 }
0x1085   :  { %v2446_v43 = vmul.f32 0.25, %v8418_v27  ;;  %v2436_v28 = vpop.f32.mrb[39].mxu1 }
0x1086   :  { %v2445_v49 = vmul.f32 0.25, %v2436_v28 }
0x1087   :  { %v2450_v41 = vsel %vm31_vm0, %v2446_v43, -inf }
0x1088   :  { %2451 = vmax.xlane.f32.xlu0 %v2450_v41  ;;  %v2447_v16 = vsel %vm31_vm0, %v2445_v49, -inf }
0x1089   :  { %2448 = vmax.xlane.f32.xlu1 %v2447_v16 }
0x109a   :  { %9448 = vrot.lane.b32.xlu1 %v10484_v55, %s9825_s29 }
0x109e   :  { %9453 = vrot.lane.b32.xlu1 %v10480_v29, %s9823_s25 }
0x10a2   :  { %2781 = vrot.lane.b32.xlu1 %v10558_v59, %s9823_s25 }
0x1115   :  { %v2452_v40 = vpop.xlane.xlu0 %2451 }
0x1116   :  { %v2454_v47 = vsub.f32 %v2446_v43, %v2452_v40  ;;  %v2449_v51 = vpop.xlane.xlu1 %2448 }
0x1117   :  { %v2453_v44 = vsub.f32 %v2445_v49, %v2449_v51 }
0x1118   :  { %v2457_v54 = vmul.f32 1.442695, %v2454_v47 }
0x1119   :  { %v2455_v56 = vmul.f32 1.442695, %v2453_v44 }
0x111a   :  { %v9449_v17 = vpop.permute.xlu1 %9448 }
0x111b   :  { %9626 = vpow2.f32 %v2455_v56  ;;  %v9451_v58 = vunpack.i.h.bf16 %v9449_v17  ;;  %v9450_v55 = vunpack.i.l.bf16 %v9449_v17 }
0x111c   :  { %9628 = vpow2.f32 %v2457_v54 }
0x111d   :  { %v9027_v8 = vpack.c.bf16 %v9451_v58, %v9450_v55 }
0x111e   :  { %v9454_v62 = vpop.permute.xlu1 %9453 }
0x111f   :  { %v9456_v63 = vunpack.i.h.bf16 %v9454_v62  ;;  %v9455_v0 = vunpack.i.l.bf16 %v9454_v62  ;;  %9028 = vmatprep.subr.bf16.mxu0 %v9027_v8 }
0x1120   :  { %9030 = vmatpush3.bf16.msra.mxu0 %v9027_v8 }
0x1121   :  { %v9041_v39 = vpack.c.bf16 %v9456_v63, %v9455_v0  ;;  %9033 = vmatprep.subr.msk.bf16.mxu0 %vm10444_vm4, %v10482_v38 }
0x1122   :  { %v2782_v0 = vpop.permute.xlu1 %2781 }
0x1123   :  { %9043 = vmatprep.subr.msk.bf16.mxu1 %vm10444_vm4, %v9041_v39 }
0x1125   :  { %v9627_v18 = vpop.eup %9626 }
0x1126   :  { %v2459_v1 = vsel %vm31_vm0, %v9627_v18, 0.0  ;;  %v9629_v23 = vpop.eup %9628 }
0x1127   :  { %2460 = vadd.xlane.f32.xlu0 %v2459_v1  ;;  %v2462_v34 = vsel %vm31_vm0, %v9629_v23, 0.0 }
0x112b   :  { %2463 = vadd.xlane.f32.xlu0 %v2462_v34 }
0x11b4   :  { %v2461_v3 = vpop.xlane.xlu0 %2460 }
0x11b5   :  { %9630 = vrcp.f32 %v2461_v3 }
0x11b8   :  { %v2464_v4 = vpop.xlane.xlu0 %2463 }
0x11b9   :  { %9632 = vrcp.f32 %v2464_v4 }
0x11bf   :  { %v9631_v6 = vpop.eup %9630 }
0x11c0   :  { %v2467_v7 = vmul.f32 %v9631_v6, %v9627_v18 }
0x11c2   :  { %8423 = vmatprep.mubr.msk.f32.mxu0 %vm31_vm0, %v2467_v7 }
0x11c3   :  { %v9633_v11 = vpop.eup %9632 }
0x11c4   :  { %v2468_v12 = vmul.f32 %v9633_v11, %v9629_v23 }
0x11c6   :  { %8424 = vmatmul.mubr.msk.f32.vlgmr.msra.gmra.mrb[26].mxu0 %vm31_vm0, %v2468_v12 }
0x11c7   :  { %9036 = vmatpush3.bf16.xpose.msk.msra.mxu0 %vm10444_vm4, %v10482_v38  ;;  %8430 = vmatprep.mubr.msk.f32.mxu0 %vm31_vm0, %v10572_v13 }
0x11ce   :  { %8431 = vmatmul.mubr.msk.f32.vlgmr.msra.gmra.mrb[28].mxu0 %vm31_vm0, %v10558_v59 }
0x1299   :  { %v10582_v14 = vpop.f32.mrb[26].mxu0 }
0x129a   :  { %v10584_v15 = vpop.f32.mrb[27].mxu0 }
0x12a1   :  { %v8432_v19 = vpop.f32.mrb[28].mxu0 }
0x12a2   :  { %v2665_v22 = vpop.f32.mrb[29].mxu0  ;;  %v2675_v46 = vmul.f32 0.25, %v8432_v19 }
0x12a3   :  { %v2674_v10 = vmul.f32 0.25, %v2665_v22 }
0x12a4   :  { %v2679_v43 = vsel %vm31_vm0, %v2675_v46, -inf }
0x12a5   :  { %v2676_v27 = vsel %vm31_vm0, %v2674_v10, -inf }
0x12a6   :  { %2677 = vmax.xlane.f32.xlu0 %v2676_v27 }
0x12aa   :  { %2680 = vmax.xlane.f32.xlu0 %v2679_v43 }
0x1333   :  { %v2678_v38 = vpop.xlane.xlu0 %2677 }
0x1334   :  { %v2682_v28 = vsub.f32 %v2674_v10, %v2678_v38 }
0x1336   :  { %v2684_v49 = vmul.f32 1.442695, %v2682_v28 }
0x1337   :  { %v2681_v41 = vpop.xlane.xlu0 %2680 }
0x1338   :  { %9634 = vpow2.f32 %v2684_v49  ;;  %v2683_v16 = vsub.f32 %v2675_v46, %v2681_v41 }
0x133a   :  { %v2686_v40 = vmul.f32 1.442695, %v2683_v16 }
0x133c   :  { %9636 = vpow2.f32 %v2686_v40 }
0x1342   :  { %v9635_v47 = vpop.eup %9634 }
0x1343   :  { %v2688_v51 = vsel %vm31_vm0, %v9635_v47, 0.0 }
0x1344   :  { %2689 = vadd.xlane.f32.xlu0 %v2688_v51 }
0x1346   :  { %v9637_v44 = vpop.eup %9636 }
0x1347   :  { %v2691_v54 = vsel %vm31_vm0, %v9637_v44, 0.0 }
0x1348   :  { %2692 = vadd.xlane.f32.xlu0 %v2691_v54 }
0x135e   :  { %2779 = vrot.lane.b32.xlu0 %v10572_v13, %s9823_s25 }
0x13d1   :  { %v2690_v56 = vpop.xlane.xlu0 %2689 }
0x13d2   :  { %9638 = vrcp.f32 %v2690_v56 }
0x13d5   :  { %v2693_v17 = vpop.xlane.xlu0 %2692 }
0x13d6   :  { %9640 = vrcp.f32 %v2693_v17 }
0x13d9   :  { %v2780_v63 = vpop.permute.xlu0 %2779 }
0x13dc   :  { %v9639_v58 = vpop.eup %9638 }
0x13dd   :  { %v2696_v55 = vmul.f32 %v9639_v58, %v9635_v47 }
0x13df   :  { %8437 = vmatprep.mubr.msk.f32.mxu1 %vm31_vm0, %v2696_v55 }
0x13e0   :  { %v9641_v8 = vpop.eup %9640 }
0x13e1   :  { %v2697_v62 = vmul.f32 %v9641_v8, %v9637_v44 }
0x13e3   :  { %8438 = vmatmul.mubr.msk.f32.vlgmr.msra.gmra.mrb[40].mxu1 %vm31_vm0, %v2697_v62 }
0x13e4   :  { %9046 = vmatpush3.bf16.xpose.msk.msra.mxu1 %vm10444_vm4, %v9041_v39  ;;  %8444 = vmatprep.mubr.msk.f32.mxu1 %vm31_vm0, %v2780_v63 }
0x13eb   :  { %8445 = vmatmul.mubr.msk.f32.vlgmr.msra.gmra.mrb[42].mxu1 %vm31_vm0, %v2782_v0 }
0x14b6   :  { %v10598_v18 = vpop.f32.mrb[40].mxu1 }
0x14b7   :  { %v10600_v1 = vpop.f32.mrb[41].mxu1 }
0x14be   :  { %v8446_v23 = vpop.f32.mrb[42].mxu1 }
0x14bf   :  { %v2871_v34 = vmul.f32 0.25, %v8446_v23  ;;  %v2861_v3 = vpop.f32.mrb[43].mxu1 }
0x14c0   :  { %v2870_v4 = vmul.f32 0.25, %v2861_v3 }
0x14c1   :  { %v2875_v6 = vsel %vm31_vm0, %v2871_v34, -inf }
0x14c2   :  { %2876 = vmax.xlane.f32.xlu0 %v2875_v6  ;;  %v2872_v7 = vsel %vm31_vm0, %v2870_v4, -inf }
0x14c3   :  { %2873 = vmax.xlane.f32.xlu1 %v2872_v7 }
0x14d4   :  { %9458 = vrot.lane.b32.xlu1 %v10488_v60, %s9823_s25 }
0x14d8   :  { %9463 = vrot.lane.b32.xlu0 %v10480_v29, %s9824_s28  ;;  %2983 = vrot.lane.b32.xlu1 %v10572_v13, %s9824_s28 }
0x154f   :  { %v2877_v39 = vpop.xlane.xlu0 %2876 }
0x1550   :  { %v2879_v11 = vsub.f32 %v2871_v34, %v2877_v39  ;;  %v2874_v12 = vpop.xlane.xlu1 %2873 }
0x1551   :  { %v2878_v19 = vsub.f32 %v2870_v4, %v2874_v12 }
0x1552   :  { %v2882_v22 = vmul.f32 1.442695, %v2879_v11 }
0x1553   :  { %v2880_v10 = vmul.f32 1.442695, %v2878_v19  ;;  %v9464_v46 = vpop.permute.xlu0 %9463 }
0x1554   :  { %9642 = vpow2.f32 %v2882_v22  ;;  %v9459_v27 = vpop.permute.xlu1 %9458  ;;  %v9466_v43 = vunpack.i.h.bf16 %v9464_v46  ;;  %v9465_v38 = vunpack.i.l.bf16 %v9464_v46 }
0x1555   :  { %v9461_v28 = vunpack.i.h.bf16 %v9459_v27  ;;  %v9460_v49 = vunpack.i.l.bf16 %v9459_v27  ;;  %9644 = vpow2.f32 %v2880_v10 }
0x1556   :  { %v9051_v16 = vpack.c.bf16 %v9466_v43, %v9465_v38 }
0x1557   :  { %v9047_v41 = vpack.c.bf16 %v9461_v28, %v9460_v49 }
0x1558   :  { %v2984_v54 = vpop.permute.xlu1 %2983 }
0x1559   :  { %9048 = vmatprep.subr.bf16.mxu0 %v9047_v41 }
0x155a   :  { %9050 = vmatpush3.bf16.msra.mxu0 %v9047_v41 }
0x155b   :  { %9053 = vmatprep.subr.msk.bf16.mxu0 %vm10444_vm4, %v9051_v16 }
0x155e   :  { %v9643_v40 = vpop.eup %9642 }
0x155f   :  { %v2887_v47 = vsel %vm31_vm0, %v9643_v40, 0.0  ;;  %v9645_v51 = vpop.eup %9644 }
0x1560   :  { %2888 = vadd.xlane.f32.xlu1 %v2887_v47  ;;  %v2884_v44 = vsel %vm31_vm0, %v9645_v51, 0.0 }
0x1564   :  { %2885 = vadd.xlane.f32.xlu1 %v2884_v44 }
0x1575   :  { %2985 = vrot.lane.b32.xlu1 %v10558_v59, %s9824_s28 }
0x15ed   :  { %v2889_v56 = vpop.xlane.xlu1 %2888 }
0x15ee   :  { %9646 = vrcp.f32 %v2889_v56 }
0x15f1   :  { %v2886_v17 = vpop.xlane.xlu1 %2885 }
0x15f2   :  { %9648 = vrcp.f32 %v2886_v17 }
0x15f5   :  { %v2986_v63 = vpop.permute.xlu1 %2985 }
0x15f8   :  { %v9647_v58 = vpop.eup %9646 }
0x15f9   :  { %v2893_v62 = vmul.f32 %v9647_v58, %v9643_v40 }
0x15fc   :  { %v9649_v55 = vpop.eup %9648 }
0x15fd   :  { %v2892_v8 = vmul.f32 %v9649_v55, %v9645_v51 }
0x15ff   :  { %8451 = vmatprep.mubr.msk.f32.mxu0 %vm31_vm0, %v2892_v8 }
0x1600   :  { %8452 = vmatmul.mubr.msk.f32.vlgmr.msra.gmra.mrb[30].mxu0 %vm31_vm0, %v2893_v62 }
0x1601   :  { %9056 = vmatpush3.bf16.xpose.msk.msra.mxu0 %vm10444_vm4, %v9051_v16  ;;  %8458 = vmatprep.mubr.msk.f32.mxu0 %vm31_vm0, %v2984_v54 }
0x1608   :  { %8459 = vmatmul.mubr.msk.f32.vlgmr.msra.gmra.mrb[32].mxu0 %vm31_vm0, %v2986_v63 }
0x16d3   :  { %v10622_v0 = vpop.f32.mrb[30].mxu0 }
0x16d4   :  { %v10624_v23 = vpop.f32.mrb[31].mxu0 }
0x16db   :  { %v8460_v34 = vpop.f32.mrb[32].mxu0 }
0x16dc   :  { %v3075_v3 = vmul.f32 0.25, %v8460_v34  ;;  %v3065_v4 = vpop.f32.mrb[33].mxu0 }
0x16dd   :  { %v3074_v6 = vmul.f32 0.25, %v3065_v4 }
0x16de   :  { %v3079_v7 = vsel %vm31_vm0, %v3075_v3, -inf }
0x16df   :  { %3080 = vmax.xlane.f32.xlu0 %v3079_v7  ;;  %v3076_v39 = vsel %vm31_vm0, %v3074_v6, -inf }
0x16e0   :  { %3077 = vmax.xlane.f32.xlu1 %v3076_v39 }
0x16f1   :  { %9468 = vrot.lane.b32.xlu1 %v10488_v60, %s9824_s28 }
0x16f5   :  { %3185 = vrot.lane.b32.xlu1 %v10572_v13, %s9825_s29 }
0x16f9   :  { %3187 = vrot.lane.b32.xlu1 %v10558_v59, %s9825_s29 }
0x176c   :  { %v3081_v11 = vpop.xlane.xlu0 %3080 }
0x176d   :  { %v3083_v12 = vsub.f32 %v3075_v3, %v3081_v11  ;;  %v3078_v19 = vpop.xlane.xlu1 %3077 }
0x176e   :  { %v3082_v22 = vsub.f32 %v3074_v6, %v3078_v19 }
0x176f   :  { %v3086_v10 = vmul.f32 1.442695, %v3083_v12 }
0x1770   :  { %v3084_v46 = vmul.f32 1.442695, %v3082_v22 }
0x1771   :  { %9650 = vpow2.f32 %v3086_v10  ;;  %v9469_v27 = vpop.permute.xlu1 %9468 }
0x1772   :  { %v9471_v43 = vunpack.i.h.bf16 %v9469_v27  ;;  %v9470_v38 = vunpack.i.l.bf16 %v9469_v27  ;;  %9652 = vpow2.f32 %v3084_v46 }
0x1774   :  { %v9057_v28 = vpack.c.bf16 %v9471_v43, %v9470_v38  ;;  %v3417_v38 = vld [vmem:[%s11755_s2 + $0x278] sm:$0xff] }
0x1775   :  { %v3186_v8 = vpop.permute.xlu1 %3185 }
0x1776   :  { %9058 = vmatprep.subr.bf16.mxu1 %v9057_v28 }
0x1777   :  { %9060 = vmatpush3.bf16.msra.mxu1 %v9057_v28  ;;  %v3418_v28 = vld [vmem:[%s11755_s2 + $0x280] sm:$0xff] }
0x177b   :  { %v9651_v49 = vpop.eup %9650 }
0x177c   :  { %v3091_v13 = vsel %vm31_vm0, %v9651_v49, 0.0  ;;  %v9653_v41 = vpop.eup %9652 }
0x177d   :  { %3092 = vadd.xlane.f32.xlu0 %v3091_v13  ;;  %v3088_v59 = vsel %vm31_vm0, %v9653_v41, 0.0 }
0x1781   :  { %3089 = vadd.xlane.f32.xlu0 %v3088_v59 }
0x1797   :  { %9473 = vrot.lane.b32.xlu0 %v10480_v29, %s9825_s29  ;;  %v3188_v29 = vpop.permute.xlu1 %3187 }
0x180a   :  { %v3093_v16 = vpop.xlane.xlu0 %3092 }
0x180b   :  { %9654 = vrcp.f32 %v3093_v16 }
0x180e   :  { %v3090_v40 = vpop.xlane.xlu0 %3089 }
0x180f   :  { %9656 = vrcp.f32 %v3090_v40 }
0x1812   :  { %v9474_v47 = vpop.permute.xlu0 %9473 }
0x1813   :  { %v9476_v51 = vunpack.i.h.bf16 %v9474_v47  ;;  %v9475_v44 = vunpack.i.l.bf16 %v9474_v47  ;;  %v3419_v47 = vld [vmem:[%s11755_s2 + $0x288] sm:$0xff] }
0x1815   :  { %v9061_v54 = vpack.c.bf16 %v9476_v51, %v9475_v44  ;;  %v9655_v56 = vpop.eup %9654 }
0x1816   :  { %v3097_v55 = vmul.f32 %v9655_v56, %v9651_v49  ;;  %v10671_v49 = vpack.c.bf16 %v3418_v28, %v3417_v38 }
0x1817   :  { %9063 = vmatprep.subr.msk.bf16.mxu1 %vm10444_vm4, %v9061_v54 }
0x1819   :  { %v9657_v17 = vpop.eup %9656 }
0x181a   :  { %v3096_v58 = vmul.f32 %v9657_v17, %v9653_v41 }
0x181c   :  { %8465 = vmatprep.mubr.msk.f32.mxu1 %vm31_vm0, %v3096_v58 }
0x181d   :  { %8466 = vmatmul.mubr.msk.f32.vlgmr.msra.gmra.mrb[44].mxu1 %vm31_vm0, %v3097_v55  ;;  %v3421_v55 = vld [vmem:[%s11755_s2 + $0x298] sm:$0xff] }
0x181e   :  { %9066 = vmatpush3.bf16.xpose.msk.msra.mxu1 %vm10444_vm4, %v9061_v54  ;;  %8472 = vmatprep.mubr.msk.f32.mxu1 %vm31_vm0, %v3186_v8  ;;  %v3422_v8 = vld [vmem:[%s11755_s2 + $0x2a0] sm:$0xff] }
0x1825   :  { %8473 = vmatmul.mubr.msk.f32.vlgmr.msra.gmra.mrb[46].mxu1 %vm31_vm0, %v3188_v29  ;;  %v10702_v29 = vpack.c.bf16 %v3422_v8, %v3421_v55 }
0x18f0   :  { %v8467_v62 = vpop.f32.mrb[44].mxu1 }
0x18f1   :  { %v3176_v63 = vpop.f32.mrb[45].mxu1 }
0x18f8   :  { %v8474_v34 = vpop.f32.mrb[46].mxu1 }
0x18f9   :  { %v3277_v3 = vmul.f32 0.25, %v8474_v34  ;;  %v3267_v4 = vpop.f32.mrb[47].mxu1 }
0x18fa   :  { %v3276_v6 = vmul.f32 0.25, %v3267_v4 }
0x18fb   :  { %v3281_v7 = vsel %vm31_vm0, %v3277_v3, -inf }
0x18fc   :  { %3282 = vmax.xlane.f32.xlu0 %v3281_v7  ;;  %v3278_v39 = vsel %vm31_vm0, %v3276_v6, -inf }
0x18fd   :  { %3279 = vmax.xlane.f32.xlu1 %v3278_v39 }
0x190e   :  { %9478 = vrot.lane.b32.xlu1 %v10488_v60, %s9825_s29 }
0x1912   :  { %2560 = vrot.lane.b32.xlu1 %v10520_v32, %s9826_s30 }
0x1916   :  { %2566 = vrot.lane.b32.xlu1 %v10548_v26, %s9827_s5 }
0x191a   :  { %2568 = vrot.lane.b32.xlu1 %v10546_v21, %s9827_s5 }
0x191e   :  { %2576 = vrot.lane.b32.xlu1 %v10582_v14, %s9828_s6 }
0x1922   :  { %3391 = vrot.lane.b32.xlu1 %v10622_v0, %s9826_s30 }
0x1926   :  { %3399 = vrot.lane.b32.xlu1 %v8467_v62, %s9827_s5  ;;  %v3423_v62 = vld [vmem:[%s11755_s2 + $0x2a8] sm:$0xff] }
0x1989   :  { %v3283_v60 = vpop.xlane.xlu0 %3282 }
0x198a   :  { %v3285_v11 = vsub.f32 %v3277_v3, %v3283_v60  ;;  %v3280_v12 = vpop.xlane.xlu1 %3279 }
0x198b   :  { %v3284_v32 = vsub.f32 %v3276_v6, %v3280_v12 }
0x198c   :  { %v3288_v19 = vmul.f32 1.442695, %v3285_v11 }
0x198d   :  { %v3286_v22 = vmul.f32 1.442695, %v3284_v32 }
0x198e   :  { %v9479_v10 = vpop.permute.xlu1 %9478 }
0x198f   :  { %9658 = vpow2.f32 %v3286_v22  ;;  %v9481_v26 = vunpack.i.h.bf16 %v9479_v10  ;;  %v9480_v46 = vunpack.i.l.bf16 %v9479_v10 }
0x1990   :  { %9660 = vpow2.f32 %v3288_v19 }
0x1991   :  { %v9067_v21 = vpack.c.bf16 %v9481_v26, %v9480_v46 }
0x1992   :  { %v2561_v59 = vpop.permute.xlu1 %2560 }
0x1993   :  { %9068 = vmatprep.subr.bf16.mxu0 %v9067_v21  ;;  %v2581_v6 = vsel %vm31_vm0, %v10516_v30, %v2561_v59  ;;  %v7551_v30 = vld [vmem:[%s11755_s2 + $0x2b8] ss:$0 sm:$0xff] }
0x1994   :  { %9070 = vmatpush3.bf16.msra.mxu0 %v9067_v21 }
0x1995   :  { %9072 = vmatprep.subr.bf16.mxu0 %v10671_v49 }
0x1996   :  { %v2567_v54 = vpop.permute.xlu1 %2566 }
0x1999   :  { %v9659_v14 = vpop.eup %9658 }
0x199a   :  { %v3290_v27 = vsel %vm31_vm0, %v9659_v14, 0.0  ;;  %v9661_v0 = vpop.eup %9660  ;;  %v2569_v34 = vpop.permute.xlu1 %2568 }
0x199b   :  { %3291 = vadd.xlane.f32.xlu0 %v3290_v27  ;;  %v3293_v43 = vsel %vm31_vm0, %v9661_v0, 0.0  ;;  %v2583_v7 = vsel %vm650_vm3, %v2581_v6, %v2569_v34  ;;  %v3602_v34 = vld [vmem:[%s11756_s3 + $0x8] sm:$0xff]  ;;  %v3601_v6 = vld [vmem:[%s11756_s3] sm:$0xff] }
0x199e   :  { %v2577_v4 = vpop.permute.xlu1 %2576 }
0x199f   :  { %3294 = vadd.xlane.f32.xlu0 %v3293_v43  ;;  %v2586_v39 = vsel %vm2584_vm5, %v2583_v7, %v2577_v4  ;;  %v3603_v7 = vld [vmem:[%s11756_s3 + $0x10] sm:$0xff] }
0x19b5   :  { %2558 = vrot.lane.b32.xlu0 %v10522_v37, %s9826_s30 }
0x19b9   :  { %2574 = vrot.lane.b32.xlu0 %v10584_v15, %s9828_s6  ;;  %v3420_v15 = vld [vmem:[%s11755_s2 + $0x290] sm:$0xff] }
0x19ba   :  { %v10688_v17 = vpack.c.bf16 %v3420_v15, %v3419_v47 }
0x19bd   :  { %3389 = vrot.lane.b32.xlu0 %v10624_v23, %s9826_s30 }
0x19c1   :  { %3397 = vrot.lane.b32.xlu0 %v3176_v63, %s9827_s5  ;;  %v3424_v63 = vld [vmem:[%s11755_s2 + $0x2b0] sm:$0xff] }
0x19c2   :  { %v10712_v3 = vpack.c.bf16 %v3424_v63, %v3423_v62 }
0x1a28   :  { %v3292_v37 = vpop.xlane.xlu0 %3291 }
0x1a29   :  { %9662 = vrcp.f32 %v3292_v37 }
0x1a2c   :  { %v3295_v13 = vpop.xlane.xlu0 %3294 }
0x1a2d   :  { %9664 = vrcp.f32 %v3295_v13 }
0x1a30   :  { %v2559_v41 = vpop.permute.xlu0 %2558 }
0x1a31   :  { %v2580_v23 = vsel %vm31_vm0, %v10518_v31, %v2559_v41 }
0x1a32   :  { %v2582_v58 = vsel %vm650_vm3, %v2580_v23, %v2567_v54 }
0x1a33   :  { %v9663_v16 = vpop.eup %9662 }
0x1a34   :  { %v3298_v40 = vmul.f32 %v9663_v16, %v9659_v14  ;;  %v2575_v44 = vpop.permute.xlu0 %2574  ;;  %v3392_v14 = vpop.permute.xlu1 %3391 }
0x1a35   :  { %v2585_v31 = vsel %vm2584_vm5, %v2582_v58, %v2575_v44 }
0x1a36   :  { %8479 = vmatprep.mubr.msk.f32.mxu0 %vm31_vm0, %v3298_v40 }
0x1a37   :  { %v9665_v51 = vpop.eup %9664 }
0x1a38   :  { %v3299_v56 = vmul.f32 %v9665_v51, %v9661_v0  ;;  %v3390_v27 = vpop.permute.xlu0 %3389  ;;  %v3400_v0 = vpop.permute.xlu1 %3399 }
0x1a39   :  { %v3411_v38 = vsel %vm31_vm0, %v10600_v1, %v3390_v27  ;;  %v3611_v27 = vld [vmem:[%s11756_s3 + $0x50] sm:$0xff] }
0x1a3a   :  { %8480 = vmatmul.mubr.msk.f32.vlgmr.msra.gmra.mrb[34].mxu0 %vm31_vm0, %v3299_v56 }
0x1a3b   :  { %9074 = vmatpush3.bf16.msra.mxu0 %v10671_v49  ;;  %8498 = vmatprep.mubr.msk.f32.mxu0 %vm163_vm1, %v2585_v31 }
0x1a3c   :  { %9076 = vmatprep.subr.bf16.mxu0 %v10688_v17  ;;  %v3398_v43 = vpop.permute.xlu0 %3397 }
0x1a3d   :  { %v3413_v28 = vsel %vm650_vm3, %v3411_v38, %v3398_v43  ;;  %v3614_v43 = vld [vmem:[%s11756_s3 + $0x68] sm:$0xff]  ;;  %v3616_v38 = vld [vmem:[%s11756_s3 + $0x78] sm:$0xff] }
0x1a3f   :  { %9078 = vmatpush3.bf16.msra.mxu0 %v10688_v17 }
0x1a40   :  { %9080 = vmatprep.subr.bf16.mxu0 %v10702_v29 }
0x1a43   :  { %9082 = vmatpush3.bf16.msra.mxu0 %v10702_v29 }
0x1a44   :  { %9084 = vmatprep.subr.bf16.mxu0 %v10712_v3 }
0x1a47   :  { %9086 = vmatpush3.bf16.msra.mxu0 %v10712_v3 }
0x1a4a   :  { %8499 = vmatmul.mubr.msk.f32.vlgmr.msra.gmra.mrb[36].mxu0 %vm163_vm1, %v2586_v39  ;;  %v10783_v39 = vpack.c.bf16 %v3603_v7, %v3601_v6 }
0x1b0d   :  { %v8481_v60 = vpop.f32.mrb[34].mxu0 }
0x1b0e   :  { %3407 = vrot.lane.b32.xlu1 %v8481_v60, %s9828_s6  ;;  %v3378_v11 = vpop.f32.mrb[35].mxu0  ;;  %v3606_v60 = vld [vmem:[%s11756_s3 + $0x28] sm:$0xff] }
0x1b0f   :  { %3405 = vrot.lane.b32.xlu0 %v3378_v11, %s9828_s6  ;;  %v3608_v11 = vld [vmem:[%s11756_s3 + $0x38] sm:$0xff] }
0x1b1d   :  { %v8500_v12 = vpop.f32.mrb[36].mxu0 }
0x1b1e   :  { %v3508_v32 = vpop.f32.mrb[37].mxu0  ;;  %v3514_v22 = vadd.f32 %v8500_v12, %v7551_v30  ;;  %v10793_v12 = vpack.c.bf16 %v3608_v11, %v3606_v60  ;;  %v10860_v60 = vld [vmem:[%s11755_s2 + $0x2c0] ss:$0 sm:$0xff] }
0x1b1f   :  { %v3509_v19 = vadd.f32 %v7551_v30, %v3508_v32  ;;  %v3605_v32 = vld [vmem:[%s11756_s3 + $0x20] sm:$0xff] }
0x1b20   :  { %v10731_v26 = vadd.f32 %v3514_v22, %v10256_v33  ;;  %v3412_v33 = vsel %vm31_vm0, %v10598_v18, %v3392_v14  ;;  %v3610_v22 = vld [vmem:[%s11756_s3 + $0x48] sm:$0xff]  ;;  %v3609_v14 = vld [vmem:[%s11756_s3 + $0x40] sm:$0xff] }
0x1b21   :  { %v10728_v10 = vadd.f32 %v3509_v19, %v10259_v36  ;;  %v3414_v13 = vsel %vm650_vm3, %v3412_v33, %v3400_v0  ;;  %v10819_v0 = vpack.c.bf16 %v3611_v27, %v3609_v14  ;;  %v10832_v33 = vpack.c.bf16 %v3616_v38, %v3614_v43  ;;  %v3790_v14 = vld [vmem:[%s11755_s2 + $0x368] sm:$0xff]  ;;  %v3773_v38 = vld [vmem:[%s11755_s2 + $0x2e0] sm:$0xff] }
0x1b22   :  { %v3536_v21 = vsel %vm163_vm1, %v10731_v26, 0.0 }
0x1b23   :  { %v3533_v46 = vsel %vm163_vm1, %v10728_v10, 0.0 }
0x1b2e   :  { %3534 = vadd.xlane.f32.xlu0 %v3533_v46  ;;  %v3612_v46 = vld [vmem:[%s11756_s3 + $0x58] sm:$0xff] }
0x1b32   :  { %3537 = vadd.xlane.f32.xlu1 %v3536_v21  ;;  %v10811_v21 = vpack.c.bf16 %v3612_v46, %v3610_v22 }
0x1b80   :  { %v3408_v36 = vpop.permute.xlu1 %3407 }
0x1b81   :  { %v3406_v37 = vpop.permute.xlu0 %3405  ;;  %v3416_v59 = vsel %vm2584_vm5, %v3414_v13, %v3408_v36  ;;  %v3613_v36 = vld [vmem:[%s11756_s3 + $0x60] sm:$0xff] }
0x1b82   :  { %v3415_v41 = vsel %vm2584_vm5, %v3413_v28, %v3406_v37  ;;  %v3615_v28 = vld [vmem:[%s11756_s3 + $0x70] sm:$0xff]  ;;  %v11759_v37 = vmov 0.0  }
0x1b83   :  { %8501 = vmatprep.mubr.msk.f32.mxu0 %vm163_vm1, %v3415_v41  ;;  %3706 = vmatprep.mubr.f32.mxu1 %v11759_v37  ;;  %v10838_v13 = vpack.c.bf16 %v3615_v28, %v3613_v36  ;;  %v3774_v36 = vld [vmem:[%s11755_s2 + $0x2e8] sm:$0xff]  ;;  %v3791_v28 = vld [vmem:[%s11755_s2 + $0x370] sm:$0xff] }
0x1b84   :  { %8502 = vmatmul.mubr.msk.f32.gmra.mrb[38].mxu0 %vm163_vm1, %v3416_v59 }
0x1bbb   :  { %v3535_v15 = vpop.xlane.xlu0 %3534 }
0x1bbc   :  { %v3545_v44 = vmul.f32 0.015625, %v3535_v15 }
0x1bbe   :  { %v10757_v55 = vsub.f32 %v10728_v10, %v3545_v44 }
0x1bbf   :  { %v3538_v16 = vpop.xlane.xlu1 %3537 }
0x1bc0   :  { %v3546_v40 = vmul.f32 0.015625, %v3538_v16  ;;  %v3553_v63 = vmul.f32 %v10757_v55, %v10757_v55 }
0x1bc2   :  { %v10748_v1 = vsub.f32 %v10731_v26, %v3546_v40 }
0x1bc4   :  { %v3554_v18 = vmul.f32 %v10748_v1, %v10748_v1 }
0x1bc6   :  { %v3560_v47 = vsel %vm163_vm1, %v3554_v18, 0.0 }
0x1bc7   :  { %3561 = vadd.xlane.f32.xlu1 %v3560_v47 }
0x1c54   :  { %v3562_v41 = vpop.xlane.xlu1 %3561 }
0x1c55   :  { %v3570_v40 = vmul.f32 0.015625, %v3562_v41  ;;  %v3792_v41 = vld [vmem:[%s11755_s2 + $0x378] sm:$0xff] }
0x1c57   :  { %v8503_v23 = vpop.f32.mrb[38].mxu0 }
0x1c58   :  { %v3518_v51 = vpop.f32.mrb[39].mxu0  ;;  %v3524_v54 = vadd.f32 %v8503_v23, %v7551_v30 }
0x1c59   :  { %v3519_v56 = vadd.f32 %v7551_v30, %v3518_v51  ;;  %v3607_v30 = vld [vmem:[%s11756_s3 + $0x30] sm:$0xff]  ;;  %v3574_v51 = vadd.f32 1e-05, %v3570_v40 }
0x1c5a   :  { %v10760_v8 = vadd.f32 %v3524_v54, %v10278_v45  ;;  %v3604_v45 = vld [vmem:[%s11756_s3 + $0x18] sm:$0xff]  ;;  %v10801_v19 = vpack.c.bf16 %v3607_v30, %v3605_v32  ;;  %v10866_v32 = vld [vmem:[%s11755_s2 + $0x2c8] ss:$0 sm:$0xff]  ;;  %v3775_v40 = vld [vmem:[%s11755_s2 + $0x2f0] sm:$0xff] }
0x1c5b   :  { %v10754_v58 = vadd.f32 %v3519_v56, %v10281_v52  ;;  %v3557_v52 = vsel %vm163_vm1, %v3553_v63, 0.0  ;;  %v10775_v4 = vpack.c.bf16 %v3604_v45, %v3602_v34  ;;  %9666 = vrsqrt.f32 %v3574_v51  ;;  %v3794_v51 = vld [vmem:[%s11755_s2 + $0x388] sm:$0xff] }
0x1c5c   :  { %v3542_v62 = vsel %vm163_vm1, %v10760_v8, 0.0 }
0x1c5d   :  { %v3539_v31 = vsel %vm163_vm1, %v10754_v58, 0.0  ;;  %9088 = vmatprep.subr.bf16.mxu1 %v10775_v4 }
0x1c5e   :  { %3540 = vadd.xlane.f32.xlu0 %v3539_v31  ;;  %9090 = vmatpush1.bf16.msra.mxu1 %v10783_v39 }
0x1c5f   :  { %9092 = vmatprep.subr.bf16.mxu1 %v10793_v12 }
0x1c62   :  { %3543 = vadd.xlane.f32.xlu0 %v3542_v62  ;;  %9094 = vmatpush1.bf16.msra.mxu1 %v10801_v19 }
0x1c63   :  { %9096 = vmatprep.subr.bf16.mxu1 %v10811_v21 }
0x1c65   :  { %v9667_v34 = vpop.eup %9666 }
0x1c66   :  { %3558 = vadd.xlane.f32.xlu0 %v3557_v52  ;;  %9098 = vmatpush1.bf16.msra.mxu1 %v10819_v0  ;;  %v3582_v7 = vmul.f32 %v9667_v34, %v10748_v1 }
0x1c67   :  { %9100 = vmatprep.subr.bf16.mxu1 %v10832_v33 }
0x1c68   :  { %v3590_v22 = vmul.f32 %v10860_v60, %v3582_v7 }
0x1c6a   :  { %9102 = vmatpush1.bf16.msra.mxu1 %v10838_v13  ;;  %v3598_v1 = vadd.f32 %v10866_v32, %v3590_v22 }
0x1c6b   :  { %9136 = vmatprep.subr.bf16.mxu1 %v10296_v57 }
0x1ceb   :  { %v3541_v59 = vpop.xlane.xlu0 %3540 }
0x1cec   :  { %v3547_v16 = vmul.f32 0.015625, %v3541_v59  ;;  %v10921_v59 = vpack.c.bf16 %v3774_v36, %v3773_v38  ;;  %v3784_v38 = vld [vmem:[%s11755_s2 + $0x338] sm:$0xff] }
0x1cee   :  { %v10844_v18 = vsub.f32 %v10754_v58, %v3547_v16  ;;  %v10924_v16 = vpack.c.bf16 %v3792_v41, %v3791_v28  ;;  %v3801_v28 = vld [vmem:[%s11755_s2 + $0x3c0] sm:$0xff]  ;;  %v3802_v41 = vld [vmem:[%s11755_s2 + $0x3c8] sm:$0xff] }
0x1cef   :  { %v3544_v47 = vpop.xlane.xlu0 %3543 }
0x1cf0   :  { %v3548_v15 = vmul.f32 0.015625, %v3544_v47  ;;  %v3555_v23 = vmul.f32 %v10844_v18, %v10844_v18  ;;  %v3776_v47 = vld [vmem:[%s11755_s2 + $0x2f8] sm:$0xff] }
0x1cf2   :  { %v10849_v44 = vsub.f32 %v10760_v8, %v3548_v15  ;;  %v3563_v54 = vsel %vm163_vm1, %v3555_v23, 0.0  ;;  %v10933_v15 = vpack.c.bf16 %v3776_v47, %v3775_v40  ;;  %v3793_v23 = vld [vmem:[%s11755_s2 + $0x380] sm:$0xff]  ;;  %v11015_v40 = vpack.c.bf16 %v3802_v41, %v3801_v28 }
0x1cf3   :  { %3564 = vadd.xlane.f32.xlu0 %v3563_v54  ;;  %v3559_v56 = vpop.xlane.xlu0 %3558  ;;  %v10943_v54 = vpack.c.bf16 %v3794_v51, %v3793_v23  ;;  %v3785_v47 = vld [vmem:[%s11755_s2 + $0x340] sm:$0xff]  ;;  %v3786_v23 = vld [vmem:[%s11755_s2 + $0x348] sm:$0xff]  ;;  %v3620_v28 = vlaneseq }
0x1cf4   :  { %v3569_v31 = vmul.f32 0.015625, %v3559_v56  ;;  %v3556_v62 = vmul.f32 %v10849_v44, %v10849_v44  ;;  %v3777_v56 = vld [vmem:[%s11755_s2 + $0x300] sm:$0xff]  ;;  %v11023_v51 = vpack.c.bf16 %v3786_v23, %v3785_v47 }
0x1cf5   :  { %v3621_v41 = vshrl.u32 %v3620_v28, 7  ;;  %v7558_v47 = vld [vmem:[%s11756_s3 + $0x80] ss:$8 sm:$0x3] }
0x1cf6   :  { %v3573_v63 = vadd.f32 1e-05, %v3569_v31  ;;  %v3566_v52 = vsel %vm163_vm1, %v3556_v62, 0.0  ;;  %v3778_v31 = vld [vmem:[%s11755_s2 + $0x308] sm:$0xff] }
0x1cf7   :  { %3567 = vadd.xlane.f32.xlu1 %v3566_v52  ;;  %v10951_v62 = vpack.c.bf16 %v3778_v31, %v3777_v56  ;;  %v3796_v52 = vld [vmem:[%s11755_s2 + $0x398] sm:$0xff]  ;;  %v3626_v23 = vsub.s32 1, %v3621_v41 }
0x1cf8   :  { %9668 = vrsqrt.f32 %v3573_v63  ;;  %v3795_v63 = vld [vmem:[%s11755_s2 + $0x390] sm:$0xff] }
0x1cf9   :  { %v10961_v34 = vpack.c.bf16 %v3796_v52, %v3795_v63 }
0x1d02   :  { %v9669_v45 = vpop.eup %9668 }
0x1d03   :  { %v3581_v6 = vmul.f32 %v9669_v45, %v10757_v55  ;;  %v3788_v55 = vld [vmem:[%s11755_s2 + $0x358] sm:$0xff]  ;;  %v3779_v45 = vld [vmem:[%s11755_s2 + $0x310] sm:$0xff] }
0x1d05   :  { %v3589_v11 = vmul.f32 %v10860_v60, %v3581_v6  ;;  %v3780_v6 = vld [vmem:[%s11755_s2 + $0x318] sm:$0xff] }
0x1d06   :  { %v10969_v7 = vpack.c.bf16 %v3780_v6, %v3779_v45 }
0x1d07   :  { %v3597_v30 = vadd.f32 %v10866_v32, %v3589_v11  ;;  %v3797_v11 = vld [vmem:[%s11755_s2 + $0x3a0] sm:$0xff] }
0x1d09   :  { %7559 = vmatmul.mubr.msk.f32.vlgmr.msra.gmra.mrb[48].mxu1 %vm163_vm1, %v3597_v30  ;;  %v3798_v30 = vld [vmem:[%s11755_s2 + $0x3a8] sm:$0xff] }
0x1d0a   :  { %3712 = vmatprep.mubr.f32.mxu1 %v11759_v37  ;;  %9138 = vmatpush3.bf16.msra.mxu1 %v10296_v57  ;;  %v3787_v57 = vld [vmem:[%s11755_s2 + $0x350] sm:$0xff]  ;;  %v10979_v22 = vpack.c.bf16 %v3798_v30, %v3797_v11 }
0x1d0b   :  { %9140 = vmatprep.subr.bf16.mxu1 %v10316_v48  ;;  %v10892_v46 = vpack.c.bf16 %v3788_v55, %v3787_v57  ;;  %v3782_v57 = vld [vmem:[%s11755_s2 + $0x328] sm:$0xff] }
0x1d0d   :  { %7560 = vmatmul.mubr.msk.f32.gmra.mrb[50].mxu1 %vm163_vm1, %v3598_v1  ;;  %9104 = vmatprep.subr.bf16.mxu0 %v10892_v46  ;;  %v3781_v1 = vld [vmem:[%s11755_s2 + $0x320] sm:$0xff] }
0x1d0e   :  { %3718 = vmatprep.mubr.f32.mxu1 %v11759_v37  ;;  %9142 = vmatpush3.bf16.msra.mxu1 %v10316_v48  ;;  %v3771_v48 = vld [vmem:[%s11755_s2 + $0x2d0] sm:$0xff]  ;;  %v10987_v55 = vpack.c.bf16 %v3782_v57, %v3781_v1 }
0x1d0f   :  { %9144 = vmatprep.subr.bf16.mxu1 %v10336_v25 }
0x1d12   :  { %9146 = vmatpush3.bf16.msra.mxu1 %v10336_v25  ;;  %v3772_v25 = vld [vmem:[%s11755_s2 + $0x2d8] sm:$0xff] }
0x1d13   :  { %9148 = vmatprep.subr.bf16.mxu1 %v10356_v5  ;;  %v10903_v27 = vpack.c.bf16 %v3772_v25, %v3771_v48  ;;  %v3799_v48 = vld [vmem:[%s11755_s2 + $0x3b0] sm:$0xff]  ;;  %v3800_v25 = vld [vmem:[%s11755_s2 + $0x3b8] sm:$0xff] }
0x1d15   :  { %9106 = vmatpush3.bf16.msra.mxu0 %v10903_v27 }
0x1d16   :  { %9150 = vmatpush3.bf16.msra.mxu1 %v10356_v5  ;;  %v3789_v5 = vld [vmem:[%s11755_s2 + $0x360] sm:$0xff] }
0x1d17   :  { %9152 = vmatprep.subr.bf16.mxu1 %v10301_v9  ;;  %v10905_v43 = vpack.c.bf16 %v3790_v14, %v3789_v5  ;;  %v10997_v5 = vpack.c.bf16 %v3800_v25, %v3799_v48  ;;  %v3783_v14 = vld [vmem:[%s11755_s2 + $0x330] sm:$0xff] }
0x1d18   :  { %v11005_v36 = vpack.c.bf16 %v3784_v38, %v3783_v14 }
0x1d19   :  { %9108 = vmatprep.subr.bf16.mxu0 %v10905_v43 }
0x1d1a   :  { %9110 = vmatpush3.bf16.msra.mxu0 %v10921_v59 }
0x1d1b   :  { %9112 = vmatprep.subr.bf16.mxu0 %v10924_v16 }
0x1d1e   :  { %9114 = vmatpush3.bf16.msra.mxu0 %v10933_v15 }
0x1d1f   :  { %9116 = vmatprep.subr.bf16.mxu0 %v10943_v54 }
0x1d22   :  { %9118 = vmatpush3.bf16.msra.mxu0 %v10951_v62 }
0x1d23   :  { %9120 = vmatprep.subr.bf16.mxu0 %v10961_v34 }
0x1d26   :  { %9122 = vmatpush3.bf16.msra.mxu0 %v10969_v7 }
0x1d27   :  { %9124 = vmatprep.subr.bf16.mxu0 %v10979_v22 }
0x1d2a   :  { %9126 = vmatpush3.bf16.msra.mxu0 %v10987_v55 }
0x1d2b   :  { %9128 = vmatprep.subr.bf16.mxu0 %v10997_v5 }
0x1d2e   :  { %9130 = vmatpush3.bf16.msra.mxu0 %v11005_v36 }
0x1d2f   :  { %9132 = vmatprep.subr.bf16.mxu0 %v11015_v40 }
0x1d32   :  { %9134 = vmatpush3.bf16.msra.mxu0 %v11023_v51 }
0x1d33   :  { %9168 = vmatprep.subr.bf16.mxu0 %v10392_v42 }
0x1d80   :  { %v3565_v56 = vpop.xlane.xlu0 %3564 }
0x1d81   :  { %v3571_v31 = vmul.f32 0.015625, %v3565_v56 }
0x1d83   :  { %v3575_v63 = vadd.f32 1e-05, %v3571_v31 }
0x1d84   :  { %v3568_v52 = vpop.xlane.xlu1 %3567 }
0x1d85   :  { %9670 = vrsqrt.f32 %v3575_v63  ;;  %v3572_v45 = vmul.f32 0.015625, %v3568_v52 }
0x1d87   :  { %v3576_v6 = vadd.f32 1e-05, %v3572_v45 }
0x1d89   :  { %9672 = vrsqrt.f32 %v3576_v6 }
0x1d8f   :  { %v9671_v11 = vpop.eup %9670 }
0x1d90   :  { %v3583_v30 = vmul.f32 %v9671_v11, %v10844_v18  ;;  %v3622_v18 = vsub.s32 0, %v3621_v41 }
0x1d92   :  { %v3591_v1 = vmul.f32 %v10860_v60, %v3583_v30  ;;  %v11040_v56 = vrot.slane %v7558_v47, %v3622_v18 }
0x1d93   :  { %v9673_v57 = vpop.eup %9672 }
0x1d94   :  { %v3599_v48 = vadd.f32 %v10866_v32, %v3591_v1  ;;  %v3584_v25 = vmul.f32 %v9673_v57, %v10849_v44  ;;  %11771 = vst [vmem:[#allocation2_spill] sm:$0xff] %v11040_v56  ;;  %v11042_v44 = vrot.slane %v7558_v47, %v3626_v23 }
0x1d96   :  { %7561 = vmatmul.mubr.msk.f32.gmra.mrb[52].mxu1 %vm163_vm1, %v3599_v48  ;;  %v3592_v14 = vmul.f32 %v10860_v60, %v3584_v25  ;;  %11772 = vst [vmem:[#allocation3_spill] sm:$0xff] %v11042_v44 }
0x1d97   :  { %3724 = vmatprep.mubr.f32.mxu1 %v11759_v37 }
0x1d98   :  { %v3600_v38 = vadd.f32 %v10866_v32, %v3592_v14 }
0x1d9a   :  { %7562 = vmatmul.mubr.msk.f32.gmra.mrb[54].mxu1 %vm163_vm1, %v3600_v38 }
0x1ddc   :  { %v3708_v31 = vpop.f32.mrb[48].mxu1 }
0x1ddd   :  { %v3709_v60 = vadd.f32 %v3708_v31, %v11040_v56  ;;  %v3710_v63 = vpop.f32.mrb[49].mxu1 }
0x1dde   :  { %v3711_v32 = vadd.f32 %v3710_v63, %v11042_v44 }
0x1ddf   :  { %v3739_v52 = vmul.f32 0.70710677, %v3709_v60  ;;  %v3731_v18 = vmul.f32 0.5, %v3709_v60 }
0x1de0   :  { %v3740_v45 = vmul.f32 0.70710677, %v3711_v32  ;;  %v3714_v6 = vpop.f32.mrb[50].mxu1  ;;  %v3732_v28 = vmul.f32 0.5, %v3711_v32 }
0x1de1   :  { %9674 = verf.f32 %v3739_v52  ;;  %v3715_v11 = vadd.f32 %v3714_v6, %v11040_v56  ;;  %v3716_v30 = vpop.f32.mrb[51].mxu1 }
0x1de2   :  { %9676 = verf.f32 %v3740_v45  ;;  %v3717_v1 = vadd.f32 %v3716_v30, %v11042_v44 }
0x1de3   :  { %v3741_v57 = vmul.f32 0.70710677, %v3715_v11  ;;  %v3733_v45 = vmul.f32 0.5, %v3715_v11 }
0x1de4   :  { %v3742_v48 = vmul.f32 0.70710677, %v3717_v1  ;;  %v3734_v6 = vmul.f32 0.5, %v3717_v1 }
0x1de5   :  { %9678 = verf.f32 %v3741_v57 }
0x1de6   :  { %9680 = verf.f32 %v3742_v48 }
0x1deb   :  { %v9675_v25 = vpop.eup %9674 }
0x1dec   :  { %v9677_v14 = vpop.eup %9676  ;;  %v3755_v38 = vadd.f32 1.0, %v9675_v25 }
0x1ded   :  { %v3756_v41 = vadd.f32 1.0, %v9677_v14 }
0x1dee   :  { %v3763_v63 = vmul.f32 %v3755_v38, %v3731_v18 }
0x1def   :  { %v9679_v47 = vpop.eup %9678  ;;  %v3764_v23 = vmul.f32 %v3756_v41, %v3732_v28 }
0x1df0   :  { %v9681_v31 = vpop.eup %9680  ;;  %v3757_v52 = vadd.f32 1.0, %v9679_v47 }
0x1df1   :  { %v3758_v37 = vadd.f32 1.0, %v9681_v31  ;;  %3872 = vmatprep.mubr.f32.mxu0 %v3764_v23 }
0x1df2   :  { %3873 = vmatmul.mubr.f32.vlgmr.msra.gmra.mrb[40].mxu0 %v3763_v63  ;;  %v3765_v57 = vmul.f32 %v3757_v52, %v3733_v45 }
0x1df3   :  { %v3766_v30 = vmul.f32 %v3758_v37, %v3734_v6  ;;  %9170 = vmatpush3.bf16.msra.mxu0 %v10392_v42 }
0x1df4   :  { %9172 = vmatprep.subr.bf16.mxu0 %v10397_v50 }
0x1df5   :  { %3877 = vmatprep.mubr.f32.mxu0 %v3766_v30 }
0x1df6   :  { %3878 = vmatmul.mubr.f32.gmra.mrb[42].mxu0 %v3765_v57 }
0x1df7   :  { %9174 = vmatpush3.bf16.msra.mxu0 %v10397_v50 }
0x1df8   :  { %9176 = vmatprep.subr.bf16.mxu0 %v10408_v53 }
0x1dfb   :  { %9178 = vmatpush3.bf16.msra.mxu0 %v10408_v53 }
0x1dfc   :  { %9180 = vmatprep.subr.bf16.mxu0 %v10419_v24 }
0x1dff   :  { %9182 = vmatpush3.bf16.msra.mxu0 %v10419_v24 }
0x1e69   :  { %v3720_v60 = vpop.f32.mrb[52].mxu1 }
0x1e6a   :  { %v3721_v37 = vadd.f32 %v3720_v60, %v11040_v56  ;;  %v3722_v32 = vpop.f32.mrb[53].mxu1 }
0x1e6b   :  { %v3723_v42 = vadd.f32 %v3722_v32, %v11042_v44 }
0x1e6c   :  { %v3743_v11 = vmul.f32 0.70710677, %v3721_v37  ;;  %v3735_v23 = vmul.f32 0.5, %v3721_v37 }
0x1e6d   :  { %v3744_v1 = vmul.f32 0.70710677, %v3723_v42  ;;  %v3726_v48 = vpop.f32.mrb[54].mxu1  ;;  %v3736_v18 = vmul.f32 0.5, %v3723_v42  ;;  %v7563_v42 = vld [vmem:[%s11755_s2 + $0x3d0] ss:$0 sm:$0xff] }
0x1e6e   :  { %9682 = verf.f32 %v3743_v11  ;;  %v3727_v50 = vadd.f32 %v3726_v48, %v11040_v56  ;;  %v3728_v25 = vpop.f32.mrb[55].mxu1 }
0x1e6f   :  { %9684 = verf.f32 %v3744_v1  ;;  %v3729_v53 = vadd.f32 %v3728_v25, %v11042_v44 }
0x1e70   :  { %v3745_v14 = vmul.f32 0.70710677, %v3727_v50  ;;  %v3737_v60 = vmul.f32 0.5, %v3727_v50 }
0x1e71   :  { %v3746_v38 = vmul.f32 0.70710677, %v3729_v53  ;;  %v3738_v30 = vmul.f32 0.5, %v3729_v53 }
0x1e72   :  { %9686 = verf.f32 %v3745_v14 }
0x1e73   :  { %9688 = verf.f32 %v3746_v38 }
0x1e78   :  { %v9683_v24 = vpop.eup %9682 }
0x1e79   :  { %v9685_v28 = vpop.eup %9684  ;;  %v3759_v41 = vadd.f32 1.0, %v9683_v24 }
0x1e7a   :  { %v3760_v47 = vadd.f32 1.0, %v9685_v28 }
0x1e7b   :  { %v3767_v45 = vmul.f32 %v3759_v41, %v3735_v23 }
0x1e7c   :  { %v9687_v31 = vpop.eup %9686  ;;  %v3768_v63 = vmul.f32 %v3760_v47, %v3736_v18 }
0x1e7d   :  { %v9689_v52 = vpop.eup %9688  ;;  %v3761_v6 = vadd.f32 1.0, %v9687_v31 }
0x1e7e   :  { %v3762_v57 = vadd.f32 1.0, %v9689_v52  ;;  %3882 = vmatprep.mubr.f32.mxu0 %v3768_v63 }
0x1e7f   :  { %3883 = vmatmul.mubr.f32.gmra.mrb[44].mxu0 %v3767_v45  ;;  %v3769_v11 = vmul.f32 %v3761_v6, %v3737_v60 }
0x1e80   :  { %v3770_v32 = vmul.f32 %v3762_v57, %v3738_v30 }
0x1e82   :  { %3887 = vmatprep.mubr.f32.mxu0 %v3770_v32 }
0x1e83   :  { %3888 = vmatmul.mubr.f32.gmra.mrb[46].mxu0 %v3769_v11 }
0x1ec5   :  { %v7906_v1 = vpop.f32.mrb[40].mxu0 }
0x1ec6   :  { %v7907_v37 = vpop.f32.mrb[41].mxu0 }
0x1ec7   :  { %v7908_v48 = vadd.f32 %v7907_v37, %v7906_v1 }
0x1ec9   :  { %v3875_v25 = vadd.f32 %v7908_v48, %v7563_v42  ;;  %v7909_v14 = vpop.f32.mrb[42].mxu0 }
0x1eca   :  { %v7910_v38 = vpop.f32.mrb[43].mxu0 }
0x1ecb   :  { %v11063_v53 = vadd.f32 %v3875_v25, %v10728_v10  ;;  %v7911_v24 = vadd.f32 %v7910_v38, %v7909_v14 }
0x1ecd   :  { %v3880_v50 = vadd.f32 %v7911_v24, %v7563_v42  ;;  %v3897_v28 = vsel %vm163_vm1, %v11063_v53, 0.0 }
0x1ece   :  { %3898 = vadd.xlane.f32.xlu0 %v3897_v28 }
0x1ecf   :  { %v11068_v41 = vadd.f32 %v3880_v50, %v10731_v26 }
0x1ed1   :  { %v3900_v18 = vsel %vm163_vm1, %v11068_v41, 0.0 }
0x1ed2   :  { %3901 = vadd.xlane.f32.xlu1 %v3900_v18 }
0x1f52   :  { %v7912_v47 = vpop.f32.mrb[44].mxu0 }
0x1f53   :  { %v7913_v23 = vpop.f32.mrb[45].mxu0 }
0x1f54   :  { %v7914_v31 = vadd.f32 %v7913_v23, %v7912_v47 }
0x1f56   :  { %v3885_v63 = vadd.f32 %v7914_v31, %v7563_v42  ;;  %v7915_v52 = vpop.f32.mrb[46].mxu0 }
0x1f57   :  { %v7916_v10 = vpop.f32.mrb[47].mxu0 }
0x1f58   :  { %v11073_v6 = vadd.f32 %v3885_v63, %v10754_v58  ;;  %v7917_v45 = vadd.f32 %v7916_v10, %v7915_v52 }
0x1f5a   :  { %11773 = vst [vmem:[#allocation4_spill] sm:$0xff] %v11073_v6  ;;  %v3890_v30 = vadd.f32 %v7917_v45, %v7563_v42  ;;  %v3903_v57 = vsel %vm163_vm1, %v11073_v6, 0.0 }
0x1f5b   :  { %3904 = vadd.xlane.f32.xlu0 %v3903_v57  ;;  %v3899_v26 = vpop.xlane.xlu0 %3898 }
0x1f5c   :  { %v11078_v60 = vadd.f32 %v3890_v30, %v10760_v8  ;;  %v3909_v32 = vmul.f32 0.015625, %v3899_v26 }
0x1f5e   :  { %11774 = vst [vmem:[#allocation5_spill] sm:$0xff] %v11078_v60  ;;  %v3913_v11 = vsub.f32 %v11063_v53, %v3909_v32  ;;  %v3906_v1 = vsel %vm163_vm1, %v11078_v60, 0.0 }
0x1f5f   :  { %v3902_v37 = vpop.xlane.xlu1 %3901  ;;  %3907 = vadd.xlane.f32.xlu1 %v3906_v1 }
0x1f60   :  { %v3910_v58 = vmul.f32 0.015625, %v3902_v37  ;;  %v3917_v48 = vmul.f32 %v3913_v11, %v3913_v11 }
0x1f62   :  { %v3914_v42 = vsub.f32 %v11068_v41, %v3910_v58  ;;  %v3921_v25 = vsel %vm163_vm1, %v3917_v48, 0.0  ;;  %v9814_v58 = vld [vmem:[%s11755_s2 + $0x190] ss:$0 sm:$0xff] }
0x1f63   :  { %3922 = vadd.xlane.f32.xlu0 %v3921_v25 }
0x1f64   :  { %v3918_v14 = vmul.f32 %v3914_v42, %v3914_v42 }
0x1f66   :  { %v3924_v38 = vsel %vm163_vm1, %v3918_v14, 0.0 }
0x1f67   :  { %3925 = vadd.xlane.f32.xlu1 %v3924_v38  ;;  %v9815_v38 = vld [vmem:[%s11755_s2 + $0x198] ss:$0 sm:$0xff] }
0x1fe8   :  { %v3905_v8 = vpop.xlane.xlu0 %3904 }
0x1fe9   :  { %v3911_v24 = vmul.f32 0.015625, %v3905_v8 }
0x1feb   :  { %v3915_v50 = vsub.f32 %v11073_v6, %v3911_v24 }
0x1fec   :  { %v3908_v28 = vpop.xlane.xlu1 %3907 }
0x1fed   :  { %v3912_v18 = vmul.f32 0.015625, %v3908_v28  ;;  %v3919_v47 = vmul.f32 %v3915_v50, %v3915_v50 }
0x1fef   :  { %v3916_v23 = vsub.f32 %v11078_v60, %v3912_v18  ;;  %v3927_v31 = vsel %vm163_vm1, %v3919_v47, 0.0 }
0x1ff0   :  { %3928 = vadd.xlane.f32.xlu0 %v3927_v31  ;;  %v3923_v63 = vpop.xlane.xlu0 %3922 }
0x1ff1   :  { %v3933_v52 = vmul.f32 0.015625, %v3923_v63  ;;  %v3920_v10 = vmul.f32 %v3916_v23, %v3916_v23 }
0x1ff3   :  { %v3937_v45 = vadd.f32 1e-05, %v3933_v52  ;;  %v3930_v30 = vsel %vm163_vm1, %v3920_v10, 0.0 }
0x1ff4   :  { %3931 = vadd.xlane.f32.xlu1 %v3930_v30  ;;  %v3926_v57 = vpop.xlane.xlu1 %3925 }
0x1ff5   :  { %9690 = vrsqrt.f32 %v3937_v45  ;;  %v3934_v26 = vmul.f32 0.015625, %v3926_v57  ;;  %v9816_v57 = vld [vmem:[%s11755_s2 + $0x270] ss:$0 sm:$0xff] }
0x1ff7   :  { %v3938_v32 = vadd.f32 1e-05, %v3934_v26 }
0x1ff9   :  { %9692 = vrsqrt.f32 %v3938_v32 }
0x1fff   :  { %v9691_v1 = vpop.eup %9690 }
0x2000   :  { %v3945_v37 = vmul.f32 %v9691_v1, %v3913_v11 }
0x2002   :  { %v3949_v48 = vmul.f32 %v9814_v58, %v3945_v37  ;;  %v11121_v37 = vld [vmem:[%s11755_s2 + $0x1e0] ss:$0 sm:$0xff] }
0x2003   :  { %v9693_v25 = vpop.eup %9692 }
0x2004   :  { %v3946_v14 = vmul.f32 %v9693_v25, %v3914_v42  ;;  %v3953_v8 = vadd.f32 %v9815_v38, %v3949_v48 }
0x2006   :  { %v3950_v24 = vmul.f32 %v9814_v58, %v3946_v14  ;;  %8520 = vmatprep.mubr.msk.f32.mxu1 %vm163_vm1, %v3953_v8  ;;  %8564 = vmatprep.mubr.msk.f32.mxu0 %vm163_vm1, %v3953_v8 }
0x2008   :  { %v3954_v28 = vadd.f32 %v9815_v38, %v3950_v24 }
0x200a   :  { %8521 = vmatmul.mubr.msk.f32.vlgmr.msra.gmra.mrb[56].mxu1 %vm163_vm1, %v3954_v28  ;;  %8565 = vmatmul.mubr.msk.f32.vlgmr.msra.gmra.mrb[48].mxu0 %vm163_vm1, %v3954_v28 }
0x200b   :  { %9154 = vmatpush3.bf16.msra.mxu1 %v10301_v9 }
0x200c   :  { %9156 = vmatprep.subr.bf16.mxu1 %v10321_v61 }
0x200f   :  { %9158 = vmatpush3.bf16.msra.mxu1 %v10321_v61 }
0x2010   :  { %9160 = vmatprep.subr.bf16.mxu1 %v10341_v2 }
0x2013   :  { %9162 = vmatpush3.bf16.msra.mxu1 %v10341_v2 }
0x2014   :  { %9164 = vmatprep.subr.bf16.mxu1 %v10361_v35 }
0x2017   :  { %9166 = vmatpush3.bf16.msra.mxu1 %v10361_v35 }
0x207d   :  { %v3929_v11 = vpop.xlane.xlu0 %3928 }
0x207e   :  { %v3935_v42 = vmul.f32 0.015625, %v3929_v11 }
0x2080   :  { %v3939_v18 = vadd.f32 1e-05, %v3935_v42 }
0x2081   :  { %v3932_v47 = vpop.xlane.xlu1 %3931 }
0x2082   :  { %9694 = vrsqrt.f32 %v3939_v18  ;;  %v3936_v31 = vmul.f32 0.015625, %v3932_v47 }
0x2084   :  { %v3940_v63 = vadd.f32 1e-05, %v3936_v31 }
0x2086   :  { %9696 = vrsqrt.f32 %v3940_v63  ;;  %v9818_v63 = vld [vmem:[%s11755_s2 + $0x228] ss:$0 sm:$0xff] }
0x208c   :  { %v9695_v9 = vpop.eup %9694 }
0x208d   :  { %v3947_v52 = vmul.f32 %v9695_v9, %v3915_v50 }
0x208f   :  { %v3951_v10 = vmul.f32 %v9814_v58, %v3947_v52 }
0x2090   :  { %v9697_v61 = vpop.eup %9696 }
0x2091   :  { %v3955_v45 = vadd.f32 %v9815_v38, %v3951_v10  ;;  %v3948_v30 = vmul.f32 %v9697_v61, %v3916_v23 }
0x2093   :  { %8523 = vmatprep.mubr.msk.f32.mxu1 %vm163_vm1, %v3955_v45  ;;  %8567 = vmatprep.mubr.msk.f32.mxu0 %vm163_vm1, %v3955_v45  ;;  %v3952_v2 = vmul.f32 %v9814_v58, %v3948_v30 }
0x2095   :  { %v3956_v35 = vadd.f32 %v9815_v38, %v3952_v2 }
0x2097   :  { %8524 = vmatmul.mubr.msk.f32.gmra.mrb[58].mxu1 %vm163_vm1, %v3956_v35  ;;  %8568 = vmatmul.mubr.msk.f32.gmra.mrb[50].mxu0 %vm163_vm1, %v3956_v35 }
0x2098   :  { %8542 = vmatprep.mubr.msk.f32.mxu1 %vm163_vm1, %v3953_v8 }
0x209b   :  { %8543 = vmatmul.mubr.msk.f32.vlgmr.msra.gmra.mrb[60].mxu1 %vm163_vm1, %v3954_v28 }
0x209c   :  { %8545 = vmatprep.mubr.msk.f32.mxu1 %vm163_vm1, %v3955_v45 }
0x209f   :  { %8546 = vmatmul.mubr.msk.f32.gmra.mrb[62].mxu1 %vm163_vm1, %v3956_v35 }
0x20dd   :  { %v8522_v50 = vpop.f32.mrb[56].mxu1  ;;  %v8566_v23 = vpop.f32.mrb[48].mxu0 }
0x20de   :  { %v4211_v26 = vadd.f32 %v9816_v57, %v8566_v23  ;;  %v4035_v32 = vpop.f32.mrb[57].mxu1  ;;  %v4205_v1 = vpop.f32.mrb[49].mxu0 }
0x20df   :  { %v11124_v58 = vadd.f32 %v11121_v37, %v4035_v32  ;;  %v4206_v48 = vadd.f32 %v9816_v57, %v4205_v1  ;;  %v11152_v32 = vadd.f32 %v11121_v37, %v8522_v50 }
0x20e1   :  { %8574 = vmatprep.mubr.msk.f32.mxu1 %vm31_vm0, %v11124_v58  ;;  %v9189_v25 = vpack.c.bf16 %v4211_v26, %v4206_v48  ;;  %v11128_v14 = vpack.i.bf16 %v4211_v26, %v4206_v48 }
0x216a   :  { %v11130_v38 = vpop.f32.mrb[58].mxu1  ;;  %v8569_v8 = vpop.f32.mrb[50].mxu0 }
0x216b   :  { %v4221_v24 = vadd.f32 %v9816_v57, %v8569_v8  ;;  %v11132_v28 = vpop.f32.mrb[59].mxu1  ;;  %v4215_v11 = vpop.f32.mrb[51].mxu0 }
0x216c   :  { %v4216_v42 = vadd.f32 %v9816_v57, %v4215_v11 }
0x216e   :  { %v8544_v18 = vpop.f32.mrb[60].mxu1  ;;  %v11134_v47 = vpack.c.bf16 %v4221_v24, %v4216_v42  ;;  %v11136_v31 = vpack.i.bf16 %v4221_v24, %v4216_v42 }
0x216f   :  { %v4126_v9 = vadd.f32 %v9818_v63, %v8544_v18  ;;  %v4120_v52 = vpop.f32.mrb[61].mxu1 }
0x2170   :  { %v4121_v10 = vadd.f32 %v9818_v63, %v4120_v52 }
0x2172   :  { %v8547_v61 = vpop.f32.mrb[62].mxu1  ;;  %v9183_v45 = vpack.c.bf16 %v4126_v9, %v4121_v10  ;;  %v11141_v30 = vpack.i.bf16 %v4126_v9, %v4121_v10 }
0x2173   :  { %v4136_v2 = vadd.f32 %v9818_v63, %v8547_v61  ;;  %v4130_v35 = vpop.f32.mrb[63].mxu1 }
0x2174   :  { %v4131_v23 = vadd.f32 %v9818_v63, %v4130_v35  ;;  %9185 = vmatprep.subr.msk.bf16.mxu1 %vm10444_vm4, %v9183_v45 }
0x2175   :  { %9188 = vmatpush3.bf16.xpose.msk.msra.mxu1 %vm10444_vm4, %v9183_v45 }
0x2176   :  { %9190 = vmatprep.subr.bf16.mxu1 %v9189_v25  ;;  %v11147_v57 = vpack.i.bf16 %v4136_v2, %v4131_v23  ;;  %v11149_v26 = vpack.c.bf16 %v4136_v2, %v4131_v23 }
0x217c   :  { %8575 = vmatmul.mubr.msk.f32.vlgmr.msra.gmra.mrb[64].mxu1 %vm31_vm0, %v11152_v32 }
0x217d   :  { %9192 = vmatpush3.bf16.msra.mxu1 %v9189_v25 }
0x224f   :  { %v8576_v1 = vpop.f32.mrb[64].mxu1 }
0x2250   :  { %v4312_v48 = vmul.f32 0.25, %v8576_v1  ;;  %v4302_v8 = vpop.f32.mrb[65].mxu1 }
0x2251   :  { %v4311_v24 = vmul.f32 0.25, %v4302_v8 }
0x2252   :  { %v4316_v11 = vsel %vm31_vm0, %v4312_v48, -inf }
0x2253   :  { %4317 = vmax.xlane.f32.xlu1 %v4316_v11  ;;  %v4313_v42 = vsel %vm31_vm0, %v4311_v24, -inf }
0x2254   :  { %4314 = vmax.xlane.f32.xlu0 %v4313_v42 }
0x22e0   :  { %v4318_v18 = vpop.xlane.xlu1 %4317 }
0x22e1   :  { %v4320_v63 = vsub.f32 %v4312_v48, %v4318_v18  ;;  %v4315_v9 = vpop.xlane.xlu0 %4314 }
0x22e2   :  { %v4319_v52 = vsub.f32 %v4311_v24, %v4315_v9 }
0x22e3   :  { %v4323_v50 = vmul.f32 1.442695, %v4320_v63 }
0x22e4   :  { %v4321_v10 = vmul.f32 1.442695, %v4319_v52 }
0x22e5   :  { %9698 = vpow2.f32 %v4323_v50 }
0x22e6   :  { %9700 = vpow2.f32 %v4321_v10 }
0x22ef   :  { %v9699_v61 = vpop.eup %9698 }
0x22f0   :  { %v9701_v25 = vpop.eup %9700  ;;  %v4328_v45 = vsel %vm31_vm0, %v9699_v61, 0.0 }
0x22f1   :  { %4329 = vadd.xlane.f32.xlu1 %v4328_v45  ;;  %v4325_v2 = vsel %vm31_vm0, %v9701_v25, 0.0 }
0x22f2   :  { %4326 = vadd.xlane.f32.xlu0 %v4325_v2 }
0x2302   :  { %4416 = vrot.lane.b32.xlu1 %v11124_v58, %s9823_s25 }
0x2306   :  { %9488 = vrot.lane.b32.xlu1 %v11141_v30, %s9824_s28 }
0x2308   :  { %9483 = vrot.lane.b32.xlu0 %v11141_v30, %s9823_s25 }
0x230a   :  { %4418 = vrot.lane.b32.xlu1 %v11152_v32, %s9823_s25 }
0x230c   :  { %4620 = vrot.lane.b32.xlu0 %v11124_v58, %s9824_s28 }
0x230e   :  { %4622 = vrot.lane.b32.xlu1 %v11152_v32, %s9824_s28 }
0x237e   :  { %v4330_v35 = vpop.xlane.xlu1 %4329 }
0x237f   :  { %9702 = vrcp.f32 %v4330_v35  ;;  %v4327_v23 = vpop.xlane.xlu0 %4326 }
0x2380   :  { %9704 = vrcp.f32 %v4327_v23 }
0x2382   :  { %v4417_v1 = vpop.permute.xlu1 %4416 }
0x2383   :  { %v9484_v48 = vpop.permute.xlu0 %9483 }
0x2384   :  { %v9486_v8 = vunpack.i.h.bf16 %v9484_v48  ;;  %v9485_v24 = vunpack.i.l.bf16 %v9484_v48 }
0x2386   :  { %v9193_v11 = vpack.c.bf16 %v9486_v8, %v9485_v24  ;;  %v9489_v42 = vpop.permute.xlu1 %9488 }
0x2387   :  { %v9491_v9 = vunpack.i.h.bf16 %v9489_v42  ;;  %v9490_v52 = vunpack.i.l.bf16 %v9489_v42  ;;  %v4621_v35 = vpop.permute.xlu0 %4620 }
0x2388   :  { %9195 = vmatprep.subr.msk.bf16.mxu1 %vm10444_vm4, %v9193_v11 }
0x2389   :  { %v9703_v18 = vpop.eup %9702  ;;  %v9203_v45 = vpack.c.bf16 %v9491_v9, %v9490_v52 }
0x238a   :  { %v9705_v63 = vpop.eup %9704  ;;  %v4334_v10 = vmul.f32 %v9703_v18, %v9699_v61  ;;  %v4419_v2 = vpop.permute.xlu1 %4418 }
0x238b   :  { %v4333_v50 = vmul.f32 %v9705_v63, %v9701_v25 }
0x238d   :  { %8581 = vmatprep.mubr.msk.f32.mxu1 %vm31_vm0, %v4333_v50 }
0x238e   :  { %8582 = vmatmul.mubr.msk.f32.vlgmr.msra.gmra.mrb[66].mxu1 %vm31_vm0, %v4334_v10  ;;  %v4623_v61 = vpop.permute.xlu1 %4622 }
0x238f   :  { %9198 = vmatpush3.bf16.xpose.msk.msra.mxu1 %vm10444_vm4, %v9193_v11  ;;  %8588 = vmatprep.mubr.msk.f32.mxu1 %vm31_vm0, %v4417_v1 }
0x2390   :  { %9205 = vmatprep.subr.msk.bf16.mxu1 %vm10444_vm4, %v9203_v45 }
0x2396   :  { %8589 = vmatmul.mubr.msk.f32.vlgmr.msra.gmra.mrb[68].mxu1 %vm31_vm0, %v4419_v2 }
0x2397   :  { %9208 = vmatpush3.bf16.xpose.msk.msra.mxu1 %vm10444_vm4, %v9203_v45  ;;  %8602 = vmatprep.mubr.msk.f32.mxu1 %vm31_vm0, %v4621_v35 }
0x239e   :  { %8603 = vmatmul.mubr.msk.f32.vlgmr.msra.gmra.mrb[70].mxu1 %vm31_vm0, %v4623_v61 }
0x2461   :  { %v11186_v25 = vpop.f32.mrb[66].mxu1 }
0x2462   :  { %v11188_v23 = vpop.f32.mrb[67].mxu1 }
0x2469   :  { %v8590_v1 = vpop.f32.mrb[68].mxu1 }
0x246a   :  { %v4508_v48 = vmul.f32 0.25, %v8590_v1  ;;  %v4498_v8 = vpop.f32.mrb[69].mxu1 }
0x246b   :  { %v4507_v24 = vmul.f32 0.25, %v4498_v8 }
0x246c   :  { %v4512_v11 = vsel %vm31_vm0, %v4508_v48, -inf }
0x246d   :  { %4513 = vmax.xlane.f32.xlu1 %v4512_v11  ;;  %v4509_v42 = vsel %vm31_vm0, %v4507_v24, -inf }
0x246e   :  { %4510 = vmax.xlane.f32.xlu0 %v4509_v42 }
0x2471   :  { %v8604_v18 = vpop.f32.mrb[70].mxu1 }
0x2472   :  { %v4702_v63 = vpop.f32.mrb[71].mxu1  ;;  %v4712_v52 = vmul.f32 0.25, %v8604_v18 }
0x2473   :  { %v4711_v9 = vmul.f32 0.25, %v4702_v63 }
0x2474   :  { %v4716_v10 = vsel %vm31_vm0, %v4712_v52, -inf }
0x2475   :  { %v4713_v50 = vsel %vm31_vm0, %v4711_v9, -inf }
0x2476   :  { %4714 = vmax.xlane.f32.xlu0 %v4713_v50 }
0x247a   :  { %4717 = vmax.xlane.f32.xlu0 %v4716_v10 }
0x24fa   :  { %v4514_v45 = vpop.xlane.xlu1 %4513 }
0x24fb   :  { %v4516_v2 = vsub.f32 %v4508_v48, %v4514_v45  ;;  %v4511_v35 = vpop.xlane.xlu0 %4510 }
0x24fc   :  { %v4515_v61 = vsub.f32 %v4507_v24, %v4511_v35 }
0x24fd   :  { %v4519_v1 = vmul.f32 1.442695, %v4516_v2 }
0x24fe   :  { %v4517_v8 = vmul.f32 1.442695, %v4515_v61 }
0x24ff   :  { %9706 = vpow2.f32 %v4519_v1 }
0x2500   :  { %9708 = vpow2.f32 %v4517_v8 }
0x2503   :  { %v4715_v11 = vpop.xlane.xlu0 %4714 }
0x2504   :  { %v4719_v42 = vsub.f32 %v4711_v9, %v4715_v11 }
0x2506   :  { %v4721_v44 = vmul.f32 1.442695, %v4719_v42 }
0x2507   :  { %v4718_v56 = vpop.xlane.xlu0 %4717 }
0x2508   :  { %9710 = vpow2.f32 %v4721_v44  ;;  %v4720_v18 = vsub.f32 %v4712_v52, %v4718_v56 }
0x2509   :  { %v9707_v63 = vpop.eup %9706 }
0x250a   :  { %v9709_v6 = vpop.eup %9708  ;;  %v4723_v50 = vmul.f32 1.442695, %v4720_v18  ;;  %v4524_v60 = vsel %vm31_vm0, %v9707_v63, 0.0 }
0x250b   :  { %4525 = vadd.xlane.f32.xlu1 %v4524_v60  ;;  %v4521_v48 = vsel %vm31_vm0, %v9709_v6, 0.0 }
0x250c   :  { %9712 = vpow2.f32 %v4723_v50  ;;  %4522 = vadd.xlane.f32.xlu0 %v4521_v48 }
0x2512   :  { %v9711_v24 = vpop.eup %9710 }
0x2513   :  { %v4725_v10 = vsel %vm31_vm0, %v9711_v24, 0.0 }
0x2514   :  { %4726 = vadd.xlane.f32.xlu0 %v4725_v10 }
0x2516   :  { %v9713_v45 = vpop.eup %9712 }
0x2517   :  { %v4728_v9 = vsel %vm31_vm0, %v9713_v45, 0.0 }
0x2518   :  { %4729 = vadd.xlane.f32.xlu1 %v4728_v9 }
0x2529   :  { %9498 = vrot.lane.b32.xlu1 %v11128_v14, %s9824_s28 }
0x252a   :  { %9493 = vrot.lane.b32.xlu0 %v11128_v14, %s9823_s25 }
0x252d   :  { %9503 = vrot.lane.b32.xlu1 %v11141_v30, %s9825_s29 }
0x252e   :  { %4824 = vrot.lane.b32.xlu0 %v11152_v32, %s9825_s29 }
0x2531   :  { %4822 = vrot.lane.b32.xlu1 %v11124_v58, %s9825_s29 }
0x2598   :  { %v4526_v44 = vpop.xlane.xlu1 %4525 }
0x2599   :  { %v4523_v56 = vpop.xlane.xlu0 %4522 }
0x259a   :  { %9714 = vrcp.f32 %v4523_v56 }
0x259b   :  { %9716 = vrcp.f32 %v4526_v44 }
0x25a1   :  { %v4727_v60 = vpop.xlane.xlu0 %4726 }
0x25a2   :  { %9718 = vrcp.f32 %v4727_v60 }
0x25a4   :  { %v9715_v52 = vpop.eup %9714 }
0x25a5   :  { %v4730_v2 = vpop.xlane.xlu1 %4729  ;;  %v9494_v35 = vpop.permute.xlu0 %9493  ;;  %v4529_v61 = vmul.f32 %v9715_v52, %v9709_v6 }
0x25a6   :  { %9720 = vrcp.f32 %v4730_v2  ;;  %v9496_v1 = vunpack.i.h.bf16 %v9494_v35  ;;  %v9495_v8 = vunpack.i.l.bf16 %v9494_v35  ;;  %v9717_v32 = vpop.eup %9716 }
0x25a7   :  { %8595 = vmatprep.mubr.msk.f32.mxu0 %vm31_vm0, %v4529_v61  ;;  %v4530_v50 = vmul.f32 %v9717_v32, %v9707_v63 }
0x25a8   :  { %v9199_v30 = vpack.c.bf16 %v9496_v1, %v9495_v8 }
0x25a9   :  { %v9499_v11 = vpop.permute.xlu1 %9498  ;;  %v4825_v63 = vpop.permute.xlu0 %4824 }
0x25aa   :  { %v9501_v42 = vunpack.i.h.bf16 %v9499_v11  ;;  %v9500_v58 = vunpack.i.l.bf16 %v9499_v11  ;;  %9200 = vmatprep.subr.bf16.mxu0 %v9199_v30 }
0x25ab   :  { %9202 = vmatpush3.bf16.msra.mxu0 %v9199_v30 }
0x25ac   :  { %v9719_v18 = vpop.eup %9718  ;;  %v9209_v48 = vpack.c.bf16 %v9501_v42, %v9500_v58 }
0x25ad   :  { %v9504_v10 = vpop.permute.xlu1 %9503  ;;  %v4733_v9 = vmul.f32 %v9719_v18, %v9711_v24 }
0x25ae   :  { %v9506_v56 = vunpack.i.h.bf16 %v9504_v10  ;;  %v9505_v44 = vunpack.i.l.bf16 %v9504_v10  ;;  %8596 = vmatmul.mubr.msk.f32.vlgmr.msra.gmra.mrb[52].mxu0 %vm31_vm0, %v4530_v50  ;;  %9210 = vmatprep.subr.bf16.mxu0 %v9209_v48 }
0x25af   :  { %9212 = vmatpush3.bf16.msra.mxu0 %v9209_v48  ;;  %8609 = vmatprep.mubr.msk.f32.mxu0 %vm31_vm0, %v4733_v9 }
0x25b0   :  { %v9721_v6 = vpop.eup %9720  ;;  %v9213_v60 = vpack.c.bf16 %v9506_v56, %v9505_v44 }
0x25b1   :  { %v4734_v52 = vmul.f32 %v9721_v6, %v9713_v45  ;;  %v4823_v2 = vpop.permute.xlu1 %4822 }
0x25b2   :  { %9215 = vmatprep.subr.msk.bf16.mxu0 %vm10444_vm4, %v9213_v60 }
0x25b3   :  { %8610 = vmatmul.mubr.msk.f32.vlgmr.msra.gmra.mrb[54].mxu0 %vm31_vm0, %v4734_v52 }
0x25b4   :  { %8616 = vmatprep.mubr.msk.f32.mxu0 %vm31_vm0, %v4823_v2 }
0x25b8   :  { %9218 = vmatpush3.bf16.xpose.msk.msra.mxu0 %vm10444_vm4, %v9213_v60 }
0x25b9   :  { %9230 = vmatprep.subr.bf16.mxu0 %v11134_v47 }
0x25bf   :  { %8617 = vmatmul.mubr.msk.f32.vlgmr.msra.gmra.mrb[56].mxu0 %vm31_vm0, %v4825_v63 }
0x25c0   :  { %9232 = vmatpush3.bf16.msra.mxu0 %v11134_v47  ;;  %v11236_v47 = vadd.f32 %v11121_v37, %v11130_v38 }
0x2681   :  { %v11220_v24 = vpop.f32.mrb[52].mxu0 }
0x2682   :  { %v11222_v45 = vpop.f32.mrb[53].mxu0 }
0x2686   :  { %v11224_v35 = vpop.f32.mrb[54].mxu0 }
0x2687   :  { %v11226_v61 = vpop.f32.mrb[55].mxu0 }
0x2692   :  { %v8618_v1 = vpop.f32.mrb[56].mxu0 }
0x2693   :  { %v4914_v8 = vmul.f32 0.25, %v8618_v1  ;;  %v4904_v30 = vpop.f32.mrb[57].mxu0 }
0x2694   :  { %v4913_v32 = vmul.f32 0.25, %v4904_v30 }
0x2695   :  { %v4918_v11 = vsel %vm31_vm0, %v4914_v8, -inf }
0x2696   :  { %4919 = vmax.xlane.f32.xlu0 %v4918_v11  ;;  %v4915_v42 = vsel %vm31_vm0, %v4913_v32, -inf }
0x2697   :  { %4916 = vmax.xlane.f32.xlu1 %v4915_v42 }
0x26a8   :  { %9508 = vrot.lane.b32.xlu1 %v11128_v14, %s9825_s29 }
0x26ac   :  { %9513 = vrot.lane.b32.xlu1 %v11147_v57, %s9823_s25 }
0x26b0   :  { %5248 = vrot.lane.b32.xlu1 %v11236_v47, %s9823_s25 }
0x2723   :  { %v4920_v58 = vpop.xlane.xlu0 %4919 }
0x2724   :  { %v4922_v18 = vsub.f32 %v4914_v8, %v4920_v58  ;;  %v4917_v50 = vpop.xlane.xlu1 %4916 }
0x2725   :  { %v4921_v48 = vsub.f32 %v4913_v32, %v4917_v50 }
0x2726   :  { %v4925_v10 = vmul.f32 1.442695, %v4922_v18 }
0x2727   :  { %v4923_v9 = vmul.f32 1.442695, %v4921_v48  ;;  %v11250_v48 = vadd.f32 %v11121_v37, %v11132_v28 }
0x2728   :  { %v9509_v56 = vpop.permute.xlu1 %9508 }
0x2729   :  { %9722 = vpow2.f32 %v4923_v9  ;;  %v9511_v44 = vunpack.i.h.bf16 %v9509_v56  ;;  %v9510_v14 = vunpack.i.l.bf16 %v9509_v56 }
0x272a   :  { %9724 = vpow2.f32 %v4925_v10 }
0x272b   :  { %v9219_v6 = vpack.c.bf16 %v9511_v44, %v9510_v14 }
0x272c   :  { %v9514_v60 = vpop.permute.xlu1 %9513 }
0x272d   :  { %v9516_v52 = vunpack.i.h.bf16 %v9514_v60  ;;  %v9515_v2 = vunpack.i.l.bf16 %v9514_v60  ;;  %9220 = vmatprep.subr.bf16.mxu1 %v9219_v6 }
0x272e   :  { %9222 = vmatpush3.bf16.msra.mxu1 %v9219_v6 }
0x272f   :  { %v9233_v38 = vpack.c.bf16 %v9516_v52, %v9515_v2  ;;  %9225 = vmatprep.subr.msk.bf16.mxu1 %vm10444_vm4, %v11149_v26 }
0x2731   :  { %9235 = vmatprep.subr.msk.bf16.mxu0 %vm10444_vm4, %v9233_v38 }
0x2733   :  { %v9723_v63 = vpop.eup %9722 }
0x2734   :  { %v4927_v1 = vsel %vm31_vm0, %v9723_v63, 0.0  ;;  %v9725_v8 = vpop.eup %9724 }
0x2735   :  { %4928 = vadd.xlane.f32.xlu0 %v4927_v1  ;;  %v4930_v30 = vsel %vm31_vm0, %v9725_v8, 0.0 }
0x2739   :  { %4931 = vadd.xlane.f32.xlu0 %v4930_v30 }
0x27c2   :  { %v4929_v32 = vpop.xlane.xlu0 %4928 }
0x27c3   :  { %9726 = vrcp.f32 %v4929_v32 }
0x27c6   :  { %v4932_v11 = vpop.xlane.xlu0 %4931 }
0x27c7   :  { %9728 = vrcp.f32 %v4932_v11 }
0x27cd   :  { %v9727_v42 = vpop.eup %9726 }
0x27ce   :  { %v4935_v58 = vmul.f32 %v9727_v42, %v9723_v63 }
0x27d0   :  { %8623 = vmatprep.mubr.msk.f32.mxu1 %vm31_vm0, %v4935_v58 }
0x27d1   :  { %v9729_v18 = vpop.eup %9728 }
0x27d2   :  { %v4936_v50 = vmul.f32 %v9729_v18, %v9725_v8 }
0x27d4   :  { %8624 = vmatmul.mubr.msk.f32.vlgmr.msra.gmra.mrb[72].mxu1 %vm31_vm0, %v4936_v50 }
0x27d5   :  { %9228 = vmatpush3.bf16.xpose.msk.msra.mxu1 %vm10444_vm4, %v11149_v26  ;;  %8630 = vmatprep.mubr.msk.f32.mxu1 %vm31_vm0, %v11250_v48 }
0x27dc   :  { %8631 = vmatmul.mubr.msk.f32.vlgmr.msra.gmra.mrb[74].mxu1 %vm31_vm0, %v11236_v47 }
0x28a7   :  { %v11260_v10 = vpop.f32.mrb[72].mxu1 }
0x28a8   :  { %v11262_v9 = vpop.f32.mrb[73].mxu1 }
0x28af   :  { %v8632_v56 = vpop.f32.mrb[74].mxu1 }
0x28b0   :  { %v5132_v44 = vpop.f32.mrb[75].mxu1  ;;  %v5142_v28 = vmul.f32 0.25, %v8632_v56 }
0x28b1   :  { %v5141_v37 = vmul.f32 0.25, %v5132_v44 }
0x28b2   :  { %v5146_v6 = vsel %vm31_vm0, %v5142_v28, -inf }
0x28b3   :  { %v5143_v14 = vsel %vm31_vm0, %v5141_v37, -inf }
0x28b4   :  { %5144 = vmax.xlane.f32.xlu0 %v5143_v14 }
0x28b8   :  { %5147 = vmax.xlane.f32.xlu0 %v5146_v6 }
0x2941   :  { %v5145_v26 = vpop.xlane.xlu0 %5144 }
0x2942   :  { %v5149_v60 = vsub.f32 %v5141_v37, %v5145_v26 }
0x2944   :  { %v5151_v52 = vmul.f32 1.442695, %v5149_v60 }
0x2945   :  { %v5148_v2 = vpop.xlane.xlu0 %5147 }
0x2946   :  { %9730 = vpow2.f32 %v5151_v52  ;;  %v5150_v63 = vsub.f32 %v5142_v28, %v5148_v2  ;;  %v5249_v28 = vpop.permute.xlu1 %5248 }
0x2948   :  { %v5153_v1 = vmul.f32 1.442695, %v5150_v63 }
0x294a   :  { %9732 = vpow2.f32 %v5153_v1 }
0x2950   :  { %v9731_v8 = vpop.eup %9730 }
0x2951   :  { %v5155_v30 = vsel %vm31_vm0, %v9731_v8, 0.0 }
0x2952   :  { %5156 = vadd.xlane.f32.xlu0 %v5155_v30 }
0x2954   :  { %v9733_v32 = vpop.eup %9732 }
0x2955   :  { %v5158_v11 = vsel %vm31_vm0, %v9733_v32, 0.0 }
0x2956   :  { %5159 = vadd.xlane.f32.xlu0 %v5158_v11 }
0x296c   :  { %5246 = vrot.lane.b32.xlu0 %v11250_v48, %s9823_s25 }
0x29df   :  { %v5157_v42 = vpop.xlane.xlu0 %5156 }
0x29e0   :  { %9734 = vrcp.f32 %v5157_v42 }
0x29e3   :  { %v5160_v58 = vpop.xlane.xlu0 %5159 }
0x29e4   :  { %9736 = vrcp.f32 %v5160_v58 }
0x29e7   :  { %v5247_v37 = vpop.permute.xlu0 %5246 }
0x29ea   :  { %v9735_v18 = vpop.eup %9734 }
0x29eb   :  { %v5163_v50 = vmul.f32 %v9735_v18, %v9731_v8 }
0x29ed   :  { %8637 = vmatprep.mubr.msk.f32.mxu0 %vm31_vm0, %v5163_v50 }
0x29ee   :  { %v9737_v56 = vpop.eup %9736 }
0x29ef   :  { %v5164_v44 = vmul.f32 %v9737_v56, %v9733_v32 }
0x29f1   :  { %8638 = vmatmul.mubr.msk.f32.vlgmr.msra.gmra.mrb[58].mxu0 %vm31_vm0, %v5164_v44 }
0x29f2   :  { %9238 = vmatpush3.bf16.xpose.msk.msra.mxu0 %vm10444_vm4, %v9233_v38  ;;  %8644 = vmatprep.mubr.msk.f32.mxu0 %vm31_vm0, %v5247_v37 }
0x29f9   :  { %8645 = vmatmul.mubr.msk.f32.vlgmr.msra.gmra.mrb[60].mxu0 %vm31_vm0, %v5249_v28 }
0x2ac4   :  { %v11276_v14 = vpop.f32.mrb[58].mxu0 }
0x2ac5   :  { %v11278_v6 = vpop.f32.mrb[59].mxu0 }
0x2acc   :  { %v8646_v26 = vpop.f32.mrb[60].mxu0 }
0x2acd   :  { %v5338_v60 = vmul.f32 0.25, %v8646_v26  ;;  %v5328_v52 = vpop.f32.mrb[61].mxu0 }
0x2ace   :  { %v5337_v2 = vmul.f32 0.25, %v5328_v52 }
0x2acf   :  { %v5342_v63 = vsel %vm31_vm0, %v5338_v60, -inf }
0x2ad0   :  { %5343 = vmax.xlane.f32.xlu0 %v5342_v63  ;;  %v5339_v1 = vsel %vm31_vm0, %v5337_v2, -inf }
0x2ad1   :  { %5340 = vmax.xlane.f32.xlu1 %v5339_v1 }
0x2ae2   :  { %9518 = vrot.lane.b32.xlu1 %v11136_v31, %s9823_s25 }
0x2ae6   :  { %9523 = vrot.lane.b32.xlu0 %v11147_v57, %s9824_s28  ;;  %5450 = vrot.lane.b32.xlu1 %v11250_v48, %s9824_s28 }
0x2b5d   :  { %v5344_v38 = vpop.xlane.xlu0 %5343 }
0x2b5e   :  { %v5346_v8 = vsub.f32 %v5338_v60, %v5344_v38  ;;  %v5341_v30 = vpop.xlane.xlu1 %5340 }
0x2b5f   :  { %v5345_v32 = vsub.f32 %v5337_v2, %v5341_v30 }
0x2b60   :  { %v5349_v11 = vmul.f32 1.442695, %v5346_v8 }
0x2b61   :  { %v5347_v42 = vmul.f32 1.442695, %v5345_v32  ;;  %v9524_v58 = vpop.permute.xlu0 %9523 }
0x2b62   :  { %9738 = vpow2.f32 %v5349_v11  ;;  %v9519_v18 = vpop.permute.xlu1 %9518  ;;  %v9526_v50 = vunpack.i.h.bf16 %v9524_v58  ;;  %v9525_v56 = vunpack.i.l.bf16 %v9524_v58 }
0x2b63   :  { %v9521_v44 = vunpack.i.h.bf16 %v9519_v18  ;;  %v9520_v37 = vunpack.i.l.bf16 %v9519_v18  ;;  %9740 = vpow2.f32 %v5347_v42 }
0x2b64   :  { %v9243_v26 = vpack.c.bf16 %v9526_v50, %v9525_v56 }
0x2b65   :  { %v9239_v28 = vpack.c.bf16 %v9521_v44, %v9520_v37 }
0x2b66   :  { %v5451_v1 = vpop.permute.xlu1 %5450 }
0x2b67   :  { %9240 = vmatprep.subr.bf16.mxu1 %v9239_v28 }
0x2b68   :  { %9242 = vmatpush3.bf16.msra.mxu1 %v9239_v28 }
0x2b69   :  { %9245 = vmatprep.subr.msk.bf16.mxu1 %vm10444_vm4, %v9243_v26 }
0x2b6c   :  { %v9739_v60 = vpop.eup %9738 }
0x2b6d   :  { %v5354_v52 = vsel %vm31_vm0, %v9739_v60, 0.0  ;;  %v9741_v2 = vpop.eup %9740 }
0x2b6e   :  { %5355 = vadd.xlane.f32.xlu1 %v5354_v52  ;;  %v5351_v63 = vsel %vm31_vm0, %v9741_v2, 0.0 }
0x2b72   :  { %5352 = vadd.xlane.f32.xlu1 %v5351_v63 }
0x2b83   :  { %5452 = vrot.lane.b32.xlu1 %v11236_v47, %s9824_s28 }
0x2bfb   :  { %v5356_v38 = vpop.xlane.xlu1 %5355 }
0x2bfc   :  { %9742 = vrcp.f32 %v5356_v38 }
0x2bff   :  { %v5353_v8 = vpop.xlane.xlu1 %5352 }
0x2c00   :  { %9744 = vrcp.f32 %v5353_v8 }
0x2c03   :  { %v5453_v58 = vpop.permute.xlu1 %5452 }
0x2c06   :  { %v9743_v30 = vpop.eup %9742 }
0x2c07   :  { %v5360_v42 = vmul.f32 %v9743_v30, %v9739_v60 }
0x2c0a   :  { %v9745_v32 = vpop.eup %9744 }
0x2c0b   :  { %v5359_v11 = vmul.f32 %v9745_v32, %v9741_v2 }
0x2c0d   :  { %8651 = vmatprep.mubr.msk.f32.mxu1 %vm31_vm0, %v5359_v11 }
0x2c0e   :  { %8652 = vmatmul.mubr.msk.f32.vlgmr.msra.gmra.mrb[76].mxu1 %vm31_vm0, %v5360_v42 }
0x2c0f   :  { %9248 = vmatpush3.bf16.xpose.msk.msra.mxu1 %vm10444_vm4, %v9243_v26  ;;  %8658 = vmatprep.mubr.msk.f32.mxu1 %vm31_vm0, %v5451_v1 }
0x2c16   :  { %8659 = vmatmul.mubr.msk.f32.vlgmr.msra.gmra.mrb[78].mxu1 %vm31_vm0, %v5453_v58 }
0x2ce1   :  { %v11300_v18 = vpop.f32.mrb[76].mxu1 }
0x2ce2   :  { %v11302_v50 = vpop.f32.mrb[77].mxu1 }
0x2ce9   :  { %v8660_v56 = vpop.f32.mrb[78].mxu1 }
0x2cea   :  { %v5542_v44 = vmul.f32 0.25, %v8660_v56  ;;  %v5532_v37 = vpop.f32.mrb[79].mxu1 }
0x2ceb   :  { %v5541_v28 = vmul.f32 0.25, %v5532_v37 }
0x2cec   :  { %v5546_v60 = vsel %vm31_vm0, %v5542_v44, -inf }
0x2ced   :  { %5547 = vmax.xlane.f32.xlu0 %v5546_v60  ;;  %v5543_v52 = vsel %vm31_vm0, %v5541_v28, -inf }
0x2cee   :  { %5544 = vmax.xlane.f32.xlu1 %v5543_v52 }
0x2cff   :  { %9528 = vrot.lane.b32.xlu1 %v11136_v31, %s9824_s28 }
0x2d03   :  { %5652 = vrot.lane.b32.xlu1 %v11250_v48, %s9825_s29 }
0x2d07   :  { %5654 = vrot.lane.b32.xlu1 %v11236_v47, %s9825_s29 }
0x2d7a   :  { %v5548_v26 = vpop.xlane.xlu0 %5547 }
0x2d7b   :  { %v5550_v2 = vsub.f32 %v5542_v44, %v5548_v26  ;;  %v5545_v63 = vpop.xlane.xlu1 %5544 }
0x2d7c   :  { %v5549_v1 = vsub.f32 %v5541_v28, %v5545_v63 }
0x2d7d   :  { %v5553_v38 = vmul.f32 1.442695, %v5550_v2 }
0x2d7e   :  { %v5551_v8 = vmul.f32 1.442695, %v5549_v1 }
0x2d7f   :  { %9746 = vpow2.f32 %v5553_v38  ;;  %v9529_v30 = vpop.permute.xlu1 %9528 }
0x2d80   :  { %v9531_v32 = vunpack.i.h.bf16 %v9529_v30  ;;  %v9530_v11 = vunpack.i.l.bf16 %v9529_v30  ;;  %9748 = vpow2.f32 %v5551_v8  ;;  %v11775_v30 = vmov 0.0  }
0x2d82   :  { %v9249_v42 = vpack.c.bf16 %v9531_v32, %v9530_v11 }
0x2d83   :  { %v5653_v8 = vpop.permute.xlu1 %5652 }
0x2d84   :  { %9250 = vmatprep.subr.bf16.mxu0 %v9249_v42 }
0x2d85   :  { %9252 = vmatpush3.bf16.msra.mxu0 %v9249_v42 }
0x2d89   :  { %v9747_v58 = vpop.eup %9746 }
0x2d8a   :  { %v5558_v48 = vsel %vm31_vm0, %v9747_v58, 0.0  ;;  %v9749_v56 = vpop.eup %9748 }
0x2d8b   :  { %5559 = vadd.xlane.f32.xlu0 %v5558_v48  ;;  %v5555_v47 = vsel %vm31_vm0, %v9749_v56, 0.0 }
0x2d8f   :  { %5556 = vadd.xlane.f32.xlu0 %v5555_v47 }
0x2da5   :  { %9533 = vrot.lane.b32.xlu0 %v11147_v57, %s9825_s29  ;;  %v5655_v57 = vpop.permute.xlu1 %5654 }
0x2e18   :  { %v5560_v44 = vpop.xlane.xlu0 %5559 }
0x2e19   :  { %9750 = vrcp.f32 %v5560_v44 }
0x2e1c   :  { %v5557_v37 = vpop.xlane.xlu0 %5556 }
0x2e1d   :  { %9752 = vrcp.f32 %v5557_v37 }
0x2e20   :  { %v9534_v28 = vpop.permute.xlu0 %9533 }
0x2e21   :  { %v9536_v60 = vunpack.i.h.bf16 %v9534_v28  ;;  %v9535_v52 = vunpack.i.l.bf16 %v9534_v28 }
0x2e23   :  { %v9253_v26 = vpack.c.bf16 %v9536_v60, %v9535_v52  ;;  %v9751_v2 = vpop.eup %9750 }
0x2e24   :  { %v5564_v38 = vmul.f32 %v9751_v2, %v9747_v58 }
0x2e25   :  { %9255 = vmatprep.subr.msk.bf16.mxu0 %vm10444_vm4, %v9253_v26 }
0x2e27   :  { %v9753_v63 = vpop.eup %9752 }
0x2e28   :  { %v5563_v1 = vmul.f32 %v9753_v63, %v9749_v56 }
0x2e2a   :  { %8665 = vmatprep.mubr.msk.f32.mxu0 %vm31_vm0, %v5563_v1 }
0x2e2b   :  { %8666 = vmatmul.mubr.msk.f32.vlgmr.msra.gmra.mrb[62].mxu0 %vm31_vm0, %v5564_v38 }
0x2e2c   :  { %9258 = vmatpush3.bf16.xpose.msk.msra.mxu0 %vm10444_vm4, %v9253_v26  ;;  %8672 = vmatprep.mubr.msk.f32.mxu0 %vm31_vm0, %v5653_v8 }
0x2e2d   :  { %9280 = vmatprep.subr.bf16.mxu0 %v10775_v4 }
0x2e33   :  { %8673 = vmatmul.mubr.msk.f32.vlgmr.msra.gmra.mrb[64].mxu0 %vm31_vm0, %v5655_v57 }
0x2e34   :  { %9282 = vmatpush1.bf16.msra.mxu0 %v10783_v39  ;;  %6121 = vmatprep.mubr.f32.mxu0 %v11775_v30 }
0x2e35   :  { %9284 = vmatprep.subr.bf16.mxu0 %v10793_v12 }
0x2e38   :  { %9286 = vmatpush1.bf16.msra.mxu0 %v10801_v19 }
0x2e39   :  { %9288 = vmatprep.subr.bf16.mxu0 %v10811_v21 }
0x2e3c   :  { %9290 = vmatpush1.bf16.msra.mxu0 %v10819_v0 }
0x2e3d   :  { %9292 = vmatprep.subr.bf16.mxu0 %v10832_v33 }
0x2e40   :  { %9294 = vmatpush1.bf16.msra.mxu0 %v10838_v13 }
0x2efe   :  { %v8667_v20 = vpop.f32.mrb[62].mxu0 }
0x2eff   :  { %v5643_v4 = vpop.f32.mrb[63].mxu0 }
0x2f06   :  { %v8674_v32 = vpop.f32.mrb[64].mxu0 }
0x2f07   :  { %v5744_v11 = vmul.f32 0.25, %v8674_v32  ;;  %v5734_v42 = vpop.f32.mrb[65].mxu0 }
0x2f08   :  { %v5743_v39 = vmul.f32 0.25, %v5734_v42 }
0x2f09   :  { %v5748_v58 = vsel %vm31_vm0, %v5744_v11, -inf }
0x2f0a   :  { %5749 = vmax.xlane.f32.xlu0 %v5748_v58  ;;  %v5745_v12 = vsel %vm31_vm0, %v5743_v39, -inf }
0x2f0b   :  { %5746 = vmax.xlane.f32.xlu1 %v5745_v12 }
0x2f1c   :  { %9538 = vrot.lane.b32.xlu1 %v11136_v31, %s9825_s29 }
0x2f20   :  { %5028 = vrot.lane.b32.xlu1 %v11220_v24, %s9826_s30 }
0x2f24   :  { %5034 = vrot.lane.b32.xlu1 %v11226_v61, %s9827_s5 }
0x2f28   :  { %5036 = vrot.lane.b32.xlu1 %v11224_v35, %s9827_s5 }
0x2f2c   :  { %5044 = vrot.lane.b32.xlu1 %v11260_v10, %s9828_s6 }
0x2f30   :  { %5858 = vrot.lane.b32.xlu1 %v11300_v18, %s9826_s30 }
0x2f34   :  { %5866 = vrot.lane.b32.xlu1 %v8667_v20, %s9827_s5 }
0x2f97   :  { %v5750_v19 = vpop.xlane.xlu0 %5749 }
0x2f98   :  { %v5752_v21 = vsub.f32 %v5744_v11, %v5750_v19  ;;  %v5747_v0 = vpop.xlane.xlu1 %5746 }
0x2f99   :  { %v5751_v33 = vsub.f32 %v5743_v39, %v5747_v0 }
0x2f9a   :  { %v5755_v13 = vmul.f32 1.442695, %v5752_v21 }
0x2f9b   :  { %v5753_v31 = vmul.f32 1.442695, %v5751_v33 }
0x2f9c   :  { %v9539_v24 = vpop.permute.xlu1 %9538 }
0x2f9d   :  { %9754 = vpow2.f32 %v5753_v31  ;;  %v9541_v61 = vunpack.i.h.bf16 %v9539_v24  ;;  %v9540_v48 = vunpack.i.l.bf16 %v9539_v24 }
0x2f9e   :  { %9756 = vpow2.f32 %v5755_v13 }
0x2f9f   :  { %v9259_v35 = vpack.c.bf16 %v9541_v61, %v9540_v48 }
0x2fa0   :  { %v5029_v60 = vpop.permute.xlu1 %5028 }
0x2fa1   :  { %9260 = vmatprep.subr.bf16.mxu1 %v9259_v35  ;;  %v5049_v57 = vsel %vm31_vm0, %v11186_v25, %v5029_v60 }
0x2fa2   :  { %9262 = vmatpush3.bf16.msra.mxu1 %v9259_v35 }
0x2fa3   :  { %9264 = vmatprep.subr.bf16.mxu1 %v10671_v49 }
0x2fa4   :  { %v5035_v63 = vpop.permute.xlu1 %5034 }
0x2fa7   :  { %v9755_v10 = vpop.eup %9754 }
0x2fa8   :  { %v5757_v18 = vsel %vm31_vm0, %v9755_v10, 0.0  ;;  %v9757_v56 = vpop.eup %9756 }
0x2fa9   :  { %5758 = vadd.xlane.f32.xlu0 %v5757_v18  ;;  %v5760_v47 = vsel %vm31_vm0, %v9757_v56, 0.0 }
0x2fad   :  { %5761 = vadd.xlane.f32.xlu0 %v5760_v47 }
0x2fc3   :  { %5026 = vrot.lane.b32.xlu0 %v11222_v45, %s9826_s30 }
0x2fc7   :  { %5042 = vrot.lane.b32.xlu0 %v11262_v9, %s9828_s6 }
0x2fcb   :  { %5856 = vrot.lane.b32.xlu0 %v11302_v50, %s9826_s30 }
0x2fcf   :  { %5864 = vrot.lane.b32.xlu0 %v5643_v4, %s9827_s5 }
0x3036   :  { %v5759_v44 = vpop.xlane.xlu0 %5758 }
0x3037   :  { %9758 = vrcp.f32 %v5759_v44  ;;  %v11777_v44 = vld [vmem:[#allocation4_spill] sm:$0xff] }
0x303a   :  { %v5762_v37 = vpop.xlane.xlu0 %5761 }
0x303b   :  { %9760 = vrcp.f32 %v5762_v37 }
0x303e   :  { %v5027_v28 = vpop.permute.xlu0 %5026 }
0x303f   :  { %v5048_v2 = vsel %vm31_vm0, %v11188_v23, %v5027_v28  ;;  %v5037_v23 = vpop.permute.xlu1 %5036 }
0x3040   :  { %v5050_v50 = vsel %vm650_vm3, %v5048_v2, %v5035_v63  ;;  %v11435_v2 = vld [vmem:[%s11755_s2 + $0x2c0] ss:$0 sm:$0xff]  ;;  %v11441_v63 = vld [vmem:[%s11755_s2 + $0x2c8] ss:$0 sm:$0xff] }
0x3041   :  { %v9759_v52 = vpop.eup %9758 }
0x3042   :  { %v5765_v26 = vmul.f32 %v9759_v52, %v9755_v10  ;;  %v5043_v9 = vpop.permute.xlu0 %5042 }
0x3043   :  { %v5052_v38 = vsel %vm2584_vm5, %v5050_v50, %v5043_v9  ;;  %v5045_v8 = vpop.permute.xlu1 %5044 }
0x3044   :  { %8679 = vmatprep.mubr.msk.f32.mxu1 %vm31_vm0, %v5765_v26 }
0x3045   :  { %v9761_v45 = vpop.eup %9760 }
0x3046   :  { %v5766_v1 = vmul.f32 %v9761_v45, %v9757_v56  ;;  %v11776_v56 = vld [vmem:[#allocation5_spill] sm:$0xff] }
0x3048   :  { %8680 = vmatmul.mubr.msk.f32.vlgmr.msra.gmra.mrb[80].mxu1 %vm31_vm0, %v5766_v1 }
0x3049   :  { %9266 = vmatpush3.bf16.msra.mxu1 %v10671_v49  ;;  %8698 = vmatprep.mubr.msk.f32.mxu1 %vm163_vm1, %v5052_v38  ;;  %v5051_v49 = vsel %vm650_vm3, %v5049_v57, %v5037_v23 }
0x304a   :  { %9268 = vmatprep.subr.bf16.mxu1 %v10688_v17  ;;  %v5053_v20 = vsel %vm2584_vm5, %v5051_v49, %v5045_v8 }
0x304d   :  { %9270 = vmatpush3.bf16.msra.mxu1 %v10688_v17 }
0x304e   :  { %9272 = vmatprep.subr.bf16.mxu1 %v10702_v29 }
0x3051   :  { %9274 = vmatpush3.bf16.msra.mxu1 %v10702_v29 }
0x3052   :  { %9276 = vmatprep.subr.bf16.mxu1 %v10712_v3 }
0x3055   :  { %9278 = vmatpush3.bf16.msra.mxu1 %v10712_v3 }
0x3056   :  { %9296 = vmatprep.subr.bf16.mxu1 %v10892_v46 }
0x3058   :  { %8699 = vmatmul.mubr.msk.f32.vlgmr.msra.gmra.mrb[82].mxu1 %vm163_vm1, %v5053_v20 }
0x3059   :  { %9298 = vmatpush3.bf16.msra.mxu1 %v10903_v27  ;;  %v9819_v27 = vld [vmem:[%s11755_s2 + $0x2b8] ss:$0 sm:$0xff] }
0x305a   :  { %9300 = vmatprep.subr.bf16.mxu1 %v10905_v43 }
0x305d   :  { %9302 = vmatpush3.bf16.msra.mxu1 %v10921_v59 }
0x305e   :  { %9304 = vmatprep.subr.bf16.mxu1 %v10924_v16 }
0x3061   :  { %9306 = vmatpush3.bf16.msra.mxu1 %v10933_v15 }
0x3062   :  { %9308 = vmatprep.subr.bf16.mxu1 %v10943_v54 }
0x3065   :  { %9310 = vmatpush3.bf16.msra.mxu1 %v10951_v62 }
0x3066   :  { %9312 = vmatprep.subr.bf16.mxu1 %v10961_v34  ;;  %v5859_v34 = vpop.permute.xlu1 %5858 }
0x3069   :  { %9314 = vmatpush3.bf16.msra.mxu1 %v10969_v7  ;;  %v5857_v7 = vpop.permute.xlu0 %5856 }
0x306a   :  { %9316 = vmatprep.subr.bf16.mxu1 %v10979_v22  ;;  %v5867_v22 = vpop.permute.xlu1 %5866 }
0x306d   :  { %9318 = vmatpush3.bf16.msra.mxu1 %v10987_v55  ;;  %v5865_v55 = vpop.permute.xlu0 %5864 }
0x306e   :  { %9320 = vmatprep.subr.bf16.mxu1 %v10997_v5  ;;  %v5878_v5 = vsel %vm31_vm0, %v11278_v6, %v5857_v7 }
0x3071   :  { %9322 = vmatpush3.bf16.msra.mxu1 %v11005_v36 }
0x3072   :  { %9324 = vmatprep.subr.bf16.mxu1 %v11015_v40  ;;  %v5879_v40 = vsel %vm31_vm0, %v11276_v14, %v5859_v34 }
0x3075   :  { %9326 = vmatpush3.bf16.msra.mxu1 %v11023_v51  ;;  %v5880_v51 = vsel %vm650_vm3, %v5878_v5, %v5865_v55 }
0x311b   :  { %v8681_v17 = vpop.f32.mrb[80].mxu1 }
0x311c   :  { %5874 = vrot.lane.b32.xlu1 %v8681_v17, %s9828_s6  ;;  %v5845_v29 = vpop.f32.mrb[81].mxu1 }
0x311d   :  { %5872 = vrot.lane.b32.xlu0 %v5845_v29, %s9828_s6 }
0x312b   :  { %v8700_v3 = vpop.f32.mrb[82].mxu1 }
0x312c   :  { %v5962_v46 = vpop.f32.mrb[83].mxu1  ;;  %v5968_v59 = vadd.f32 %v9819_v27, %v8700_v3 }
0x312d   :  { %v5963_v43 = vadd.f32 %v9819_v27, %v5962_v46 }
0x312e   :  { %v11402_v15 = vadd.f32 %v5968_v59, %v11068_v41  ;;  %v5881_v41 = vsel %vm650_vm3, %v5879_v40, %v5867_v22  ;;  %v11457_v59 = vld [vmem:[%s11757_s1] sm:$0xff] }
0x312f   :  { %v11399_v16 = vadd.f32 %v5963_v43, %v11063_v53  ;;  %v11778_v22 = vld [vmem:[#allocation2_spill] sm:$0xff] }
0x3130   :  { %v5988_v62 = vsel %vm163_vm1, %v11402_v15, 0.0 }
0x3131   :  { %v5985_v54 = vsel %vm163_vm1, %v11399_v16, 0.0 }
0x313c   :  { %5986 = vadd.xlane.f32.xlu0 %v5985_v54  ;;  %v11462_v54 = vld [vmem:[%s11757_s1 + $0x8] sm:$0xff] }
0x313d   :  { %v6350_v34 = vsel %vm650_vm3, %v11462_v54, 0.0 }
0x3140   :  { %5989 = vadd.xlane.f32.xlu1 %v5988_v62  ;;  %v6347_v62 = vsel %vm650_vm3, %v11457_v59, 0.0 }
0x318e   :  { %v5875_v36 = vpop.permute.xlu1 %5874 }
0x318f   :  { %v5873_v53 = vpop.permute.xlu0 %5872  ;;  %v5883_v4 = vsel %vm2584_vm5, %v5881_v41, %v5875_v36  ;;  %v11779_v36 = vld [vmem:[#allocation3_spill] sm:$0xff] }
0x3190   :  { %v5882_v25 = vsel %vm2584_vm5, %v5880_v51, %v5873_v53 }
0x3191   :  { %8701 = vmatprep.mubr.msk.f32.mxu1 %vm163_vm1, %v5882_v25 }
0x3192   :  { %8702 = vmatmul.mubr.msk.f32.gmra.mrb[84].mxu1 %vm163_vm1, %v5883_v4 }
0x31c9   :  { %v5987_v32 = vpop.xlane.xlu0 %5986 }
0x31ca   :  { %v5997_v11 = vmul.f32 0.015625, %v5987_v32 }
0x31cc   :  { %v6001_v6 = vsub.f32 %v11399_v16, %v5997_v11 }
0x31cd   :  { %v5990_v42 = vpop.xlane.xlu1 %5989 }
0x31ce   :  { %v5998_v39 = vmul.f32 0.015625, %v5990_v42  ;;  %v6005_v14 = vmul.f32 %v6001_v6, %v6001_v6 }
0x31d0   :  { %v6002_v58 = vsub.f32 %v11402_v15, %v5998_v39  ;;  %v6009_v12 = vsel %vm163_vm1, %v6005_v14, 0.0 }
0x31d1   :  { %6010 = vadd.xlane.f32.xlu0 %v6009_v12 }
0x31d2   :  { %v6006_v19 = vmul.f32 %v6002_v58, %v6002_v58 }
0x31d4   :  { %v6012_v21 = vsel %vm163_vm1, %v6006_v19, 0.0 }
0x31d5   :  { %6013 = vadd.xlane.f32.xlu0 %v6012_v21 }
0x325e   :  { %v6011_v0 = vpop.xlane.xlu0 %6010 }
0x325f   :  { %v6021_v33 = vmul.f32 0.015625, %v6011_v0 }
0x3261   :  { %v6025_v13 = vadd.f32 1e-05, %v6021_v33 }
0x3262   :  { %v6014_v31 = vpop.xlane.xlu0 %6013 }
0x3263   :  { %9762 = vrsqrt.f32 %v6025_v13  ;;  %v6022_v24 = vmul.f32 0.015625, %v6014_v31 }
0x3265   :  { %v6026_v61 = vadd.f32 1e-05, %v6022_v24  ;;  %v8703_v48 = vpop.f32.mrb[84].mxu1 }
0x3266   :  { %v5978_v35 = vadd.f32 %v9819_v27, %v8703_v48  ;;  %v5972_v10 = vpop.f32.mrb[85].mxu1 }
0x3267   :  { %9764 = vrsqrt.f32 %v6026_v61  ;;  %v5973_v18 = vadd.f32 %v9819_v27, %v5972_v10 }
0x3268   :  { %v11423_v47 = vadd.f32 %v5978_v35, %v11776_v56 }
0x3269   :  { %v11426_v37 = vadd.f32 %v5973_v18, %v11777_v44 }
0x326a   :  { %v5994_v28 = vsel %vm163_vm1, %v11423_v47, 0.0 }
0x326b   :  { %5995 = vadd.xlane.f32.xlu1 %v5994_v28  ;;  %v5991_v60 = vsel %vm163_vm1, %v11426_v37, 0.0 }
0x326c   :  { %5992 = vadd.xlane.f32.xlu0 %v5991_v60 }
0x326d   :  { %v9763_v52 = vpop.eup %9762 }
0x326e   :  { %v6033_v26 = vmul.f32 %v9763_v52, %v6001_v6 }
0x3270   :  { %v6037_v45 = vmul.f32 %v11435_v2, %v6033_v26 }
0x3271   :  { %v9765_v9 = vpop.eup %9764 }
0x3272   :  { %v6041_v1 = vadd.f32 %v11441_v63, %v6037_v45  ;;  %v6034_v50 = vmul.f32 %v9765_v9, %v6002_v58 }
0x3274   :  { %7628 = vmatmul.mubr.msk.f32.vlgmr.msra.gmra.mrb[66].mxu0 %vm163_vm1, %v6041_v1  ;;  %v6038_v38 = vmul.f32 %v11435_v2, %v6034_v50 }
0x3275   :  { %6127 = vmatprep.mubr.f32.mxu0 %v11775_v30 }
0x3276   :  { %v6042_v23 = vadd.f32 %v11441_v63, %v6038_v38 }
0x3278   :  { %7629 = vmatmul.mubr.msk.f32.gmra.mrb[68].mxu0 %vm163_vm1, %v6042_v23 }
0x3279   :  { %6133 = vmatprep.mubr.f32.mxu0 %v11775_v30 }
0x32f8   :  { %v5996_v8 = vpop.xlane.xlu1 %5995 }
0x32f9   :  { %v6000_v57 = vmul.f32 0.015625, %v5996_v8  ;;  %v5993_v49 = vpop.xlane.xlu0 %5992 }
0x32fa   :  { %v5999_v20 = vmul.f32 0.015625, %v5993_v49 }
0x32fb   :  { %v6004_v17 = vsub.f32 %v11423_v47, %v6000_v57 }
0x32fc   :  { %v6003_v29 = vsub.f32 %v11426_v37, %v5999_v20 }
0x32fd   :  { %v6008_v3 = vmul.f32 %v6004_v17, %v6004_v17 }
0x32fe   :  { %v6007_v46 = vmul.f32 %v6003_v29, %v6003_v29 }
0x32ff   :  { %v6018_v27 = vsel %vm163_vm1, %v6008_v3, 0.0 }
0x3300   :  { %6019 = vadd.xlane.f32.xlu1 %v6018_v27  ;;  %v6015_v43 = vsel %vm163_vm1, %v6007_v46, 0.0 }
0x3301   :  { %6016 = vadd.xlane.f32.xlu0 %v6015_v43 }
0x3304   :  { %6351 = vadd.xlane.f32.xlu1 %v6350_v34 }
0x3305   :  { %6348 = vadd.xlane.f32.xlu0 %v6347_v62 }
0x3347   :  { %v6123_v7 = vpop.f32.mrb[66].mxu0 }
0x3348   :  { %v6124_v55 = vadd.f32 %v6123_v7, %v11778_v22  ;;  %v6125_v5 = vpop.f32.mrb[67].mxu0 }
0x3349   :  { %v6126_v40 = vadd.f32 %v6125_v5, %v11779_v36 }
0x334a   :  { %v6154_v51 = vmul.f32 0.70710677, %v6124_v55  ;;  %v6146_v19 = vmul.f32 0.5, %v6124_v55 }
0x334b   :  { %v6155_v53 = vmul.f32 0.70710677, %v6126_v40  ;;  %v6129_v41 = vpop.f32.mrb[68].mxu0  ;;  %v6147_v58 = vmul.f32 0.5, %v6126_v40 }
0x334c   :  { %9766 = verf.f32 %v6154_v51  ;;  %v6130_v25 = vadd.f32 %v6129_v41, %v11778_v22  ;;  %v6131_v4 = vpop.f32.mrb[69].mxu0 }
0x334d   :  { %9768 = verf.f32 %v6155_v53  ;;  %v6132_v32 = vadd.f32 %v6131_v4, %v11779_v36  ;;  %v6388_v4 = vld [vmem:[%s11755_s2 + $0x408] sm:$0xff] }
0x334e   :  { %v6156_v11 = vmul.f32 0.70710677, %v6130_v25  ;;  %v6148_v48 = vmul.f32 0.5, %v6130_v25  ;;  %v6386_v25 = vld [vmem:[%s11755_s2 + $0x3f8] sm:$0xff] }
0x334f   :  { %v6157_v6 = vmul.f32 0.70710677, %v6132_v32  ;;  %v6149_v24 = vmul.f32 0.5, %v6132_v32 }
0x3350   :  { %9770 = verf.f32 %v6156_v11  ;;  %v6389_v11 = vld [vmem:[%s11755_s2 + $0x410] sm:$0xff] }
0x3351   :  { %9772 = verf.f32 %v6157_v6  ;;  %v9331_v6 = vpack.c.bf16 %v6389_v11, %v6388_v4  ;;  %v6476_v4 = vld [vmem:[%s11755_s2 + $0x420] sm:$0xff]  ;;  %v6587_v11 = vld [vmem:[%s11755_s2 + $0x470] sm:$0xff] }
0x3356   :  { %v9767_v42 = vpop.eup %9766 }
0x3357   :  { %v9769_v39 = vpop.eup %9768  ;;  %v6170_v14 = vadd.f32 1.0, %v9767_v42 }
0x3358   :  { %v6171_v12 = vadd.f32 1.0, %v9769_v39 }
0x3359   :  { %v6178_v13 = vmul.f32 %v6170_v14, %v6146_v19 }
0x335a   :  { %v9771_v21 = vpop.eup %9770  ;;  %v6179_v0 = vmul.f32 %v6171_v12, %v6147_v58 }
0x335b   :  { %v9773_v33 = vpop.eup %9772  ;;  %v6172_v31 = vadd.f32 1.0, %v9771_v21 }
0x335c   :  { %v6173_v61 = vadd.f32 1.0, %v9773_v33  ;;  %6250 = vmatprep.mubr.f32.mxu1 %v6179_v0 }
0x335d   :  { %6251 = vmatmul.mubr.f32.vlgmr.msra.gmra.mrb[86].mxu1 %v6178_v13  ;;  %v6180_v10 = vmul.f32 %v6172_v31, %v6148_v48 }
0x335e   :  { %v6181_v35 = vmul.f32 %v6173_v61, %v6149_v24 }
0x3360   :  { %6255 = vmatprep.mubr.f32.mxu1 %v6181_v35 }
0x3361   :  { %6256 = vmatmul.mubr.f32.gmra.mrb[88].mxu1 %v6180_v10 }
0x338d   :  { %v6020_v18 = vpop.xlane.xlu1 %6019 }
0x338e   :  { %v6024_v56 = vmul.f32 0.015625, %v6020_v18  ;;  %v6017_v44 = vpop.xlane.xlu0 %6016 }
0x338f   :  { %v6023_v28 = vmul.f32 0.015625, %v6017_v44 }
0x3390   :  { %v6028_v60 = vadd.f32 1e-05, %v6024_v56 }
0x3391   :  { %v6027_v52 = vadd.f32 1e-05, %v6023_v28  ;;  %v6352_v20 = vpop.xlane.xlu1 %6351 }
0x3392   :  { %9774 = vrsqrt.f32 %v6028_v60  ;;  %v6349_v57 = vpop.xlane.xlu0 %6348  ;;  %v6355_v27 = vmul.f32 0.03125, %v6352_v20 }
0x3393   :  { %9776 = vrsqrt.f32 %v6027_v52  ;;  %v6354_v49 = vmul.f32 0.03125, %v6349_v57 }
0x3394   :  { %v11490_v55 = vsub.f32 %v11462_v54, %v6355_v27 }
0x3395   :  { %v11480_v46 = vsub.f32 %v11457_v59, %v6354_v49 }
0x3396   :  { %v6359_v41 = vmul.f32 %v11490_v55, %v11490_v55 }
0x3397   :  { %v6358_v59 = vmul.f32 %v11480_v46, %v11480_v46 }
0x3398   :  { %v6363_v54 = vsel %vm650_vm3, %v6359_v41, 0.0 }
0x3399   :  { %v6360_v53 = vsel %vm650_vm3, %v6358_v59, 0.0 }
0x339c   :  { %v9775_v26 = vpop.eup %9774 }
0x339d   :  { %v9777_v45 = vpop.eup %9776  ;;  %v6036_v1 = vmul.f32 %v9775_v26, %v6004_v17 }
0x339e   :  { %v6035_v9 = vmul.f32 %v9777_v45, %v6003_v29 }
0x339f   :  { %v6040_v23 = vmul.f32 %v11435_v2, %v6036_v1 }
0x33a0   :  { %v6039_v50 = vmul.f32 %v11435_v2, %v6035_v9  ;;  %v11485_v2 = vld [vmem:[%s11755_s2 + $0x3d0] ss:$0 sm:$0xff] }
0x33a1   :  { %v6044_v8 = vadd.f32 %v11441_v63, %v6040_v23 }
0x33a2   :  { %v6043_v38 = vadd.f32 %v11441_v63, %v6039_v50 }
0x33a4   :  { %7630 = vmatmul.mubr.msk.f32.gmra.mrb[70].mxu0 %vm163_vm1, %v6043_v38 }
0x33a5   :  { %6139 = vmatprep.mubr.f32.mxu0 %v11775_v30 }
0x33a8   :  { %7631 = vmatmul.mubr.msk.f32.gmra.mrb[72].mxu0 %vm163_vm1, %v6044_v8 }
0x3430   :  { %v8062_v3 = vpop.f32.mrb[86].mxu1 }
0x3431   :  { %v8063_v29 = vpop.f32.mrb[87].mxu1 }
0x3432   :  { %v8064_v17 = vadd.f32 %v8063_v29, %v8062_v3 }
0x3434   :  { %v6253_v43 = vadd.f32 %v11485_v2, %v8064_v17  ;;  %v8065_v63 = vpop.f32.mrb[88].mxu1 }
0x3435   :  { %v8066_v62 = vpop.f32.mrb[89].mxu1 }
0x3436   :  { %v8067_v34 = vadd.f32 %v8066_v62, %v8065_v63  ;;  %v6271_v7 = vadd.f32 %v6253_v43, %v11399_v16 }
0x3438   :  { %v6258_v5 = vadd.f32 %v11485_v2, %v8067_v34  ;;  %v6277_v40 = vsel %vm163_vm1, %v6271_v7, 0.0 }
0x3439   :  { %6278 = vadd.xlane.f32.xlu0 %v6277_v40 }
0x343a   :  { %v6272_v51 = vadd.f32 %v6258_v5, %v11402_v15  ;;  %v6387_v15 = vld [vmem:[%s11755_s2 + $0x400] sm:$0xff]  ;;  %v7634_v5 = vld [vmem:[%s11755_s2 + $0x3e8] ss:$0 sm:$0xff] }
0x343b   :  { %v9327_v32 = vpack.c.bf16 %v6387_v15, %v6386_v25 }
0x343c   :  { %v6280_v16 = vsel %vm163_vm1, %v6272_v51, 0.0 }
0x343d   :  { %6281 = vadd.xlane.f32.xlu1 %v6280_v16  ;;  %6361 = vadd.xlane.f32.xlu0 %v6360_v53 }
0x343e   :  { %9328 = vmatprep.subr.bf16.mxu0 %v9327_v32 }
0x343f   :  { %9330 = vmatpush3.bf16.msra.mxu0 %v9327_v32  ;;  %v6586_v32 = vld [vmem:[%s11755_s2 + $0x468] sm:$0xff] }
0x3440   :  { %9332 = vmatprep.subr.bf16.mxu0 %v9331_v6 }
0x3441   :  { %6364 = vadd.xlane.f32.xlu1 %v6363_v54 }
0x3443   :  { %9334 = vmatpush3.bf16.msra.mxu0 %v9331_v6  ;;  %v9351_v6 = vpack.c.bf16 %v6587_v11, %v6586_v32  ;;  %v7639_v11 = vld [vmem:[%s11755_s2 + $0x460] ss:$0 sm:$0xff] }
0x3445   :  { %9352 = vmatprep.subr.bf16.mxu1 %v9351_v6 }
0x3446   :  { %9354 = vmatpush3.bf16.msra.mxu1 %v9351_v6  ;;  %v7644_v6 = vld [vmem:[%s11755_s2 + $0x4a8] ss:$0 sm:$0xff] }
0x3477   :  { %v6135_v42 = vpop.f32.mrb[70].mxu0 }
0x3478   :  { %v6136_v39 = vadd.f32 %v6135_v42, %v11778_v22  ;;  %v6137_v14 = vpop.f32.mrb[71].mxu0  ;;  %v6588_v42 = vld [vmem:[%s11755_s2 + $0x478] sm:$0xff] }
0x3479   :  { %v6138_v58 = vadd.f32 %v6137_v14, %v11779_v36  ;;  %v6478_v14 = vld [vmem:[%s11755_s2 + $0x430] sm:$0xff] }
0x347a   :  { %v6158_v12 = vmul.f32 0.70710677, %v6136_v39  ;;  %v6150_v56 = vmul.f32 0.5, %v6136_v39  ;;  %v6589_v39 = vld [vmem:[%s11755_s2 + $0x480] sm:$0xff] }
0x347b   :  { %v6159_v19 = vmul.f32 0.70710677, %v6138_v58  ;;  %v6141_v21 = vpop.f32.mrb[72].mxu0  ;;  %v6151_v10 = vmul.f32 0.5, %v6138_v58  ;;  %v9355_v58 = vpack.c.bf16 %v6589_v39, %v6588_v42 }
0x347c   :  { %9778 = verf.f32 %v6158_v12  ;;  %v6142_v0 = vadd.f32 %v6141_v21, %v11778_v22  ;;  %v6143_v33 = vpop.f32.mrb[73].mxu0  ;;  %v6479_v12 = vld [vmem:[%s11755_s2 + $0x438] sm:$0xff]  ;;  %v6590_v21 = vld [vmem:[%s11755_s2 + $0x488] sm:$0xff] }
0x347d   :  { %9780 = verf.f32 %v6159_v19  ;;  %v6144_v13 = vadd.f32 %v6143_v33, %v11779_v36  ;;  %v9339_v19 = vpack.c.bf16 %v6479_v12, %v6478_v14  ;;  %9356 = vmatprep.subr.bf16.mxu1 %v9355_v58  ;;  %v6480_v33 = vld [vmem:[%s11755_s2 + $0x440] sm:$0xff] }
0x347e   :  { %v6160_v31 = vmul.f32 0.70710677, %v6142_v0  ;;  %v6152_v9 = vmul.f32 0.5, %v6142_v0  ;;  %v6591_v0 = vld [vmem:[%s11755_s2 + $0x490] sm:$0xff]  ;;  %9358 = vmatpush3.bf16.msra.mxu1 %v9355_v58 }
0x347f   :  { %v6161_v24 = vmul.f32 0.70710677, %v6144_v13  ;;  %v6153_v22 = vmul.f32 0.5, %v6144_v13  ;;  %v9359_v13 = vpack.c.bf16 %v6591_v0, %v6590_v21 }
0x3480   :  { %9782 = verf.f32 %v6160_v31  ;;  %v6481_v31 = vld [vmem:[%s11755_s2 + $0x448] sm:$0xff] }
0x3481   :  { %9784 = verf.f32 %v6161_v24  ;;  %v9343_v24 = vpack.c.bf16 %v6481_v31, %v6480_v33  ;;  %9360 = vmatprep.subr.bf16.mxu1 %v9359_v13 }
0x3482   :  { %9362 = vmatpush3.bf16.msra.mxu1 %v9359_v13 }
0x3486   :  { %v9779_v61 = vpop.eup %9778 }
0x3487   :  { %v9781_v48 = vpop.eup %9780  ;;  %v6174_v35 = vadd.f32 1.0, %v9779_v61  ;;  %v6482_v61 = vld [vmem:[%s11755_s2 + $0x450] sm:$0xff] }
0x3488   :  { %v6175_v18 = vadd.f32 1.0, %v9781_v48  ;;  %v6483_v48 = vld [vmem:[%s11755_s2 + $0x458] sm:$0xff] }
0x3489   :  { %v6182_v26 = vmul.f32 %v6174_v35, %v6150_v56  ;;  %v9347_v35 = vpack.c.bf16 %v6483_v48, %v6482_v61 }
0x348a   :  { %v9783_v44 = vpop.eup %9782  ;;  %v6183_v28 = vmul.f32 %v6175_v18, %v6151_v10  ;;  %v6592_v10 = vld [vmem:[%s11755_s2 + $0x498] sm:$0xff]  ;;  %v6593_v18 = vld [vmem:[%s11755_s2 + $0x4a0] sm:$0xff] }
0x348b   :  { %v9785_v60 = vpop.eup %9784  ;;  %v6176_v52 = vadd.f32 1.0, %v9783_v44  ;;  %v9363_v56 = vpack.c.bf16 %v6593_v18, %v6592_v10 }
0x348c   :  { %v6177_v45 = vadd.f32 1.0, %v9785_v60  ;;  %6260 = vmatprep.mubr.f32.mxu1 %v6183_v28 }
0x348d   :  { %6261 = vmatmul.mubr.f32.gmra.mrb[90].mxu1 %v6182_v26  ;;  %v6184_v1 = vmul.f32 %v6176_v52, %v6152_v9  ;;  %9364 = vmatprep.subr.bf16.mxu1 %v9363_v56 }
0x348e   :  { %v6185_v36 = vmul.f32 %v6177_v45, %v6153_v22  ;;  %9366 = vmatpush3.bf16.msra.mxu1 %v9363_v56 }
0x3490   :  { %6265 = vmatprep.mubr.f32.mxu1 %v6185_v36 }
0x3491   :  { %6266 = vmatmul.mubr.f32.gmra.mrb[92].mxu1 %v6184_v1 }
0x34c6   :  { %v6279_v50 = vpop.xlane.xlu0 %6278 }
0x34c7   :  { %v6289_v38 = vmul.f32 0.015625, %v6279_v50 }
0x34c9   :  { %v11518_v23 = vsub.f32 %v6271_v7, %v6289_v38 }
0x34ca   :  { %v6282_v8 = vpop.xlane.xlu1 %6281  ;;  %v6362_v57 = vpop.xlane.xlu0 %6361 }
0x34cb   :  { %v6290_v49 = vmul.f32 0.015625, %v6282_v8  ;;  %v6297_v20 = vmul.f32 %v11518_v23, %v11518_v23  ;;  %v6366_v3 = vmul.f32 0.03125, %v6362_v57 }
0x34cd   :  { %v11522_v29 = vsub.f32 %v6272_v51, %v6290_v49  ;;  %v6301_v17 = vsel %vm163_vm1, %v6297_v20, 0.0  ;;  %v6368_v27 = vadd.f32 1e-05, %v6366_v3  ;;  %v7635_v51 = vld [vmem:[%s11755_s2 + $0x3f0] ss:$0 sm:$0xff] }
0x34ce   :  { %6302 = vadd.xlane.f32.xlu0 %v6301_v17  ;;  %v6365_v43 = vpop.xlane.xlu1 %6364 }
0x34cf   :  { %v6298_v63 = vmul.f32 %v11522_v29, %v11522_v29  ;;  %9786 = vrsqrt.f32 %v6368_v27  ;;  %v6367_v62 = vmul.f32 0.03125, %v6365_v43  ;;  %v11594_v27 = vld [vmem:[%s11755_s2 + $0x3d8] ss:$0 sm:$0xff] }
0x34d1   :  { %v6304_v34 = vsel %vm163_vm1, %v6298_v63, 0.0  ;;  %v6369_v7 = vadd.f32 1e-05, %v6367_v62 }
0x34d2   :  { %6305 = vadd.xlane.f32.xlu1 %v6304_v34 }
0x34d3   :  { %9788 = vrsqrt.f32 %v6369_v7 }
0x34d9   :  { %v9787_v59 = vpop.eup %9786 }
0x34da   :  { %v6372_v40 = vmul.f32 %v9787_v59, %v11480_v46  ;;  %v6477_v46 = vld [vmem:[%s11755_s2 + $0x428] sm:$0xff]  ;;  %v7636_v59 = vld [vmem:[%s11755_s2 + $0x418] ss:$0 sm:$0xff] }
0x34dc   :  { %v6378_v53 = vmul.f32 %v7634_v5, %v6372_v40 }
0x34dd   :  { %v9789_v41 = vpop.eup %9788 }
0x34de   :  { %v6373_v16 = vmul.f32 %v9789_v41, %v11490_v55  ;;  %v6384_v54 = vadd.f32 %v7635_v51, %v6378_v53  ;;  %v9335_v55 = vpack.c.bf16 %v6477_v46, %v6476_v4 }
0x34e0   :  { %v6379_v25 = vmul.f32 %v7634_v5, %v6373_v16  ;;  %8712 = vmatprep.mubr.msk.f32.mxu0 %vm650_vm3, %v6384_v54  ;;  %9336 = vmatprep.subr.bf16.mxu0 %v9335_v55 }
0x34e2   :  { %v6385_v15 = vadd.f32 %v7635_v51, %v6379_v25  ;;  %v9830_v51 = vmov 0.0|0.0  }
0x34e3   :  { %9378 = vmatprep.subr.bf16.mxu1 %v9830_v51 }
0x34e4   :  { %8713 = vmatmul.mubr.msk.f32.vlgmr.msra.gmra.mrb[74].mxu0 %vm650_vm3, %v6385_v15 }
0x34e5   :  { %9338 = vmatpush3.bf16.msra.mxu0 %v9335_v55 }
0x34e6   :  { %9340 = vmatprep.subr.bf16.mxu0 %v9339_v19 }
0x34e9   :  { %9342 = vmatpush3.bf16.msra.mxu0 %v9339_v19 }
0x34ea   :  { %9344 = vmatprep.subr.bf16.mxu0 %v9343_v24 }
0x34ed   :  { %9346 = vmatpush3.bf16.msra.mxu0 %v9343_v24 }
0x34ee   :  { %9348 = vmatprep.subr.bf16.mxu0 %v9347_v35 }
0x34f1   :  { %9350 = vmatpush3.bf16.msra.mxu0 %v9347_v35 }
0x34f2   :  { %9367 = vmatprep.subr.bf16.mxu0 %v9830_v51 }
0x355b   :  { %v6303_v44 = vpop.xlane.xlu0 %6302 }
0x355c   :  { %v6313_v28 = vmul.f32 0.015625, %v6303_v44 }
0x355e   :  { %v6317_v60 = vadd.f32 1e-05, %v6313_v28 }
0x355f   :  { %v6306_v52 = vpop.xlane.xlu1 %6305 }
0x3560   :  { %9790 = vrsqrt.f32 %v6317_v60  ;;  %v6314_v26 = vmul.f32 0.015625, %v6306_v52  ;;  %v8068_v22 = vpop.f32.mrb[90].mxu1 }
0x3561   :  { %v8069_v45 = vpop.f32.mrb[91].mxu1 }
0x3562   :  { %v6318_v9 = vadd.f32 1e-05, %v6314_v26  ;;  %v8070_v36 = vadd.f32 %v8069_v45, %v8068_v22 }
0x3564   :  { %9792 = vrsqrt.f32 %v6318_v9  ;;  %v6263_v1 = vadd.f32 %v11485_v2, %v8070_v36  ;;  %v8071_v50 = vpop.f32.mrb[92].mxu1 }
0x3565   :  { %v8072_v38 = vpop.f32.mrb[93].mxu1 }
0x3566   :  { %v8073_v8 = vadd.f32 %v8072_v38, %v8071_v50  ;;  %v6273_v57 = vadd.f32 %v6263_v1, %v11426_v37  ;;  %v11601_v37 = vld [vmem:[%s11755_s2 + $0x3e0] ss:$0 sm:$0xff] }
0x3568   :  { %v6268_v49 = vadd.f32 %v11485_v2, %v8073_v8  ;;  %v6283_v20 = vsel %vm163_vm1, %v6273_v57, 0.0 }
0x3569   :  { %6284 = vadd.xlane.f32.xlu0 %v6283_v20 }
0x356a   :  { %v9791_v3 = vpop.eup %9790  ;;  %v6274_v17 = vadd.f32 %v6268_v49, %v11423_v47 }
0x356b   :  { %v6325_v43 = vmul.f32 %v9791_v3, %v11518_v23 }
0x356c   :  { %v6286_v63 = vsel %vm163_vm1, %v6274_v17, 0.0 }
0x356d   :  { %6287 = vadd.xlane.f32.xlu1 %v6286_v63  ;;  %v6333_v2 = vmul.f32 %v11594_v27, %v6325_v43 }
0x356e   :  { %v9793_v62 = vpop.eup %9792 }
0x356f   :  { %v6326_v47 = vmul.f32 %v9793_v62, %v11522_v29  ;;  %v6341_v34 = vadd.f32 %v11601_v37, %v6333_v2 }
0x3571   :  { %8731 = vmatprep.mubr.msk.f32.mxu0 %vm163_vm1, %v6341_v34  ;;  %8753 = vmatprep.mubr.msk.f32.mxu1 %vm163_vm1, %v6341_v34  ;;  %v6334_v23 = vmul.f32 %v11594_v27, %v6326_v47 }
0x3573   :  { %v6342_v7 = vadd.f32 %v11601_v37, %v6334_v23 }
0x3575   :  { %8732 = vmatmul.mubr.msk.f32.vlgmr.msra.gmra.mrb[76].mxu0 %vm163_vm1, %v6342_v7  ;;  %8754 = vmatmul.mubr.msk.f32.vlgmr.msra.gmra.mrb[94].mxu1 %vm163_vm1, %v6342_v7 }
0x35b7   :  { %v8714_v5 = vpop.f32.mrb[74].mxu0 }
0x35b8   :  { %v11615_v29 = vadd.f32 %v8714_v5, %v7636_v59  ;;  %v6467_v40 = vpop.f32.mrb[75].mxu0 }
0x35b9   :  { %v6468_v9 = vadd.f32 %v7636_v59, %v6467_v40 }
0x35f6   :  { %v6285_v53 = vpop.xlane.xlu0 %6284 }
0x35f7   :  { %v6291_v41 = vmul.f32 0.015625, %v6285_v53 }
0x35f9   :  { %v6295_v16 = vsub.f32 %v6273_v57, %v6291_v41 }
0x35fa   :  { %v6288_v54 = vpop.xlane.xlu1 %6287 }
0x35fb   :  { %v6292_v25 = vmul.f32 0.015625, %v6288_v54  ;;  %v6299_v15 = vmul.f32 %v6295_v16, %v6295_v16 }
0x35fd   :  { %v6296_v4 = vsub.f32 %v6274_v17, %v6292_v25  ;;  %v6307_v46 = vsel %vm163_vm1, %v6299_v15, 0.0 }
0x35fe   :  { %6308 = vadd.xlane.f32.xlu0 %v6307_v46 }
0x35ff   :  { %v6300_v32 = vmul.f32 %v6296_v4, %v6296_v4 }
0x3601   :  { %v6310_v55 = vsel %vm163_vm1, %v6300_v32, 0.0  ;;  %v7013_v32 = vld [vmem:[%s11755_s2 + $0x4b8] sm:$0xff] }
0x3602   :  { %6311 = vadd.xlane.f32.xlu1 %v6310_v55  ;;  %v7014_v55 = vld [vmem:[%s11755_s2 + $0x4c0] sm:$0xff] }
0x3648   :  { %v8733_v42 = vpop.f32.mrb[76].mxu0  ;;  %v8755_v39 = vpop.f32.mrb[94].mxu1 }
0x3649   :  { %v6573_v14 = vadd.f32 %v8733_v42, %v7639_v11  ;;  %v6671_v58 = vadd.f32 %v8755_v39, %v7644_v6  ;;  %v6567_v12 = vpop.f32.mrb[77].mxu0  ;;  %v6665_v19 = vpop.f32.mrb[95].mxu1 }
0x364a   :  { %v6568_v21 = vadd.f32 %v7639_v11, %v6567_v12  ;;  %v6666_v0 = vadd.f32 %v7644_v6, %v6665_v19 }
0x364c   :  { %v9368_v13 = vpack.c.bf16 %v6573_v14, %v6568_v21  ;;  %v9372_v31 = vpack.c.bf16 %v6671_v58, %v6666_v0  ;;  %v7657_v21 = vld [vmem:[%s11755_s2 + $0x4d0] ss:$0 sm:$0xff] }
0x364e   :  { %9370 = vmatpush3.bf16.xpose.msk.msra.mxu0 %vm11627_vm6, %v9368_v13 }
0x364f   :  { %9371 = vmatprep.subr.bf16.mxu0 %v9830_v51 }
0x368b   :  { %v6309_v24 = vpop.xlane.xlu0 %6308 }
0x368c   :  { %v6315_v61 = vmul.f32 0.015625, %v6309_v24 }
0x368e   :  { %v6319_v48 = vadd.f32 1e-05, %v6315_v61 }
0x368f   :  { %v6312_v35 = vpop.xlane.xlu1 %6311 }
0x3690   :  { %9794 = vrsqrt.f32 %v6319_v48  ;;  %v6316_v10 = vmul.f32 0.015625, %v6312_v35 }
0x3692   :  { %v6320_v18 = vadd.f32 1e-05, %v6316_v10 }
0x3694   :  { %9796 = vrsqrt.f32 %v6320_v18 }
0x369a   :  { %v9795_v56 = vpop.eup %9794 }
0x369b   :  { %v6327_v44 = vmul.f32 %v9795_v56, %v6295_v16 }
0x369d   :  { %v6335_v28 = vmul.f32 %v11594_v27, %v6327_v44 }
0x369e   :  { %v9797_v60 = vpop.eup %9796 }
0x369f   :  { %v6343_v52 = vadd.f32 %v11601_v37, %v6335_v28  ;;  %v6328_v26 = vmul.f32 %v9797_v60, %v6296_v4 }
0x36a1   :  { %8734 = vmatprep.mubr.msk.f32.mxu0 %vm163_vm1, %v6343_v52  ;;  %8756 = vmatprep.mubr.msk.f32.mxu1 %vm163_vm1, %v6343_v52  ;;  %v6336_v22 = vmul.f32 %v11594_v27, %v6328_v26 }
0x36a3   :  { %v6344_v45 = vadd.f32 %v11601_v37, %v6336_v22  ;;  %v7142_v22 = vld [vmem:[%s11755_s2 + $0x4e8] sm:$0xff] }
0x36a5   :  { %8735 = vmatmul.mubr.msk.f32.gmra.mrb[78].mxu0 %vm163_vm1, %v6344_v45  ;;  %8757 = vmatmul.mubr.msk.f32.gmra.mrb[96].mxu1 %vm163_vm1, %v6344_v45  ;;  %v7143_v45 = vld [vmem:[%s11755_s2 + $0x4f0] sm:$0xff] }
0x36a6   :  { %8763 = vmatprep.mubr.msk.f32.mxu0 %vm9831_vm7, %v11775_v30  ;;  %8784 = vmatprep.mubr.msk.f32.mxu1 %vm9831_vm7, %v11775_v30 }
0x36a9   :  { %8764 = vmatmul.mubr.msk.f32.vlgmr.msra.gmra.mrb[80].mxu0 %vm650_vm3, %v6468_v9  ;;  %v9389_v9 = vpack.c.bf16 %v7143_v45, %v7142_v22 }
0x36aa   :  { %9373 = vmatpush3.bf16.msra.mxu0 %v9372_v31  ;;  %8770 = vmatprep.mubr.msk.f32.mxu0 %vm9831_vm7, %v11775_v30 }
0x36ab   :  { %9374 = vmatprep.subr.bf16.mxu0 %v9830_v51 }
0x3778   :  { %v8736_v36 = vpop.f32.mrb[78].mxu0  ;;  %v8758_v1 = vpop.f32.mrb[96].mxu1 }
0x3779   :  { %v6583_v50 = vadd.f32 %v8736_v36, %v7639_v11  ;;  %v6681_v38 = vadd.f32 %v8758_v1, %v7644_v6  ;;  %v6577_v8 = vpop.f32.mrb[79].mxu0  ;;  %v6675_v57 = vpop.f32.mrb[97].mxu1  ;;  %v7144_v36 = vld [vmem:[%s11755_s2 + $0x4f8] sm:$0xff]  ;;  %v7145_v1 = vld [vmem:[%s11755_s2 + $0x500] sm:$0xff] }
0x377a   :  { %v6578_v49 = vadd.f32 %v7639_v11, %v6577_v8  ;;  %v6676_v20 = vadd.f32 %v7644_v6, %v6675_v57  ;;  %v7015_v6 = vld [vmem:[%s11755_s2 + $0x4c8] sm:$0xff] }
0x377b   :  { %v9385_v42 = vpack.c.bf16 %v7015_v6, %v7014_v55 }
0x377c   :  { %v9375_v3 = vpack.c.bf16 %v6583_v50, %v6578_v49  ;;  %v9379_v17 = vpack.c.bf16 %v6681_v38, %v6676_v20  ;;  %v6759_v27 = vpop.f32.mrb[80].mxu0  ;;  %v9393_v50 = vpack.c.bf16 %v7145_v1, %v7144_v36 }
0x377d   :  { %v6763_v43 = vmul.f32 0.17677669, %v6759_v27  ;;  %v8765_v63 = vpop.f32.mrb[81].mxu0  ;;  %v7660_v27 = vld [vmem:[%s11755_s2 + $0x4d8] ss:$0 sm:$0xff] }
0x377e   :  { %9380 = vmatpush3.bf16.msra.mxu1 %v9379_v17 }
0x377f   :  { %v6764_v37 = vsel %vm31_vm0, %v6763_v43, -inf  ;;  %9390 = vmatprep.subr.bf16.mxu1 %v9389_v9 }
0x3780   :  { %6765 = vmax.xlane.f32.xlu0 %v6764_v37 }
0x380d   :  { %v6766_v2 = vpop.xlane.xlu0 %6765 }
0x380e   :  { %v6767_v62 = vsub.f32 %v6763_v43, %v6766_v2  ;;  %v7661_v2 = vld [vmem:[%s11755_s2 + $0x4e0] ss:$0 sm:$0xff] }
0x3810   :  { %v6768_v47 = vmul.f32 1.442695, %v6767_v62 }
0x3812   :  { %9798 = vpow2.f32 %v6768_v47 }
0x381c   :  { %v9799_v34 = vpop.eup %9798 }
0x381d   :  { %v6770_v23 = vsel %vm31_vm0, %v9799_v34, 0.0 }
0x381e   :  { %6771 = vadd.xlane.f32.xlu1 %v6770_v23 }
0x38ab   :  { %v6772_v7 = vpop.xlane.xlu1 %6771 }
0x38ac   :  { %9800 = vrcp.f32 %v6772_v7  ;;  %v7242_v7 = vld [vmem:[%s11755_s2 + $0x510] sm:$0xff] }
0x38b6   :  { %v9801_v59 = vpop.eup %9800 }
0x38b7   :  { %v6774_v5 = vmul.f32 %v9801_v59, %v9799_v34  ;;  %v7243_v59 = vld [vmem:[%s11755_s2 + $0x518] sm:$0xff] }
0x38b9   :  { %8771 = vmatmul.mubr.msk.f32.vlgmr.msra.gmra.mrb[82].mxu0 %vm31_vm0, %v6774_v5  ;;  %v9397_v5 = vpack.c.bf16 %v7243_v59, %v7242_v7 }
0x38ba   :  { %9377 = vmatpush3.bf16.xpose.msk.msra.mxu0 %vm11627_vm6, %v9375_v3  ;;  %8777 = vmatprep.mubr.msk.f32.mxu0 %vm9831_vm7, %v11775_v30 }
0x38c1   :  { %8778 = vmatmul.mubr.msk.f32.vlgmr.msra.gmra.mrb[84].mxu0 %vm650_vm3, %v11615_v29  ;;  %v7012_v29 = vld [vmem:[%s11755_s2 + $0x4b0] sm:$0xff] }
0x38c2   :  { %v9381_v11 = vpack.c.bf16 %v7013_v32, %v7012_v29 }
0x38c4   :  { %9382 = vmatprep.subr.bf16.mxu0 %v9381_v11 }
0x38c5   :  { %9384 = vmatpush3.bf16.msra.mxu0 %v9381_v11 }
0x38c6   :  { %9386 = vmatprep.subr.bf16.mxu0 %v9385_v42 }
0x38c9   :  { %9388 = vmatpush3.bf16.msra.mxu0 %v9385_v42 }
0x38ca   :  { %9398 = vmatprep.subr.bf16.mxu0 %v9397_v5 }
0x398c   :  { %v6844_v40 = vpop.f32.mrb[82].mxu0 }
0x398d   :  { %v8772_v51 = vpop.f32.mrb[83].mxu0  ;;  %8795 = vmatprep.mubr.msk.f32.mxu0 %vm650_vm3, %v6844_v40  ;;  %v7244_v40 = vld [vmem:[%s11755_s2 + $0x520] sm:$0xff] }
0x398e   :  { %v7245_v51 = vld [vmem:[%s11755_s2 + $0x528] sm:$0xff] }
0x3994   :  { %v6923_v53 = vpop.f32.mrb[84].mxu0 }
0x3995   :  { %v6927_v41 = vmul.f32 0.17677669, %v6923_v53  ;;  %v8779_v16 = vpop.f32.mrb[85].mxu0  ;;  %v9401_v53 = vpack.c.bf16 %v7245_v51, %v7244_v40 }
0x3996   :  { %v7335_v16 = vld [vmem:[%s11756_s3 + $0xa0] sm:$0xff] }
0x3997   :  { %v6928_v54 = vsel %vm31_vm0, %v6927_v41, -inf }
0x3998   :  { %6929 = vmax.xlane.f32.xlu0 %v6928_v54 }
0x3a25   :  { %v6930_v25 = vpop.xlane.xlu0 %6929 }
0x3a26   :  { %v6931_v15 = vsub.f32 %v6927_v41, %v6930_v25  ;;  %v7334_v41 = vld [vmem:[%s11756_s3 + $0x90] sm:$0xff]  ;;  %v7662_v25 = vld [vmem:[%s11755_s2 + $0x508] ss:$0 sm:$0xff] }
0x3a27   :  { %v9405_v54 = vpack.c.bf16 %v7335_v16, %v7334_v41 }
0x3a28   :  { %v6932_v4 = vmul.f32 1.442695, %v6931_v15 }
0x3a2a   :  { %9802 = vpow2.f32 %v6932_v4 }
0x3a34   :  { %v9803_v46 = vpop.eup %9802 }
0x3a35   :  { %v6934_v30 = vsel %vm31_vm0, %v9803_v46, 0.0 }
0x3a36   :  { %6935 = vadd.xlane.f32.xlu1 %v6934_v30 }
0x3ac3   :  { %v6936_v39 = vpop.xlane.xlu1 %6935 }
0x3ac4   :  { %9804 = vrcp.f32 %v6936_v39 }
0x3ace   :  { %v9805_v14 = vpop.eup %9804 }
0x3acf   :  { %v6938_v58 = vmul.f32 %v9805_v14, %v9803_v46 }
0x3ad1   :  { %8785 = vmatmul.mubr.msk.f32.vlgmr.msra.gmra.mrb[98].mxu1 %vm31_vm0, %v6938_v58 }
0x3ad2   :  { %9392 = vmatpush3.bf16.msra.mxu1 %v9389_v9 }
0x3ad3   :  { %9394 = vmatprep.subr.bf16.mxu1 %v9393_v50 }
0x3ad6   :  { %9396 = vmatpush3.bf16.msra.mxu1 %v9393_v50 }
0x3ad7   :  { %9406 = vmatprep.subr.bf16.mxu1 %v9405_v54 }
0x3ba4   :  { %v7008_v12 = vpop.f32.mrb[98].mxu1 }
0x3ba5   :  { %v8786_v19 = vpop.f32.mrb[99].mxu1  ;;  %8796 = vmatmul.mubr.msk.f32.vlgmr.msra.gmra.mrb[86].mxu0 %vm650_vm3, %v7008_v12 }
0x3ba6   :  { %9400 = vmatpush3.bf16.msra.mxu0 %v9397_v5  ;;  %v7336_v19 = vld [vmem:[%s11756_s3 + $0xb0] sm:$0xff] }
0x3ba7   :  { %9402 = vmatprep.subr.bf16.mxu0 %v9401_v53 }
0x3baa   :  { %9404 = vmatpush3.bf16.msra.mxu0 %v9401_v53 }
0x3c78   :  { %v8797_v0 = vpop.f32.mrb[86].mxu0 }
0x3c79   :  { %v11677_v33 = vadd.f32 %v8797_v0, %v7657_v21  ;;  %v7093_v13 = vpop.f32.mrb[87].mxu0 }
0x3c7a   :  { %v11679_v31 = vadd.f32 %v7657_v21, %v7093_v13  ;;  %v7337_v21 = vld [vmem:[%s11756_s3 + $0xc0] sm:$0xff]  ;;  %v7665_v13 = vld [vmem:[%s11755_s2 + $0x530] ss:$0 sm:$0xff] }
0x3c7b   :  { %v7107_v24 = vsel %vm650_vm3, %v11677_v33, 0.0  ;;  %v9409_v0 = vpack.c.bf16 %v7337_v21, %v7336_v19 }
0x3c7c   :  { %7108 = vadd.xlane.f32.xlu1 %v7107_v24  ;;  %v7104_v61 = vsel %vm650_vm3, %v11679_v31, 0.0 }
0x3c7d   :  { %7105 = vadd.xlane.f32.xlu0 %v7104_v61 }
0x3d09   :  { %v7109_v48 = vpop.xlane.xlu1 %7108 }
0x3d0a   :  { %v7111_v35 = vmul.f32 0.03125, %v7109_v48  ;;  %v7106_v10 = vpop.xlane.xlu0 %7105 }
0x3d0b   :  { %v7110_v18 = vmul.f32 0.03125, %v7106_v10 }
0x3d0c   :  { %v7113_v56 = vsub.f32 %v11677_v33, %v7111_v35 }
0x3d0d   :  { %v7112_v44 = vsub.f32 %v11679_v31, %v7110_v18 }
0x3d0e   :  { %v7115_v28 = vmul.f32 %v7113_v56, %v7113_v56 }
0x3d0f   :  { %v7114_v60 = vmul.f32 %v7112_v44, %v7112_v44 }
0x3d10   :  { %v7119_v52 = vsel %vm650_vm3, %v7115_v28, 0.0 }
0x3d11   :  { %7120 = vadd.xlane.f32.xlu1 %v7119_v52  ;;  %v7116_v26 = vsel %vm650_vm3, %v7114_v60, 0.0 }
0x3d12   :  { %7117 = vadd.xlane.f32.xlu0 %v7116_v26 }
0x3d9e   :  { %v7121_v38 = vpop.xlane.xlu1 %7120 }
0x3d9f   :  { %v7123_v8 = vmul.f32 0.03125, %v7121_v38  ;;  %v7118_v57 = vpop.xlane.xlu0 %7117 }
0x3da0   :  { %v7122_v49 = vmul.f32 0.03125, %v7118_v57 }
0x3da1   :  { %v7125_v20 = vadd.f32 1e-05, %v7123_v8 }
0x3da2   :  { %v7124_v3 = vadd.f32 1e-05, %v7122_v49 }
0x3da3   :  { %9806 = vrsqrt.f32 %v7125_v20 }
0x3da4   :  { %9808 = vrsqrt.f32 %v7124_v3 }
0x3dad   :  { %v9807_v17 = vpop.eup %9806 }
0x3dae   :  { %v9809_v43 = vpop.eup %9808  ;;  %v7129_v63 = vmul.f32 %v9807_v17, %v7113_v56  ;;  %v7338_v56 = vld [vmem:[%s11756_s3 + $0xd0] ss:$0 sm:$0xff] }
0x3daf   :  { %v7128_v37 = vmul.f32 %v9809_v43, %v7112_v44 }
0x3db0   :  { %v7135_v62 = vmul.f32 %v7660_v27, %v7129_v63 }
0x3db1   :  { %v7134_v47 = vmul.f32 %v7660_v27, %v7128_v37 }
0x3db2   :  { %v7141_v23 = vadd.f32 %v7661_v2, %v7135_v62 }
0x3db3   :  { %v7140_v34 = vadd.f32 %v7661_v2, %v7134_v47 }
0x3db5   :  { %8806 = vmatprep.mubr.msk.f32.mxu1 %vm650_vm3, %v7140_v34 }
0x3db6   :  { %8807 = vmatmul.mubr.msk.f32.vlgmr.msra.gmra.mrb[100].mxu1 %vm650_vm3, %v7141_v23 }
0x3db7   :  { %9408 = vmatpush3.bf16.msra.mxu1 %v9405_v54 }
0x3db8   :  { %9410 = vmatprep.subr.bf16.mxu1 %v9409_v0 }
0x3dbb   :  { %9412 = vmatpush3.bf16.msra.mxu1 %v9409_v0 }
0x3e89   :  { %v8808_v15 = vpop.f32.mrb[100].mxu1 }
0x3e8a   :  { %v7229_v4 = vadd.f32 %v8808_v15, %v7662_v25  ;;  %v7223_v46 = vpop.f32.mrb[101].mxu1 }
0x3e8b   :  { %v7224_v30 = vadd.f32 %v7662_v25, %v7223_v46 }
0x3e8c   :  { %v7235_v29 = vmul.f32 0.70710677, %v7229_v4  ;;  %v7233_v14 = vmul.f32 0.5, %v7229_v4 }
0x3e8d   :  { %v7234_v32 = vmul.f32 0.70710677, %v7224_v30  ;;  %v7232_v42 = vmul.f32 0.5, %v7224_v30 }
0x3e8e   :  { %9810 = verf.f32 %v7235_v29 }
0x3e8f   :  { %9812 = verf.f32 %v7234_v32 }
0x3e98   :  { %v9811_v55 = vpop.eup %9810 }
0x3e99   :  { %v9813_v11 = vpop.eup %9812  ;;  %v7239_v6 = vadd.f32 1.0, %v9811_v55 }
0x3e9a   :  { %v7238_v39 = vadd.f32 1.0, %v9813_v11 }
0x3e9b   :  { %v7241_v12 = vmul.f32 %v7239_v6, %v7233_v14 }
0x3e9c   :  { %v7240_v58 = vmul.f32 %v7238_v39, %v7232_v42 }
0x3e9e   :  { %8817 = vmatprep.mubr.msk.f32.mxu0 %vm650_vm3, %v7240_v58 }
0x3e9f   :  { %8818 = vmatmul.mubr.msk.f32.vlgmr.msra.gmra.mrb[88].mxu0 %vm650_vm3, %v7241_v12 }
0x3f72   :  { %v8819_v24 = vpop.f32.mrb[88].mxu0 }
0x3f73   :  { %v7329_v61 = vadd.f32 %v8819_v24, %v7665_v13  ;;  %v7323_v48 = vpop.f32.mrb[89].mxu0 }
0x3f74   :  { %v7324_v35 = vadd.f32 %v7665_v13, %v7323_v48 }
0x3f75   :  { %v7333_v18 = vadd.f32 %v7329_v61, %v11677_v33 }
0x3f76   :  { %v7332_v10 = vadd.f32 %v7324_v35, %v11679_v31 }
0x3f78   :  { %8828 = vmatprep.mubr.msk.f32.mxu1 %vm650_vm3, %v7332_v10 }
0x3f79   :  { %8829 = vmatmul.mubr.msk.f32.vlgmr.msra.gmra.mrb[102].mxu1 %vm650_vm3, %v7333_v18 }
0x404c   :  { %v8830_v44 = vpop.f32.mrb[102].mxu1 }
0x404d   :  { %v7417_v28 = vadd.f32 %v8830_v44, %v7338_v56  ;;  %v7411_v60 = vpop.f32.mrb[103].mxu1 }
0x404e   :  { %v7412_v52 = vadd.f32 %v7411_v60, %v7338_v56 }
0x404f   :  { %7421 = vst [vmem:[%s11758_s4 + $0x8] sm:$0xff] %v7417_v28 }
0x4050   :  { %7420 = vst [vmem:[%s11758_s4] sm:$0xff] %v7412_v52 }

</bundles_post_ra>
